<compile_context>
chip_gen: v6e
topology: v6e:2x2x1
jax: 0.10.0
libtpu: 0.0.40
codegen_flags: <defaults>
</compile_context>

<pallas_src>
import jax
import jax.numpy as jnp
from jax import lax
from jax.experimental import pallas as pl
from jax.experimental.pallas import tpu as pltpu


# ----------------------------- configuration --------------------------------
N_DOWN, Z_DIM, IN_SIZE, IN_CH, N_CLASSES, BATCH = 2, 32, 16, 4, 10, 2
C1 = 64 * min(2 ** 0, 16)          # 64   channels after feature layer 0
C2 = 64 * min(2 ** 1, 16)          # 128  channels after feature layer 1
H1 = IN_SIZE // 2                  # 8    spatial after layer 0
H2 = IN_SIZE // 4                  # 4    spatial after layer 1 (= bottleneck_size)
P1 = H1 * H1                       # 64
P2 = H2 * H2                       # 16
K1 = IN_CH * 16                    # 64   im2col feature size of layer 0
EPS = 1e-5                         # PyTorch InstanceNorm2d eps
NEG_SLOPE = 0.2                    # LeakyReLU slope


# -------- host glue: layer-1 im2col (channels-last, parity-ordered rows) ----
def _im2col_parity(x):
    """NCHW (B, C, 16, 16) -> (B, 64, C*16) layer-1 patches.

    Patch feature order c*16 + i*4 + j matches torch Conv2d.weight.reshape(C_out,-1).
    Rows are ordered (dh, dw, H, W) with h = 2H+dh, w = 2W+dw, so the kernel can slice
    parity planes of the layer-1 output directly (no in-kernel transpose needed).
    """
    k, s, p = 4, 2, 1
    xp = jnp.pad(x, ((0, 0), (0, 0), (p, p), (p, p)))
    B, C, Hp, Wp = xp.shape
    Ho = (Hp - k) // s + 1
    Wo = (Wp - k) // s + 1
    cols = []
    for i in range(k):
        for j in range(k):
            cols.append(xp[:, :, i:i + s * Ho:s, j:j + s * Wo:s])   # (B, C, Ho, Wo)
    pt = jnp.stack(cols, axis=2).reshape(B, C * k * k, Ho, Wo)
    pt = pt.transpose(0, 2, 3, 1)                                    # (B, Ho, Wo, K)
    pt = pt.reshape(B, Ho // 2, 2, Wo // 2, 2, C * k * k)            # (B, H, dh, W, dw, K)
    pt = pt.transpose(0, 2, 4, 1, 3, 5)                              # (B, dh, dw, H, W, K)
    return pt.reshape(B, Ho * Wo, C * k * k)


# ------------------------------ fused kernel --------------------------------
def _fused_forward_kernel(p1_ref, w1_ref, g1_ref, b1_ref,
                          w2_ref, g2_ref, b2_ref,
                          wd_ref, bd_ref, wc_ref, bc_ref,
                          o_ref, planes_ref):
    # ---- layer 1: conv(4,2,1) as one MXU matmul + InstanceNorm + LeakyReLU ----
    y1 = jnp.dot(p1_ref[0], w1_ref[...], preferred_element_type=jnp.float32)   # (P1, C1) f32
    m1 = jnp.mean(y1, axis=0, keepdims=True)
    v1 = jnp.mean(y1 * y1, axis=0, keepdims=True) - m1 * m1                    # biased var, 1 pass
    y1 = (y1 - m1) * lax.rsqrt(v1 + EPS) * g1_ref[...] + b1_ref[...]
    y1 = jnp.where(y1 >= 0.0, y1, NEG_SLOPE * y1)

    # scatter layer-1 activations into zero-padded parity planes kept in VMEM:
    #   planes[dh*2+dw, 1+H, 1+W, :] = act(h=2H+dh, w=2W+dw)
    planes_ref[...] = jnp.zeros_like(planes_ref)
    for pp in range(4):                       # parity plane (dh, dw)
        for hh in range(H2):                  # block-row H
            planes_ref[pp, 1 + hh, 1:1 + H2, :] = (
                y1[pp * P2 + hh * H2: pp * P2 + (hh + 1) * H2, :])

    # ---- layer 2: conv(4,2,1) built in-kernel from the planes ------------------
    # For kernel offset (ki, kj): input (2*oh-1+ki, 2*ow-1+kj) lives in parity plane
    # (dh, dw) = ((ki-1)%2, (kj-1)%2) at block offset (oh+si, ow+sj), si=(ki-1)//2.
    acc = jnp.zeros((P2, C2), jnp.float32)
    for ki in range(4):
        dh, si = (ki - 1) % 2, (ki - 1) // 2
        for kj in range(4):
            dw, sj = (kj - 1) % 2, (kj - 1) // 2
            rows = [planes_ref[dh * 2 + dw, 1 + si + oh, 1 + sj:1 + sj + H2, :]
                    for oh in range(H2)]                       # H2 x (H2, C1)
            patch = jnp.concatenate(rows, axis=0)              # (P2, C1), rows = oh*H2+ow
            acc = acc + jnp.dot(patch.astype(jnp.bfloat16), w2_ref[ki * 4 + kj],
                                preferred_element_type=jnp.float32)
    m2 = jnp.mean(acc, axis=0, keepdims=True)
    v2 = jnp.mean(acc * acc, axis=0, keepdims=True) - m2 * m2
    y2 = (acc - m2) * lax.rsqrt(v2 + EPS) * g2_ref[...] + b2_ref[...]
    y2 = jnp.where(y2 >= 0.0, y2, NEG_SLOPE * y2)              # (P2, C2) f32

    # ---- head: dense_encode (full-spatial conv w/ bias) + Linear classifier ----
    y2b = y2.astype(jnp.bfloat16)
    z = bd_ref[...]                                            # (1, Z_DIM) f32
    for p2 in range(P2):
        z = z + jnp.dot(y2b[p2:p2 + 1, :], wd_ref[p2],
                        preferred_element_type=jnp.float32)
    logits = jnp.dot(z, wc_ref[...], preferred_element_type=jnp.float32) + bc_ref[...]
    o_ref[0] = logits                                          # (1, N_CLASSES)


# ------------------------------- wrapper -------------------------------------
@jax.jit
def model_forward(x, params):
    (w1, g1, b1), (w2, g2, b2), (wd, bd), (wc, bc) = params
    B = x.shape[0]

    patches = _im2col_parity(x).astype(jnp.bfloat16)                       # (B, P1, K1)
    w1m = w1.reshape(C1, K1).T.astype(jnp.bfloat16)                        # (K1, C1)
    w2m = w2.transpose(2, 3, 1, 0).reshape(16, C1, C2).astype(jnp.bfloat16)    # (kk, Cin, Cout)
    wdm = wd.transpose(2, 3, 1, 0).reshape(P2, C2, Z_DIM).astype(jnp.bfloat16)  # (p2, C2, z)
    wcm = wc.T.astype(jnp.float32)                                         # (Z_DIM, N_CLASSES)

    out = pl.pallas_call(
        _fused_forward_kernel,
        out_shape=jax.ShapeDtypeStruct((B, 1, N_CLASSES), jnp.float32),
        grid=(B,),
        in_specs=[
            pl.BlockSpec((1, P1, K1), lambda b: (b, 0, 0)),      # per-sample patches
            pl.BlockSpec((K1, C1), lambda b: (0, 0)),            # conv1 weight
            pl.BlockSpec((1, C1), lambda b: (0, 0)),             # IN1 gamma
            pl.BlockSpec((1, C1), lambda b: (0, 0)),             # IN1 beta
            pl.BlockSpec((16, C1, C2), lambda b: (0, 0, 0)),     # conv2 weight (per-offset)
            pl.BlockSpec((1, C2), lambda b: (0, 0)),             # IN2 gamma
            pl.BlockSpec((1, C2), lambda b: (0, 0)),             # IN2 beta
            pl.BlockSpec((P2, C2, Z_DIM), lambda b: (0, 0, 0)),  # dense_encode weight
            pl.BlockSpec((1, Z_DIM), lambda b: (0, 0)),          # dense_encode bias
            pl.BlockSpec((Z_DIM, N_CLASSES), lambda b: (0, 0)),  # classifier weight
            pl.BlockSpec((1, N_CLASSES), lambda b: (0, 0)),      # classifier bias
        ],
        out_specs=pl.BlockSpec((1, 1, N_CLASSES), lambda b: (b, 0, 0)),
        scratch_shapes=[pltpu.VMEM((4, H2 + 2, H2 + 2, C1), jnp.float32)],  # padded parity planes
        compiler_params=pltpu.CompilerParams(dimension_semantics=("parallel",)),
    )(patches, w1m,
      g1.reshape(1, C1).astype(jnp.float32), b1.reshape(1, C1).astype(jnp.float32),
      w2m,
      g2.reshape(1, C2).astype(jnp.float32), b2.reshape(1, C2).astype(jnp.float32),
      wdm, bd.reshape(1, Z_DIM).astype(jnp.float32),
      wcm, bc.reshape(1, N_CLASSES).astype(jnp.float32))
    return out[:, 0, :]


# ------------- parameter construction (mirrors weights_init) -----------------
def init_params(key):
    key, k1, k2, k3, k4 = jax.random.split(key, 5)
    w1 = 0.02 * jax.random.normal(k1, (C1, IN_CH, 4, 4), jnp.float32)      # conv ~ N(0, 0.02)
    g1, b1 = jnp.ones((C1,), jnp.float32), jnp.zeros((C1,), jnp.float32)   # IN affine defaults
    w2 = 0.02 * jax.random.normal(k2, (C2, C1, 4, 4), jnp.float32)
    g2, b2 = jnp.ones((C2,), jnp.float32), jnp.zeros((C2,), jnp.float32)
    wd = 0.02 * jax.random.normal(k3, (Z_DIM, C2, H2, H2), jnp.float32)    # dense_encode conv
    bd = jnp.zeros((Z_DIM,), jnp.float32)
    wc = 0.1 * jax.random.normal(k4, (N_CLASSES, Z_DIM), jnp.float32)      # classifier Linear
    bc = jnp.zeros((N_CLASSES,), jnp.float32)
    return (w1, g1, b1), (w2, g2, b2), (wd, bd), (wc, bc)


# -----------------------------------------------------------------------------
if __name__ == "__main__":
    key = jax.random.PRNGKey(0)
    key, kx = jax.random.split(key)
    x = jax.random.normal(kx, (BATCH, IN_CH, IN_SIZE, IN_SIZE), jnp.float32)
    params = init_params(key)

    logits = model_forward(x, params)
    logits = jax.block_until_ready(logits)

    assert logits.shape == (BATCH, N_CLASSES), logits.shape
    assert bool(jnp.all(jnp.isfinite(logits)))
    print("KERNEL_OK")
</pallas_src>

<mosaic_0001>
module attributes {stable_mosaic.version = 11 : i64} {
  func.func @_fused_forward_kernel(%arg0: i32, %arg1: memref<1x64x64xbf16, #tpu.memory_space<vmem>>, %arg2: memref<64x64xbf16, #tpu.memory_space<vmem>>, %arg3: memref<1x64xf32, #tpu.memory_space<vmem>>, %arg4: memref<1x64xf32, #tpu.memory_space<vmem>>, %arg5: memref<16x64x128xbf16, #tpu.memory_space<vmem>>, %arg6: memref<1x128xf32, #tpu.memory_space<vmem>>, %arg7: memref<1x128xf32, #tpu.memory_space<vmem>>, %arg8: memref<16x128x32xbf16, #tpu.memory_space<vmem>>, %arg9: memref<1x32xf32, #tpu.memory_space<vmem>>, %arg10: memref<32x10xf32, #tpu.memory_space<vmem>>, %arg11: memref<1x10xf32, #tpu.memory_space<vmem>>, %arg12: memref<1x1x10xf32, #tpu.memory_space<vmem>>, %arg13: memref<4x6x6x64xf32, #tpu.memory_space<vmem>>) attributes {dimension_semantics = [#tpu.dimension_semantics<parallel>], iteration_bounds = array<i64: 2>, scalar_prefetch = 0 : i64, scratch_operands = 1 : i64, tpu.core_type = #tpu.core_type<tc>, window_params = [{transform_indices = @transform_0, window_bounds = array<i64: 1, 64, 64>}, {pipeline_mode = #tpu.pipeline_mode<synchronous>, transform_indices = @transform_1, window_bounds = array<i64: 64, 64>}, {pipeline_mode = #tpu.pipeline_mode<synchronous>, transform_indices = @transform_2, window_bounds = array<i64: 1, 64>}, {pipeline_mode = #tpu.pipeline_mode<synchronous>, transform_indices = @transform_3, window_bounds = array<i64: 1, 64>}, {pipeline_mode = #tpu.pipeline_mode<synchronous>, transform_indices = @transform_4, window_bounds = array<i64: 16, 64, 128>}, {pipeline_mode = #tpu.pipeline_mode<synchronous>, transform_indices = @transform_5, window_bounds = array<i64: 1, 128>}, {pipeline_mode = #tpu.pipeline_mode<synchronous>, transform_indices = @transform_6, window_bounds = array<i64: 1, 128>}, {pipeline_mode = #tpu.pipeline_mode<synchronous>, transform_indices = @transform_7, window_bounds = array<i64: 16, 128, 32>}, {pipeline_mode = #tpu.pipeline_mode<synchronous>, transform_indices = @transform_8, window_bounds = array<i64: 1, 32>}, {pipeline_mode = #tpu.pipeline_mode<synchronous>, transform_indices = @transform_9, window_bounds = array<i64: 32, 10>}, {pipeline_mode = #tpu.pipeline_mode<synchronous>, transform_indices = @transform_10, window_bounds = array<i64: 1, 10>}, {transform_indices = @transform_11, window_bounds = array<i64: 1, 1, 10>}]} {
    %c0 = arith.constant 0 : index
    %c0_0 = arith.constant 0 : index
    %c0_1 = arith.constant 0 : index
    %0 = vector.load %arg1[%c0, %c0_0, %c0_1] : memref<1x64x64xbf16, #tpu.memory_space<vmem>>, vector<1x64x64xbf16>
    %1 = vector.shape_cast %0 : vector<1x64x64xbf16> to vector<64x64xbf16>
    %c0_2 = arith.constant 0 : index
    %c0_3 = arith.constant 0 : index
    %2 = vector.load %arg2[%c0_2, %c0_3] : memref<64x64xbf16, #tpu.memory_space<vmem>>, vector<64x64xbf16>
    %cst = arith.constant dense<0.000000e+00> : vector<64x64xf32>
    %3 = tpu.matmul %1, %2, %cst {dimension_numbers = #tpu.dot_dimension_numbers<[1], [0], [0], [1], [0, 0, 1, 1], [], []>} : vector<64x64xbf16>, vector<64x64xbf16>, vector<64x64xf32> -> vector<64x64xf32>
    %cst_4 = arith.constant dense<0.000000e+00> : vector<64xf32>
    %4 = vector.multi_reduction <add>, %3, %cst_4 [0] : vector<64x64xf32> to vector<64xf32>
    %5 = vector.shape_cast %4 : vector<64xf32> to vector<1x64xf32>
    %cst_5 = arith.constant 6.400000e+01 : f32
    %6 = vector.broadcast %cst_5 : f32 to vector<1x64xf32>
    %7 = arith.divf %5, %6 : vector<1x64xf32>
    %8 = arith.mulf %3, %3 : vector<64x64xf32>
    %cst_6 = arith.constant dense<0.000000e+00> : vector<64xf32>
    %9 = vector.multi_reduction <add>, %8, %cst_6 [0] : vector<64x64xf32> to vector<64xf32>
    %10 = vector.shape_cast %9 : vector<64xf32> to vector<1x64xf32>
    %cst_7 = arith.constant 6.400000e+01 : f32
    %11 = vector.broadcast %cst_7 : f32 to vector<1x64xf32>
    %12 = arith.divf %10, %11 : vector<1x64xf32>
    %13 = arith.mulf %7, %7 : vector<1x64xf32>
    %14 = arith.subf %12, %13 : vector<1x64xf32>
    %15 = vector.broadcast %7 : vector<1x64xf32> to vector<64x64xf32>
    %16 = arith.subf %3, %15 : vector<64x64xf32>
    %cst_8 = arith.constant 9.99999974E-6 : f32
    %17 = vector.broadcast %cst_8 : f32 to vector<1x64xf32>
    %18 = arith.addf %14, %17 : vector<1x64xf32>
    %19 = math.rsqrt %18 : vector<1x64xf32>
    %20 = vector.broadcast %19 : vector<1x64xf32> to vector<64x64xf32>
    %21 = arith.mulf %16, %20 : vector<64x64xf32>
    %c0_9 = arith.constant 0 : index
    %c0_10 = arith.constant 0 : index
    %22 = vector.load %arg3[%c0_9, %c0_10] : memref<1x64xf32, #tpu.memory_space<vmem>>, vector<1x64xf32>
    %23 = vector.broadcast %22 : vector<1x64xf32> to vector<64x64xf32>
    %24 = arith.mulf %21, %23 : vector<64x64xf32>
    %c0_11 = arith.constant 0 : index
    %c0_12 = arith.constant 0 : index
    %25 = vector.load %arg4[%c0_11, %c0_12] : memref<1x64xf32, #tpu.memory_space<vmem>>, vector<1x64xf32>
    %26 = vector.broadcast %25 : vector<1x64xf32> to vector<64x64xf32>
    %27 = arith.addf %24, %26 : vector<64x64xf32>
    %cst_13 = arith.constant 0.000000e+00 : f32
    %28 = vector.broadcast %cst_13 : f32 to vector<64x64xf32>
    %29 = arith.cmpf oge, %27, %28 : vector<64x64xf32>
    %cst_14 = arith.constant 2.000000e-01 : f32
    %30 = vector.broadcast %cst_14 : f32 to vector<64x64xf32>
    %31 = arith.mulf %30, %27 : vector<64x64xf32>
    %32 = arith.select %29, %27, %31 : vector<64x64xi1>, vector<64x64xf32>
    %cst_15 = arith.constant 0.000000e+00 : f32
    %33 = vector.broadcast %cst_15 : f32 to vector<4x6x6x64xf32>
    %c0_16 = arith.constant 0 : index
    %c0_17 = arith.constant 0 : index
    %c0_18 = arith.constant 0 : index
    %c0_19 = arith.constant 0 : index
    %34 = vector.load %arg13[%c0_16, %c0_17, %c0_18, %c0_19] : memref<4x6x6x64xf32, #tpu.memory_space<vmem>>, vector<4x6x6x64xf32>
    tpu.vector_store %arg13[%c0_16, %c0_17, %c0_18, %c0_19], %33 {strides = array<i32>} : memref<4x6x6x64xf32, #tpu.memory_space<vmem>>, vector<4x6x6x64xf32>,
    %35 = vector.extract_strided_slice %32 {offsets = [0, 0], sizes = [4, 64], strides = [1, 1]} : vector<64x64xf32> to vector<4x64xf32>
    %c0_20 = arith.constant 0 : index
    %c1 = arith.constant 1 : index
    %c1_21 = arith.constant 1 : index
    %c0_22 = arith.constant 0 : index
    %36 = vector.load %arg13[%c0_20, %c1, %c1_21, %c0_22] : memref<4x6x6x64xf32, #tpu.memory_space<vmem>>, vector<1x1x4x64xf32>
    %37 = vector.shape_cast %36 : vector<1x1x4x64xf32> to vector<4x64xf32>
    %38 = vector.shape_cast %35 : vector<4x64xf32> to vector<1x1x4x64xf32>
    tpu.vector_store %arg13[%c0_20, %c1, %c1_21, %c0_22], %38 {strides = array<i32>} : memref<4x6x6x64xf32, #tpu.memory_space<vmem>>, vector<1x1x4x64xf32>,
    %39 = vector.extract_strided_slice %32 {offsets = [4, 0], sizes = [4, 64], strides = [1, 1]} : vector<64x64xf32> to vector<4x64xf32>
    %c0_23 = arith.constant 0 : index
    %c2 = arith.constant 2 : index
    %c1_24 = arith.constant 1 : index
    %c0_25 = arith.constant 0 : index
    %40 = vector.load %arg13[%c0_23, %c2, %c1_24, %c0_25] : memref<4x6x6x64xf32, #tpu.memory_space<vmem>>, vector<1x1x4x64xf32>
    %41 = vector.shape_cast %40 : vector<1x1x4x64xf32> to vector<4x64xf32>
    %42 = vector.shape_cast %39 : vector<4x64xf32> to vector<1x1x4x64xf32>
    tpu.vector_store %arg13[%c0_23, %c2, %c1_24, %c0_25], %42 {strides = array<i32>} : memref<4x6x6x64xf32, #tpu.memory_space<vmem>>, vector<1x1x4x64xf32>,
    %43 = vector.extract_strided_slice %32 {offsets = [8, 0], sizes = [4, 64], strides = [1, 1]} : vector<64x64xf32> to vector<4x64xf32>
    %c0_26 = arith.constant 0 : index
    %c3 = arith.constant 3 : index
    %c1_27 = arith.constant 1 : index
    %c0_28 = arith.constant 0 : index
    %44 = vector.load %arg13[%c0_26, %c3, %c1_27, %c0_28] : memref<4x6x6x64xf32, #tpu.memory_space<vmem>>, vector<1x1x4x64xf32>
    %45 = vector.shape_cast %44 : vector<1x1x4x64xf32> to vector<4x64xf32>
    %46 = vector.shape_cast %43 : vector<4x64xf32> to vector<1x1x4x64xf32>
    tpu.vector_store %arg13[%c0_26, %c3, %c1_27, %c0_28], %46 {strides = array<i32>} : memref<4x6x6x64xf32, #tpu.memory_space<vmem>>, vector<1x1x4x64xf32>,
    %47 = vector.extract_strided_slice %32 {offsets = [12, 0], sizes = [4, 64], strides = [1, 1]} : vector<64x64xf32> to vector<4x64xf32>
    %c0_29 = arith.constant 0 : index
    %c4 = arith.constant 4 : index
    %c1_30 = arith.constant 1 : index
    %c0_31 = arith.constant 0 : index
    %48 = vector.load %arg13[%c0_29, %c4, %c1_30, %c0_31] : memref<4x6x6x64xf32, #tpu.memory_space<vmem>>, vector<1x1x4x64xf32>
    %49 = vector.shape_cast %48 : vector<1x1x4x64xf32> to vector<4x64xf32>
    %50 = vector.shape_cast %47 : vector<4x64xf32> to vector<1x1x4x64xf32>
    tpu.vector_store %arg13[%c0_29, %c4, %c1_30, %c0_31], %50 {strides = array<i32>} : memref<4x6x6x64xf32, #tpu.memory_space<vmem>>, vector<1x1x4x64xf32>,
    %51 = vector.extract_strided_slice %32 {offsets = [16, 0], sizes = [4, 64], strides = [1, 1]} : vector<64x64xf32> to vector<4x64xf32>
    %c1_32 = arith.constant 1 : index
    %c1_33 = arith.constant 1 : index
    %c1_34 = arith.constant 1 : index
    %c0_35 = arith.constant 0 : index
    %52 = vector.load %arg13[%c1_32, %c1_33, %c1_34, %c0_35] : memref<4x6x6x64xf32, #tpu.memory_space<vmem>>, vector<1x1x4x64xf32>
    %53 = vector.shape_cast %52 : vector<1x1x4x64xf32> to vector<4x64xf32>
    %54 = vector.shape_cast %51 : vector<4x64xf32> to vector<1x1x4x64xf32>
    tpu.vector_store %arg13[%c1_32, %c1_33, %c1_34, %c0_35], %54 {strides = array<i32>} : memref<4x6x6x64xf32, #tpu.memory_space<vmem>>, vector<1x1x4x64xf32>,
    %55 = vector.extract_strided_slice %32 {offsets = [20, 0], sizes = [4, 64], strides = [1, 1]} : vector<64x64xf32> to vector<4x64xf32>
    %c1_36 = arith.constant 1 : index
    %c2_37 = arith.constant 2 : index
    %c1_38 = arith.constant 1 : index
    %c0_39 = arith.constant 0 : index
    %56 = vector.load %arg13[%c1_36, %c2_37, %c1_38, %c0_39] : memref<4x6x6x64xf32, #tpu.memory_space<vmem>>, vector<1x1x4x64xf32>
    %57 = vector.shape_cast %56 : vector<1x1x4x64xf32> to vector<4x64xf32>
    %58 = vector.shape_cast %55 : vector<4x64xf32> to vector<1x1x4x64xf32>
    tpu.vector_store %arg13[%c1_36, %c2_37, %c1_38, %c0_39], %58 {strides = array<i32>} : memref<4x6x6x64xf32, #tpu.memory_space<vmem>>, vector<1x1x4x64xf32>,
    %59 = vector.extract_strided_slice %32 {offsets = [24, 0], sizes = [4, 64], strides = [1, 1]} : vector<64x64xf32> to vector<4x64xf32>
    %c1_40 = arith.constant 1 : index
    %c3_41 = arith.constant 3 : index
    %c1_42 = arith.constant 1 : index
    %c0_43 = arith.constant 0 : index
    %60 = vector.load %arg13[%c1_40, %c3_41, %c1_42, %c0_43] : memref<4x6x6x64xf32, #tpu.memory_space<vmem>>, vector<1x1x4x64xf32>
    %61 = vector.shape_cast %60 : vector<1x1x4x64xf32> to vector<4x64xf32>
    %62 = vector.shape_cast %59 : vector<4x64xf32> to vector<1x1x4x64xf32>
    tpu.vector_store %arg13[%c1_40, %c3_41, %c1_42, %c0_43], %62 {strides = array<i32>} : memref<4x6x6x64xf32, #tpu.memory_space<vmem>>, vector<1x1x4x64xf32>,
    %63 = vector.extract_strided_slice %32 {offsets = [28, 0], sizes = [4, 64], strides = [1, 1]} : vector<64x64xf32> to vector<4x64xf32>
    %c1_44 = arith.constant 1 : index
    %c4_45 = arith.constant 4 : index
    %c1_46 = arith.constant 1 : index
    %c0_47 = arith.constant 0 : index
    %64 = vector.load %arg13[%c1_44, %c4_45, %c1_46, %c0_47] : memref<4x6x6x64xf32, #tpu.memory_space<vmem>>, vector<1x1x4x64xf32>
    %65 = vector.shape_cast %64 : vector<1x1x4x64xf32> to vector<4x64xf32>
    %66 = vector.shape_cast %63 : vector<4x64xf32> to vector<1x1x4x64xf32>
    tpu.vector_store %arg13[%c1_44, %c4_45, %c1_46, %c0_47], %66 {strides = array<i32>} : memref<4x6x6x64xf32, #tpu.memory_space<vmem>>, vector<1x1x4x64xf32>,
    %67 = vector.extract_strided_slice %32 {offsets = [32, 0], sizes = [4, 64], strides = [1, 1]} : vector<64x64xf32> to vector<4x64xf32>
    %c2_48 = arith.constant 2 : index
    %c1_49 = arith.constant 1 : index
    %c1_50 = arith.constant 1 : index
    %c0_51 = arith.constant 0 : index
    %68 = vector.load %arg13[%c2_48, %c1_49, %c1_50, %c0_51] : memref<4x6x6x64xf32, #tpu.memory_space<vmem>>, vector<1x1x4x64xf32>
    %69 = vector.shape_cast %68 : vector<1x1x4x64xf32> to vector<4x64xf32>
    %70 = vector.shape_cast %67 : vector<4x64xf32> to vector<1x1x4x64xf32>
    tpu.vector_store %arg13[%c2_48, %c1_49, %c1_50, %c0_51], %70 {strides = array<i32>} : memref<4x6x6x64xf32, #tpu.memory_space<vmem>>, vector<1x1x4x64xf32>,
    %71 = vector.extract_strided_slice %32 {offsets = [36, 0], sizes = [4, 64], strides = [1, 1]} : vector<64x64xf32> to vector<4x64xf32>
    %c2_52 = arith.constant 2 : index
    %c2_53 = arith.constant 2 : index
    %c1_54 = arith.constant 1 : index
    %c0_55 = arith.constant 0 : index
    %72 = vector.load %arg13[%c2_52, %c2_53, %c1_54, %c0_55] : memref<4x6x6x64xf32, #tpu.memory_space<vmem>>, vector<1x1x4x64xf32>
    %73 = vector.shape_cast %72 : vector<1x1x4x64xf32> to vector<4x64xf32>
    %74 = vector.shape_cast %71 : vector<4x64xf32> to vector<1x1x4x64xf32>
    tpu.vector_store %arg13[%c2_52, %c2_53, %c1_54, %c0_55], %74 {strides = array<i32>} : memref<4x6x6x64xf32, #tpu.memory_space<vmem>>, vector<1x1x4x64xf32>,
    %75 = vector.extract_strided_slice %32 {offsets = [40, 0], sizes = [4, 64], strides = [1, 1]} : vector<64x64xf32> to vector<4x64xf32>
    %c2_56 = arith.constant 2 : index
    %c3_57 = arith.constant 3 : index
    %c1_58 = arith.constant 1 : index
    %c0_59 = arith.constant 0 : index
    %76 = vector.load %arg13[%c2_56, %c3_57, %c1_58, %c0_59] : memref<4x6x6x64xf32, #tpu.memory_space<vmem>>, vector<1x1x4x64xf32>
    %77 = vector.shape_cast %76 : vector<1x1x4x64xf32> to vector<4x64xf32>
    %78 = vector.shape_cast %75 : vector<4x64xf32> to vector<1x1x4x64xf32>
    tpu.vector_store %arg13[%c2_56, %c3_57, %c1_58, %c0_59], %78 {strides = array<i32>} : memref<4x6x6x64xf32, #tpu.memory_space<vmem>>, vector<1x1x4x64xf32>,
    %79 = vector.extract_strided_slice %32 {offsets = [44, 0], sizes = [4, 64], strides = [1, 1]} : vector<64x64xf32> to vector<4x64xf32>
    %c2_60 = arith.constant 2 : index
    %c4_61 = arith.constant 4 : index
    %c1_62 = arith.constant 1 : index
    %c0_63 = arith.constant 0 : index
    %80 = vector.load %arg13[%c2_60, %c4_61, %c1_62, %c0_63] : memref<4x6x6x64xf32, #tpu.memory_space<vmem>>, vector<1x1x4x64xf32>
    %81 = vector.shape_cast %80 : vector<1x1x4x64xf32> to vector<4x64xf32>
    %82 = vector.shape_cast %79 : vector<4x64xf32> to vector<1x1x4x64xf32>
    tpu.vector_store %arg13[%c2_60, %c4_61, %c1_62, %c0_63], %82 {strides = array<i32>} : memref<4x6x6x64xf32, #tpu.memory_space<vmem>>, vector<1x1x4x64xf32>,
    %83 = vector.extract_strided_slice %32 {offsets = [48, 0], sizes = [4, 64], strides = [1, 1]} : vector<64x64xf32> to vector<4x64xf32>
    %c3_64 = arith.constant 3 : index
    %c1_65 = arith.constant 1 : index
    %c1_66 = arith.constant 1 : index
    %c0_67 = arith.constant 0 : index
    %84 = vector.load %arg13[%c3_64, %c1_65, %c1_66, %c0_67] : memref<4x6x6x64xf32, #tpu.memory_space<vmem>>, vector<1x1x4x64xf32>
    %85 = vector.shape_cast %84 : vector<1x1x4x64xf32> to vector<4x64xf32>
    %86 = vector.shape_cast %83 : vector<4x64xf32> to vector<1x1x4x64xf32>
    tpu.vector_store %arg13[%c3_64, %c1_65, %c1_66, %c0_67], %86 {strides = array<i32>} : memref<4x6x6x64xf32, #tpu.memory_space<vmem>>, vector<1x1x4x64xf32>,
    %87 = vector.extract_strided_slice %32 {offsets = [52, 0], sizes = [4, 64], strides = [1, 1]} : vector<64x64xf32> to vector<4x64xf32>
    %c3_68 = arith.constant 3 : index
    %c2_69 = arith.constant 2 : index
    %c1_70 = arith.constant 1 : index
    %c0_71 = arith.constant 0 : index
    %88 = vector.load %arg13[%c3_68, %c2_69, %c1_70, %c0_71] : memref<4x6x6x64xf32, #tpu.memory_space<vmem>>, vector<1x1x4x64xf32>
    %89 = vector.shape_cast %88 : vector<1x1x4x64xf32> to vector<4x64xf32>
    %90 = vector.shape_cast %87 : vector<4x64xf32> to vector<1x1x4x64xf32>
    tpu.vector_store %arg13[%c3_68, %c2_69, %c1_70, %c0_71], %90 {strides = array<i32>} : memref<4x6x6x64xf32, #tpu.memory_space<vmem>>, vector<1x1x4x64xf32>,
    %91 = vector.extract_strided_slice %32 {offsets = [56, 0], sizes = [4, 64], strides = [1, 1]} : vector<64x64xf32> to vector<4x64xf32>
    %c3_72 = arith.constant 3 : index
    %c3_73 = arith.constant 3 : index
    %c1_74 = arith.constant 1 : index
    %c0_75 = arith.constant 0 : index
    %92 = vector.load %arg13[%c3_72, %c3_73, %c1_74, %c0_75] : memref<4x6x6x64xf32, #tpu.memory_space<vmem>>, vector<1x1x4x64xf32>
    %93 = vector.shape_cast %92 : vector<1x1x4x64xf32> to vector<4x64xf32>
    %94 = vector.shape_cast %91 : vector<4x64xf32> to vector<1x1x4x64xf32>
    tpu.vector_store %arg13[%c3_72, %c3_73, %c1_74, %c0_75], %94 {strides = array<i32>} : memref<4x6x6x64xf32, #tpu.memory_space<vmem>>, vector<1x1x4x64xf32>,
    %95 = vector.extract_strided_slice %32 {offsets = [60, 0], sizes = [4, 64], strides = [1, 1]} : vector<64x64xf32> to vector<4x64xf32>
    %c3_76 = arith.constant 3 : index
    %c4_77 = arith.constant 4 : index
    %c1_78 = arith.constant 1 : index
    %c0_79 = arith.constant 0 : index
    %96 = vector.load %arg13[%c3_76, %c4_77, %c1_78, %c0_79] : memref<4x6x6x64xf32, #tpu.memory_space<vmem>>, vector<1x1x4x64xf32>
    %97 = vector.shape_cast %96 : vector<1x1x4x64xf32> to vector<4x64xf32>
    %98 = vector.shape_cast %95 : vector<4x64xf32> to vector<1x1x4x64xf32>
    tpu.vector_store %arg13[%c3_76, %c4_77, %c1_78, %c0_79], %98 {strides = array<i32>} : memref<4x6x6x64xf32, #tpu.memory_space<vmem>>, vector<1x1x4x64xf32>,
    %cst_80 = arith.constant 0.000000e+00 : f32
    %99 = vector.broadcast %cst_80 : f32 to vector<16x128xf32>
    %c3_81 = arith.constant 3 : index
    %c0_82 = arith.constant 0 : index
    %c0_83 = arith.constant 0 : index
    %c0_84 = arith.constant 0 : index
    %100 = vector.load %arg13[%c3_81, %c0_82, %c0_83, %c0_84] : memref<4x6x6x64xf32, #tpu.memory_space<vmem>>, vector<1x1x4x64xf32>
    %101 = vector.shape_cast %100 : vector<1x1x4x64xf32> to vector<4x64xf32>
    %c3_85 = arith.constant 3 : index
    %c1_86 = arith.constant 1 : index
    %c0_87 = arith.constant 0 : index
    %c0_88 = arith.constant 0 : index
    %102 = vector.load %arg13[%c3_85, %c1_86, %c0_87, %c0_88] : memref<4x6x6x64xf32, #tpu.memory_space<vmem>>, vector<1x1x4x64xf32>
    %103 = vector.shape_cast %102 : vector<1x1x4x64xf32> to vector<4x64xf32>
    %c3_89 = arith.constant 3 : index
    %c2_90 = arith.constant 2 : index
    %c0_91 = arith.constant 0 : index
    %c0_92 = arith.constant 0 : index
    %104 = vector.load %arg13[%c3_89, %c2_90, %c0_91, %c0_92] : memref<4x6x6x64xf32, #tpu.memory_space<vmem>>, vector<1x1x4x64xf32>
    %105 = vector.shape_cast %104 : vector<1x1x4x64xf32> to vector<4x64xf32>
    %c3_93 = arith.constant 3 : index
    %c3_94 = arith.constant 3 : index
    %c0_95 = arith.constant 0 : index
    %c0_96 = arith.constant 0 : index
    %106 = vector.load %arg13[%c3_93, %c3_94, %c0_95, %c0_96] : memref<4x6x6x64xf32, #tpu.memory_space<vmem>>, vector<1x1x4x64xf32>
    %107 = vector.shape_cast %106 : vector<1x1x4x64xf32> to vector<4x64xf32>
    %108 = tpu.concatenate %101, %103, %105, %107 in 0 : vector<4x64xf32>, vector<4x64xf32>, vector<4x64xf32>, vector<4x64xf32> -> vector<16x64xf32>
    %109 = arith.truncf %108 : vector<16x64xf32> to vector<16x64xbf16>
    %c0_97 = arith.constant 0 : index
    %c0_98 = arith.constant 0 : index
    %c0_99 = arith.constant 0 : index
    %110 = vector.load %arg5[%c0_97, %c0_98, %c0_99] : memref<16x64x128xbf16, #tpu.memory_space<vmem>>, vector<1x64x128xbf16>
    %111 = vector.shape_cast %110 : vector<1x64x128xbf16> to vector<64x128xbf16>
    %cst_100 = arith.constant dense<0.000000e+00> : vector<16x128xf32>
    %112 = tpu.matmul %109, %111, %cst_100 {dimension_numbers = #tpu.dot_dimension_numbers<[1], [0], [0], [1], [0, 0, 1, 1], [], []>} : vector<16x64xbf16>, vector<64x128xbf16>, vector<16x128xf32> -> vector<16x128xf32>
    %113 = arith.addf %99, %112 : vector<16x128xf32>
    %c2_101 = arith.constant 2 : index
    %c0_102 = arith.constant 0 : index
    %c1_103 = arith.constant 1 : index
    %c0_104 = arith.constant 0 : index
    %114 = vector.load %arg13[%c2_101, %c0_102, %c1_103, %c0_104] : memref<4x6x6x64xf32, #tpu.memory_space<vmem>>, vector<1x1x4x64xf32>
    %115 = vector.shape_cast %114 : vector<1x1x4x64xf32> to vector<4x64xf32>
    %c2_105 = arith.constant 2 : index
    %c1_106 = arith.constant 1 : index
    %c1_107 = arith.constant 1 : index
    %c0_108 = arith.constant 0 : index
    %116 = vector.load %arg13[%c2_105, %c1_106, %c1_107, %c0_108] : memref<4x6x6x64xf32, #tpu.memory_space<vmem>>, vector<1x1x4x64xf32>
    %117 = vector.shape_cast %116 : vector<1x1x4x64xf32> to vector<4x64xf32>
    %c2_109 = arith.constant 2 : index
    %c2_110 = arith.constant 2 : index
    %c1_111 = arith.constant 1 : index
    %c0_112 = arith.constant 0 : index
    %118 = vector.load %arg13[%c2_109, %c2_110, %c1_111, %c0_112] : memref<4x6x6x64xf32, #tpu.memory_space<vmem>>, vector<1x1x4x64xf32>
    %119 = vector.shape_cast %118 : vector<1x1x4x64xf32> to vector<4x64xf32>
    %c2_113 = arith.constant 2 : index
    %c3_114 = arith.constant 3 : index
    %c1_115 = arith.constant 1 : index
    %c0_116 = arith.constant 0 : index
    %120 = vector.load %arg13[%c2_113, %c3_114, %c1_115, %c0_116] : memref<4x6x6x64xf32, #tpu.memory_space<vmem>>, vector<1x1x4x64xf32>
    %121 = vector.shape_cast %120 : vector<1x1x4x64xf32> to vector<4x64xf32>
    %122 = tpu.concatenate %115, %117, %119, %121 in 0 : vector<4x64xf32>, vector<4x64xf32>, vector<4x64xf32>, vector<4x64xf32> -> vector<16x64xf32>
    %123 = arith.truncf %122 : vector<16x64xf32> to vector<16x64xbf16>
    %c1_117 = arith.constant 1 : index
    %c0_118 = arith.constant 0 : index
    %c0_119 = arith.constant 0 : index
    %124 = vector.load %arg5[%c1_117, %c0_118, %c0_119] : memref<16x64x128xbf16, #tpu.memory_space<vmem>>, vector<1x64x128xbf16>
    %125 = vector.shape_cast %124 : vector<1x64x128xbf16> to vector<64x128xbf16>
    %cst_120 = arith.constant dense<0.000000e+00> : vector<16x128xf32>
    %126 = tpu.matmul %123, %125, %cst_120 {dimension_numbers = #tpu.dot_dimension_numbers<[1], [0], [0], [1], [0, 0, 1, 1], [], []>} : vector<16x64xbf16>, vector<64x128xbf16>, vector<16x128xf32> -> vector<16x128xf32>
    %127 = arith.addf %113, %126 : vector<16x128xf32>
    %c3_121 = arith.constant 3 : index
    %c0_122 = arith.constant 0 : index
    %c1_123 = arith.constant 1 : index
    %c0_124 = arith.constant 0 : index
    %128 = vector.load %arg13[%c3_121, %c0_122, %c1_123, %c0_124] : memref<4x6x6x64xf32, #tpu.memory_space<vmem>>, vector<1x1x4x64xf32>
    %129 = vector.shape_cast %128 : vector<1x1x4x64xf32> to vector<4x64xf32>
    %c3_125 = arith.constant 3 : index
    %c1_126 = arith.constant 1 : index
    %c1_127 = arith.constant 1 : index
    %c0_128 = arith.constant 0 : index
    %130 = vector.load %arg13[%c3_125, %c1_126, %c1_127, %c0_128] : memref<4x6x6x64xf32, #tpu.memory_space<vmem>>, vector<1x1x4x64xf32>
    %131 = vector.shape_cast %130 : vector<1x1x4x64xf32> to vector<4x64xf32>
    %c3_129 = arith.constant 3 : index
    %c2_130 = arith.constant 2 : index
    %c1_131 = arith.constant 1 : index
    %c0_132 = arith.constant 0 : index
    %132 = vector.load %arg13[%c3_129, %c2_130, %c1_131, %c0_132] : memref<4x6x6x64xf32, #tpu.memory_space<vmem>>, vector<1x1x4x64xf32>
    %133 = vector.shape_cast %132 : vector<1x1x4x64xf32> to vector<4x64xf32>
    %c3_133 = arith.constant 3 : index
    %c3_134 = arith.constant 3 : index
    %c1_135 = arith.constant 1 : index
    %c0_136 = arith.constant 0 : index
    %134 = vector.load %arg13[%c3_133, %c3_134, %c1_135, %c0_136] : memref<4x6x6x64xf32, #tpu.memory_space<vmem>>, vector<1x1x4x64xf32>
    %135 = vector.shape_cast %134 : vector<1x1x4x64xf32> to vector<4x64xf32>
    %136 = tpu.concatenate %129, %131, %133, %135 in 0 : vector<4x64xf32>, vector<4x64xf32>, vector<4x64xf32>, vector<4x64xf32> -> vector<16x64xf32>
    %137 = arith.truncf %136 : vector<16x64xf32> to vector<16x64xbf16>
    %c2_137 = arith.constant 2 : index
    %c0_138 = arith.constant 0 : index
    %c0_139 = arith.constant 0 : index
    %138 = vector.load %arg5[%c2_137, %c0_138, %c0_139] : memref<16x64x128xbf16, #tpu.memory_space<vmem>>, vector<1x64x128xbf16>
    %139 = vector.shape_cast %138 : vector<1x64x128xbf16> to vector<64x128xbf16>
    %cst_140 = arith.constant dense<0.000000e+00> : vector<16x128xf32>
    %140 = tpu.matmul %137, %139, %cst_140 {dimension_numbers = #tpu.dot_dimension_numbers<[1], [0], [0], [1], [0, 0, 1, 1], [], []>} : vector<16x64xbf16>, vector<64x128xbf16>, vector<16x128xf32> -> vector<16x128xf32>
    %141 = arith.addf %127, %140 : vector<16x128xf32>
    %c2_141 = arith.constant 2 : index
    %c0_142 = arith.constant 0 : index
    %c2_143 = arith.constant 2 : index
    %c0_144 = arith.constant 0 : index
    %142 = vector.load %arg13[%c2_141, %c0_142, %c2_143, %c0_144] : memref<4x6x6x64xf32, #tpu.memory_space<vmem>>, vector<1x1x4x64xf32>
    %143 = vector.shape_cast %142 : vector<1x1x4x64xf32> to vector<4x64xf32>
    %c2_145 = arith.constant 2 : index
    %c1_146 = arith.constant 1 : index
    %c2_147 = arith.constant 2 : index
    %c0_148 = arith.constant 0 : index
    %144 = vector.load %arg13[%c2_145, %c1_146, %c2_147, %c0_148] : memref<4x6x6x64xf32, #tpu.memory_space<vmem>>, vector<1x1x4x64xf32>
    %145 = vector.shape_cast %144 : vector<1x1x4x64xf32> to vector<4x64xf32>
    %c2_149 = arith.constant 2 : index
    %c2_150 = arith.constant 2 : index
    %c2_151 = arith.constant 2 : index
    %c0_152 = arith.constant 0 : index
    %146 = vector.load %arg13[%c2_149, %c2_150, %c2_151, %c0_152] : memref<4x6x6x64xf32, #tpu.memory_space<vmem>>, vector<1x1x4x64xf32>
    %147 = vector.shape_cast %146 : vector<1x1x4x64xf32> to vector<4x64xf32>
    %c2_153 = arith.constant 2 : index
    %c3_154 = arith.constant 3 : index
    %c2_155 = arith.constant 2 : index
    %c0_156 = arith.constant 0 : index
    %148 = vector.load %arg13[%c2_153, %c3_154, %c2_155, %c0_156] : memref<4x6x6x64xf32, #tpu.memory_space<vmem>>, vector<1x1x4x64xf32>
    %149 = vector.shape_cast %148 : vector<1x1x4x64xf32> to vector<4x64xf32>
    %150 = tpu.concatenate %143, %145, %147, %149 in 0 : vector<4x64xf32>, vector<4x64xf32>, vector<4x64xf32>, vector<4x64xf32> -> vector<16x64xf32>
    %151 = arith.truncf %150 : vector<16x64xf32> to vector<16x64xbf16>
    %c3_157 = arith.constant 3 : index
    %c0_158 = arith.constant 0 : index
    %c0_159 = arith.constant 0 : index
    %152 = vector.load %arg5[%c3_157, %c0_158, %c0_159] : memref<16x64x128xbf16, #tpu.memory_space<vmem>>, vector<1x64x128xbf16>
    %153 = vector.shape_cast %152 : vector<1x64x128xbf16> to vector<64x128xbf16>
    %cst_160 = arith.constant dense<0.000000e+00> : vector<16x128xf32>
    %154 = tpu.matmul %151, %153, %cst_160 {dimension_numbers = #tpu.dot_dimension_numbers<[1], [0], [0], [1], [0, 0, 1, 1], [], []>} : vector<16x64xbf16>, vector<64x128xbf16>, vector<16x128xf32> -> vector<16x128xf32>
    %155 = arith.addf %141, %154 : vector<16x128xf32>
    %c1_161 = arith.constant 1 : index
    %c1_162 = arith.constant 1 : index
    %c0_163 = arith.constant 0 : index
    %c0_164 = arith.constant 0 : index
    %156 = vector.load %arg13[%c1_161, %c1_162, %c0_163, %c0_164] : memref<4x6x6x64xf32, #tpu.memory_space<vmem>>, vector<1x1x4x64xf32>
    %157 = vector.shape_cast %156 : vector<1x1x4x64xf32> to vector<4x64xf32>
    %c1_165 = arith.constant 1 : index
    %c2_166 = arith.constant 2 : index
    %c0_167 = arith.constant 0 : index
    %c0_168 = arith.constant 0 : index
    %158 = vector.load %arg13[%c1_165, %c2_166, %c0_167, %c0_168] : memref<4x6x6x64xf32, #tpu.memory_space<vmem>>, vector<1x1x4x64xf32>
    %159 = vector.shape_cast %158 : vector<1x1x4x64xf32> to vector<4x64xf32>
    %c1_169 = arith.constant 1 : index
    %c3_170 = arith.constant 3 : index
    %c0_171 = arith.constant 0 : index
    %c0_172 = arith.constant 0 : index
    %160 = vector.load %arg13[%c1_169, %c3_170, %c0_171, %c0_172] : memref<4x6x6x64xf32, #tpu.memory_space<vmem>>, vector<1x1x4x64xf32>
    %161 = vector.shape_cast %160 : vector<1x1x4x64xf32> to vector<4x64xf32>
    %c1_173 = arith.constant 1 : index
    %c4_174 = arith.constant 4 : index
    %c0_175 = arith.constant 0 : index
    %c0_176 = arith.constant 0 : index
    %162 = vector.load %arg13[%c1_173, %c4_174, %c0_175, %c0_176] : memref<4x6x6x64xf32, #tpu.memory_space<vmem>>, vector<1x1x4x64xf32>
    %163 = vector.shape_cast %162 : vector<1x1x4x64xf32> to vector<4x64xf32>
    %164 = tpu.concatenate %157, %159, %161, %163 in 0 : vector<4x64xf32>, vector<4x64xf32>, vector<4x64xf32>, vector<4x64xf32> -> vector<16x64xf32>
    %165 = arith.truncf %164 : vector<16x64xf32> to vector<16x64xbf16>
    %c4_177 = arith.constant 4 : index
    %c0_178 = arith.constant 0 : index
    %c0_179 = arith.constant 0 : index
    %166 = vector.load %arg5[%c4_177, %c0_178, %c0_179] : memref<16x64x128xbf16, #tpu.memory_space<vmem>>, vector<1x64x128xbf16>
    %167 = vector.shape_cast %166 : vector<1x64x128xbf16> to vector<64x128xbf16>
    %cst_180 = arith.constant dense<0.000000e+00> : vector<16x128xf32>
    %168 = tpu.matmul %165, %167, %cst_180 {dimension_numbers = #tpu.dot_dimension_numbers<[1], [0], [0], [1], [0, 0, 1, 1], [], []>} : vector<16x64xbf16>, vector<64x128xbf16>, vector<16x128xf32> -> vector<16x128xf32>
    %169 = arith.addf %155, %168 : vector<16x128xf32>
    %c0_181 = arith.constant 0 : index
    %c1_182 = arith.constant 1 : index
    %c1_183 = arith.constant 1 : index
    %c0_184 = arith.constant 0 : index
    %170 = vector.load %arg13[%c0_181, %c1_182, %c1_183, %c0_184] : memref<4x6x6x64xf32, #tpu.memory_space<vmem>>, vector<1x1x4x64xf32>
    %171 = vector.shape_cast %170 : vector<1x1x4x64xf32> to vector<4x64xf32>
    %c0_185 = arith.constant 0 : index
    %c2_186 = arith.constant 2 : index
    %c1_187 = arith.constant 1 : index
    %c0_188 = arith.constant 0 : index
    %172 = vector.load %arg13[%c0_185, %c2_186, %c1_187, %c0_188] : memref<4x6x6x64xf32, #tpu.memory_space<vmem>>, vector<1x1x4x64xf32>
    %173 = vector.shape_cast %172 : vector<1x1x4x64xf32> to vector<4x64xf32>
    %c0_189 = arith.constant 0 : index
    %c3_190 = arith.constant 3 : index
    %c1_191 = arith.constant 1 : index
    %c0_192 = arith.constant 0 : index
    %174 = vector.load %arg13[%c0_189, %c3_190, %c1_191, %c0_192] : memref<4x6x6x64xf32, #tpu.memory_space<vmem>>, vector<1x1x4x64xf32>
    %175 = vector.shape_cast %174 : vector<1x1x4x64xf32> to vector<4x64xf32>
    %c0_193 = arith.constant 0 : index
    %c4_194 = arith.constant 4 : index
    %c1_195 = arith.constant 1 : index
    %c0_196 = arith.constant 0 : index
    %176 = vector.load %arg13[%c0_193, %c4_194, %c1_195, %c0_196] : memref<4x6x6x64xf32, #tpu.memory_space<vmem>>, vector<1x1x4x64xf32>
    %177 = vector.shape_cast %176 : vector<1x1x4x64xf32> to vector<4x64xf32>
    %178 = tpu.concatenate %171, %173, %175, %177 in 0 : vector<4x64xf32>, vector<4x64xf32>, vector<4x64xf32>, vector<4x64xf32> -> vector<16x64xf32>
    %179 = arith.truncf %178 : vector<16x64xf32> to vector<16x64xbf16>
    %c5 = arith.constant 5 : index
    %c0_197 = arith.constant 0 : index
    %c0_198 = arith.constant 0 : index
    %180 = vector.load %arg5[%c5, %c0_197, %c0_198] : memref<16x64x128xbf16, #tpu.memory_space<vmem>>, vector<1x64x128xbf16>
    %181 = vector.shape_cast %180 : vector<1x64x128xbf16> to vector<64x128xbf16>
    %cst_199 = arith.constant dense<0.000000e+00> : vector<16x128xf32>
    %182 = tpu.matmul %179, %181, %cst_199 {dimension_numbers = #tpu.dot_dimension_numbers<[1], [0], [0], [1], [0, 0, 1, 1], [], []>} : vector<16x64xbf16>, vector<64x128xbf16>, vector<16x128xf32> -> vector<16x128xf32>
    %183 = arith.addf %169, %182 : vector<16x128xf32>
    %c1_200 = arith.constant 1 : index
    %c1_201 = arith.constant 1 : index
    %c1_202 = arith.constant 1 : index
    %c0_203 = arith.constant 0 : index
    %184 = vector.load %arg13[%c1_200, %c1_201, %c1_202, %c0_203] : memref<4x6x6x64xf32, #tpu.memory_space<vmem>>, vector<1x1x4x64xf32>
    %185 = vector.shape_cast %184 : vector<1x1x4x64xf32> to vector<4x64xf32>
    %c1_204 = arith.constant 1 : index
    %c2_205 = arith.constant 2 : index
    %c1_206 = arith.constant 1 : index
    %c0_207 = arith.constant 0 : index
    %186 = vector.load %arg13[%c1_204, %c2_205, %c1_206, %c0_207] : memref<4x6x6x64xf32, #tpu.memory_space<vmem>>, vector<1x1x4x64xf32>
    %187 = vector.shape_cast %186 : vector<1x1x4x64xf32> to vector<4x64xf32>
    %c1_208 = arith.constant 1 : index
    %c3_209 = arith.constant 3 : index
    %c1_210 = arith.constant 1 : index
    %c0_211 = arith.constant 0 : index
    %188 = vector.load %arg13[%c1_208, %c3_209, %c1_210, %c0_211] : memref<4x6x6x64xf32, #tpu.memory_space<vmem>>, vector<1x1x4x64xf32>
    %189 = vector.shape_cast %188 : vector<1x1x4x64xf32> to vector<4x64xf32>
    %c1_212 = arith.constant 1 : index
    %c4_213 = arith.constant 4 : index
    %c1_214 = arith.constant 1 : index
    %c0_215 = arith.constant 0 : index
    %190 = vector.load %arg13[%c1_212, %c4_213, %c1_214, %c0_215] : memref<4x6x6x64xf32, #tpu.memory_space<vmem>>, vector<1x1x4x64xf32>
    %191 = vector.shape_cast %190 : vector<1x1x4x64xf32> to vector<4x64xf32>
    %192 = tpu.concatenate %185, %187, %189, %191 in 0 : vector<4x64xf32>, vector<4x64xf32>, vector<4x64xf32>, vector<4x64xf32> -> vector<16x64xf32>
    %193 = arith.truncf %192 : vector<16x64xf32> to vector<16x64xbf16>
    %c6 = arith.constant 6 : index
    %c0_216 = arith.constant 0 : index
    %c0_217 = arith.constant 0 : index
    %194 = vector.load %arg5[%c6, %c0_216, %c0_217] : memref<16x64x128xbf16, #tpu.memory_space<vmem>>, vector<1x64x128xbf16>
    %195 = vector.shape_cast %194 : vector<1x64x128xbf16> to vector<64x128xbf16>
    %cst_218 = arith.constant dense<0.000000e+00> : vector<16x128xf32>
    %196 = tpu.matmul %193, %195, %cst_218 {dimension_numbers = #tpu.dot_dimension_numbers<[1], [0], [0], [1], [0, 0, 1, 1], [], []>} : vector<16x64xbf16>, vector<64x128xbf16>, vector<16x128xf32> -> vector<16x128xf32>
    %197 = arith.addf %183, %196 : vector<16x128xf32>
    %c0_219 = arith.constant 0 : index
    %c1_220 = arith.constant 1 : index
    %c2_221 = arith.constant 2 : index
    %c0_222 = arith.constant 0 : index
    %198 = vector.load %arg13[%c0_219, %c1_220, %c2_221, %c0_222] : memref<4x6x6x64xf32, #tpu.memory_space<vmem>>, vector<1x1x4x64xf32>
    %199 = vector.shape_cast %198 : vector<1x1x4x64xf32> to vector<4x64xf32>
    %c0_223 = arith.constant 0 : index
    %c2_224 = arith.constant 2 : index
    %c2_225 = arith.constant 2 : index
    %c0_226 = arith.constant 0 : index
    %200 = vector.load %arg13[%c0_223, %c2_224, %c2_225, %c0_226] : memref<4x6x6x64xf32, #tpu.memory_space<vmem>>, vector<1x1x4x64xf32>
    %201 = vector.shape_cast %200 : vector<1x1x4x64xf32> to vector<4x64xf32>
    %c0_227 = arith.constant 0 : index
    %c3_228 = arith.constant 3 : index
    %c2_229 = arith.constant 2 : index
    %c0_230 = arith.constant 0 : index
    %202 = vector.load %arg13[%c0_227, %c3_228, %c2_229, %c0_230] : memref<4x6x6x64xf32, #tpu.memory_space<vmem>>, vector<1x1x4x64xf32>
    %203 = vector.shape_cast %202 : vector<1x1x4x64xf32> to vector<4x64xf32>
    %c0_231 = arith.constant 0 : index
    %c4_232 = arith.constant 4 : index
    %c2_233 = arith.constant 2 : index
    %c0_234 = arith.constant 0 : index
    %204 = vector.load %arg13[%c0_231, %c4_232, %c2_233, %c0_234] : memref<4x6x6x64xf32, #tpu.memory_space<vmem>>, vector<1x1x4x64xf32>
    %205 = vector.shape_cast %204 : vector<1x1x4x64xf32> to vector<4x64xf32>
    %206 = tpu.concatenate %199, %201, %203, %205 in 0 : vector<4x64xf32>, vector<4x64xf32>, vector<4x64xf32>, vector<4x64xf32> -> vector<16x64xf32>
    %207 = arith.truncf %206 : vector<16x64xf32> to vector<16x64xbf16>
    %c7 = arith.constant 7 : index
    %c0_235 = arith.constant 0 : index
    %c0_236 = arith.constant 0 : index
    %208 = vector.load %arg5[%c7, %c0_235, %c0_236] : memref<16x64x128xbf16, #tpu.memory_space<vmem>>, vector<1x64x128xbf16>
    %209 = vector.shape_cast %208 : vector<1x64x128xbf16> to vector<64x128xbf16>
    %cst_237 = arith.constant dense<0.000000e+00> : vector<16x128xf32>
    %210 = tpu.matmul %207, %209, %cst_237 {dimension_numbers = #tpu.dot_dimension_numbers<[1], [0], [0], [1], [0, 0, 1, 1], [], []>} : vector<16x64xbf16>, vector<64x128xbf16>, vector<16x128xf32> -> vector<16x128xf32>
    %211 = arith.addf %197, %210 : vector<16x128xf32>
    %c3_238 = arith.constant 3 : index
    %c1_239 = arith.constant 1 : index
    %c0_240 = arith.constant 0 : index
    %c0_241 = arith.constant 0 : index
    %212 = vector.load %arg13[%c3_238, %c1_239, %c0_240, %c0_241] : memref<4x6x6x64xf32, #tpu.memory_space<vmem>>, vector<1x1x4x64xf32>
    %213 = vector.shape_cast %212 : vector<1x1x4x64xf32> to vector<4x64xf32>
    %c3_242 = arith.constant 3 : index
    %c2_243 = arith.constant 2 : index
    %c0_244 = arith.constant 0 : index
    %c0_245 = arith.constant 0 : index
    %214 = vector.load %arg13[%c3_242, %c2_243, %c0_244, %c0_245] : memref<4x6x6x64xf32, #tpu.memory_space<vmem>>, vector<1x1x4x64xf32>
    %215 = vector.shape_cast %214 : vector<1x1x4x64xf32> to vector<4x64xf32>
    %c3_246 = arith.constant 3 : index
    %c3_247 = arith.constant 3 : index
    %c0_248 = arith.constant 0 : index
    %c0_249 = arith.constant 0 : index
    %216 = vector.load %arg13[%c3_246, %c3_247, %c0_248, %c0_249] : memref<4x6x6x64xf32, #tpu.memory_space<vmem>>, vector<1x1x4x64xf32>
    %217 = vector.shape_cast %216 : vector<1x1x4x64xf32> to vector<4x64xf32>
    %c3_250 = arith.constant 3 : index
    %c4_251 = arith.constant 4 : index
    %c0_252 = arith.constant 0 : index
    %c0_253 = arith.constant 0 : index
    %218 = vector.load %arg13[%c3_250, %c4_251, %c0_252, %c0_253] : memref<4x6x6x64xf32, #tpu.memory_space<vmem>>, vector<1x1x4x64xf32>
    %219 = vector.shape_cast %218 : vector<1x1x4x64xf32> to vector<4x64xf32>
    %220 = tpu.concatenate %213, %215, %217, %219 in 0 : vector<4x64xf32>, vector<4x64xf32>, vector<4x64xf32>, vector<4x64xf32> -> vector<16x64xf32>
    %221 = arith.truncf %220 : vector<16x64xf32> to vector<16x64xbf16>
    %c8 = arith.constant 8 : index
    %c0_254 = arith.constant 0 : index
    %c0_255 = arith.constant 0 : index
    %222 = vector.load %arg5[%c8, %c0_254, %c0_255] : memref<16x64x128xbf16, #tpu.memory_space<vmem>>, vector<1x64x128xbf16>
    %223 = vector.shape_cast %222 : vector<1x64x128xbf16> to vector<64x128xbf16>
    %cst_256 = arith.constant dense<0.000000e+00> : vector<16x128xf32>
    %224 = tpu.matmul %221, %223, %cst_256 {dimension_numbers = #tpu.dot_dimension_numbers<[1], [0], [0], [1], [0, 0, 1, 1], [], []>} : vector<16x64xbf16>, vector<64x128xbf16>, vector<16x128xf32> -> vector<16x128xf32>
    %225 = arith.addf %211, %224 : vector<16x128xf32>
    %c2_257 = arith.constant 2 : index
    %c1_258 = arith.constant 1 : index
    %c1_259 = arith.constant 1 : index
    %c0_260 = arith.constant 0 : index
    %226 = vector.load %arg13[%c2_257, %c1_258, %c1_259, %c0_260] : memref<4x6x6x64xf32, #tpu.memory_space<vmem>>, vector<1x1x4x64xf32>
    %227 = vector.shape_cast %226 : vector<1x1x4x64xf32> to vector<4x64xf32>
    %c2_261 = arith.constant 2 : index
    %c2_262 = arith.constant 2 : index
    %c1_263 = arith.constant 1 : index
    %c0_264 = arith.constant 0 : index
    %228 = vector.load %arg13[%c2_261, %c2_262, %c1_263, %c0_264] : memref<4x6x6x64xf32, #tpu.memory_space<vmem>>, vector<1x1x4x64xf32>
    %229 = vector.shape_cast %228 : vector<1x1x4x64xf32> to vector<4x64xf32>
    %c2_265 = arith.constant 2 : index
    %c3_266 = arith.constant 3 : index
    %c1_267 = arith.constant 1 : index
    %c0_268 = arith.constant 0 : index
    %230 = vector.load %arg13[%c2_265, %c3_266, %c1_267, %c0_268] : memref<4x6x6x64xf32, #tpu.memory_space<vmem>>, vector<1x1x4x64xf32>
    %231 = vector.shape_cast %230 : vector<1x1x4x64xf32> to vector<4x64xf32>
    %c2_269 = arith.constant 2 : index
    %c4_270 = arith.constant 4 : index
    %c1_271 = arith.constant 1 : index
    %c0_272 = arith.constant 0 : index
    %232 = vector.load %arg13[%c2_269, %c4_270, %c1_271, %c0_272] : memref<4x6x6x64xf32, #tpu.memory_space<vmem>>, vector<1x1x4x64xf32>
    %233 = vector.shape_cast %232 : vector<1x1x4x64xf32> to vector<4x64xf32>
    %234 = tpu.concatenate %227, %229, %231, %233 in 0 : vector<4x64xf32>, vector<4x64xf32>, vector<4x64xf32>, vector<4x64xf32> -> vector<16x64xf32>
    %235 = arith.truncf %234 : vector<16x64xf32> to vector<16x64xbf16>
    %c9 = arith.constant 9 : index
    %c0_273 = arith.constant 0 : index
    %c0_274 = arith.constant 0 : index
    %236 = vector.load %arg5[%c9, %c0_273, %c0_274] : memref<16x64x128xbf16, #tpu.memory_space<vmem>>, vector<1x64x128xbf16>
    %237 = vector.shape_cast %236 : vector<1x64x128xbf16> to vector<64x128xbf16>
    %cst_275 = arith.constant dense<0.000000e+00> : vector<16x128xf32>
    %238 = tpu.matmul %235, %237, %cst_275 {dimension_numbers = #tpu.dot_dimension_numbers<[1], [0], [0], [1], [0, 0, 1, 1], [], []>} : vector<16x64xbf16>, vector<64x128xbf16>, vector<16x128xf32> -> vector<16x128xf32>
    %239 = arith.addf %225, %238 : vector<16x128xf32>
    %c3_276 = arith.constant 3 : index
    %c1_277 = arith.constant 1 : index
    %c1_278 = arith.constant 1 : index
    %c0_279 = arith.constant 0 : index
    %240 = vector.load %arg13[%c3_276, %c1_277, %c1_278, %c0_279] : memref<4x6x6x64xf32, #tpu.memory_space<vmem>>, vector<1x1x4x64xf32>
    %241 = vector.shape_cast %240 : vector<1x1x4x64xf32> to vector<4x64xf32>
    %c3_280 = arith.constant 3 : index
    %c2_281 = arith.constant 2 : index
    %c1_282 = arith.constant 1 : index
    %c0_283 = arith.constant 0 : index
    %242 = vector.load %arg13[%c3_280, %c2_281, %c1_282, %c0_283] : memref<4x6x6x64xf32, #tpu.memory_space<vmem>>, vector<1x1x4x64xf32>
    %243 = vector.shape_cast %242 : vector<1x1x4x64xf32> to vector<4x64xf32>
    %c3_284 = arith.constant 3 : index
    %c3_285 = arith.constant 3 : index
    %c1_286 = arith.constant 1 : index
    %c0_287 = arith.constant 0 : index
    %244 = vector.load %arg13[%c3_284, %c3_285, %c1_286, %c0_287] : memref<4x6x6x64xf32, #tpu.memory_space<vmem>>, vector<1x1x4x64xf32>
    %245 = vector.shape_cast %244 : vector<1x1x4x64xf32> to vector<4x64xf32>
    %c3_288 = arith.constant 3 : index
    %c4_289 = arith.constant 4 : index
    %c1_290 = arith.constant 1 : index
    %c0_291 = arith.constant 0 : index
    %246 = vector.load %arg13[%c3_288, %c4_289, %c1_290, %c0_291] : memref<4x6x6x64xf32, #tpu.memory_space<vmem>>, vector<1x1x4x64xf32>
    %247 = vector.shape_cast %246 : vector<1x1x4x64xf32> to vector<4x64xf32>
    %248 = tpu.concatenate %241, %243, %245, %247 in 0 : vector<4x64xf32>, vector<4x64xf32>, vector<4x64xf32>, vector<4x64xf32> -> vector<16x64xf32>
    %249 = arith.truncf %248 : vector<16x64xf32> to vector<16x64xbf16>
    %c10 = arith.constant 10 : index
    %c0_292 = arith.constant 0 : index
    %c0_293 = arith.constant 0 : index
    %250 = vector.load %arg5[%c10, %c0_292, %c0_293] : memref<16x64x128xbf16, #tpu.memory_space<vmem>>, vector<1x64x128xbf16>
    %251 = vector.shape_cast %250 : vector<1x64x128xbf16> to vector<64x128xbf16>
    %cst_294 = arith.constant dense<0.000000e+00> : vector<16x128xf32>
    %252 = tpu.matmul %249, %251, %cst_294 {dimension_numbers = #tpu.dot_dimension_numbers<[1], [0], [0], [1], [0, 0, 1, 1], [], []>} : vector<16x64xbf16>, vector<64x128xbf16>, vector<16x128xf32> -> vector<16x128xf32>
    %253 = arith.addf %239, %252 : vector<16x128xf32>
    %c2_295 = arith.constant 2 : index
    %c1_296 = arith.constant 1 : index
    %c2_297 = arith.constant 2 : index
    %c0_298 = arith.constant 0 : index
    %254 = vector.load %arg13[%c2_295, %c1_296, %c2_297, %c0_298] : memref<4x6x6x64xf32, #tpu.memory_space<vmem>>, vector<1x1x4x64xf32>
    %255 = vector.shape_cast %254 : vector<1x1x4x64xf32> to vector<4x64xf32>
    %c2_299 = arith.constant 2 : index
    %c2_300 = arith.constant 2 : index
    %c2_301 = arith.constant 2 : index
    %c0_302 = arith.constant 0 : index
    %256 = vector.load %arg13[%c2_299, %c2_300, %c2_301, %c0_302] : memref<4x6x6x64xf32, #tpu.memory_space<vmem>>, vector<1x1x4x64xf32>
    %257 = vector.shape_cast %256 : vector<1x1x4x64xf32> to vector<4x64xf32>
    %c2_303 = arith.constant 2 : index
    %c3_304 = arith.constant 3 : index
    %c2_305 = arith.constant 2 : index
    %c0_306 = arith.constant 0 : index
    %258 = vector.load %arg13[%c2_303, %c3_304, %c2_305, %c0_306] : memref<4x6x6x64xf32, #tpu.memory_space<vmem>>, vector<1x1x4x64xf32>
    %259 = vector.shape_cast %258 : vector<1x1x4x64xf32> to vector<4x64xf32>
    %c2_307 = arith.constant 2 : index
    %c4_308 = arith.constant 4 : index
    %c2_309 = arith.constant 2 : index
    %c0_310 = arith.constant 0 : index
    %260 = vector.load %arg13[%c2_307, %c4_308, %c2_309, %c0_310] : memref<4x6x6x64xf32, #tpu.memory_space<vmem>>, vector<1x1x4x64xf32>
    %261 = vector.shape_cast %260 : vector<1x1x4x64xf32> to vector<4x64xf32>
    %262 = tpu.concatenate %255, %257, %259, %261 in 0 : vector<4x64xf32>, vector<4x64xf32>, vector<4x64xf32>, vector<4x64xf32> -> vector<16x64xf32>
    %263 = arith.truncf %262 : vector<16x64xf32> to vector<16x64xbf16>
    %c11 = arith.constant 11 : index
    %c0_311 = arith.constant 0 : index
    %c0_312 = arith.constant 0 : index
    %264 = vector.load %arg5[%c11, %c0_311, %c0_312] : memref<16x64x128xbf16, #tpu.memory_space<vmem>>, vector<1x64x128xbf16>
    %265 = vector.shape_cast %264 : vector<1x64x128xbf16> to vector<64x128xbf16>
    %cst_313 = arith.constant dense<0.000000e+00> : vector<16x128xf32>
    %266 = tpu.matmul %263, %265, %cst_313 {dimension_numbers = #tpu.dot_dimension_numbers<[1], [0], [0], [1], [0, 0, 1, 1], [], []>} : vector<16x64xbf16>, vector<64x128xbf16>, vector<16x128xf32> -> vector<16x128xf32>
    %267 = arith.addf %253, %266 : vector<16x128xf32>
    %c1_314 = arith.constant 1 : index
    %c2_315 = arith.constant 2 : index
    %c0_316 = arith.constant 0 : index
    %c0_317 = arith.constant 0 : index
    %268 = vector.load %arg13[%c1_314, %c2_315, %c0_316, %c0_317] : memref<4x6x6x64xf32, #tpu.memory_space<vmem>>, vector<1x1x4x64xf32>
    %269 = vector.shape_cast %268 : vector<1x1x4x64xf32> to vector<4x64xf32>
    %c1_318 = arith.constant 1 : index
    %c3_319 = arith.constant 3 : index
    %c0_320 = arith.constant 0 : index
    %c0_321 = arith.constant 0 : index
    %270 = vector.load %arg13[%c1_318, %c3_319, %c0_320, %c0_321] : memref<4x6x6x64xf32, #tpu.memory_space<vmem>>, vector<1x1x4x64xf32>
    %271 = vector.shape_cast %270 : vector<1x1x4x64xf32> to vector<4x64xf32>
    %c1_322 = arith.constant 1 : index
    %c4_323 = arith.constant 4 : index
    %c0_324 = arith.constant 0 : index
    %c0_325 = arith.constant 0 : index
    %272 = vector.load %arg13[%c1_322, %c4_323, %c0_324, %c0_325] : memref<4x6x6x64xf32, #tpu.memory_space<vmem>>, vector<1x1x4x64xf32>
    %273 = vector.shape_cast %272 : vector<1x1x4x64xf32> to vector<4x64xf32>
    %c1_326 = arith.constant 1 : index
    %c5_327 = arith.constant 5 : index
    %c0_328 = arith.constant 0 : index
    %c0_329 = arith.constant 0 : index
    %274 = vector.load %arg13[%c1_326, %c5_327, %c0_328, %c0_329] : memref<4x6x6x64xf32, #tpu.memory_space<vmem>>, vector<1x1x4x64xf32>
    %275 = vector.shape_cast %274 : vector<1x1x4x64xf32> to vector<4x64xf32>
    %276 = tpu.concatenate %269, %271, %273, %275 in 0 : vector<4x64xf32>, vector<4x64xf32>, vector<4x64xf32>, vector<4x64xf32> -> vector<16x64xf32>
    %277 = arith.truncf %276 : vector<16x64xf32> to vector<16x64xbf16>
    %c12 = arith.constant 12 : index
    %c0_330 = arith.constant 0 : index
    %c0_331 = arith.constant 0 : index
    %278 = vector.load %arg5[%c12, %c0_330, %c0_331] : memref<16x64x128xbf16, #tpu.memory_space<vmem>>, vector<1x64x128xbf16>
    %279 = vector.shape_cast %278 : vector<1x64x128xbf16> to vector<64x128xbf16>
    %cst_332 = arith.constant dense<0.000000e+00> : vector<16x128xf32>
    %280 = tpu.matmul %277, %279, %cst_332 {dimension_numbers = #tpu.dot_dimension_numbers<[1], [0], [0], [1], [0, 0, 1, 1], [], []>} : vector<16x64xbf16>, vector<64x128xbf16>, vector<16x128xf32> -> vector<16x128xf32>
    %281 = arith.addf %267, %280 : vector<16x128xf32>
    %c0_333 = arith.constant 0 : index
    %c2_334 = arith.constant 2 : index
    %c1_335 = arith.constant 1 : index
    %c0_336 = arith.constant 0 : index
    %282 = vector.load %arg13[%c0_333, %c2_334, %c1_335, %c0_336] : memref<4x6x6x64xf32, #tpu.memory_space<vmem>>, vector<1x1x4x64xf32>
    %283 = vector.shape_cast %282 : vector<1x1x4x64xf32> to vector<4x64xf32>
    %c0_337 = arith.constant 0 : index
    %c3_338 = arith.constant 3 : index
    %c1_339 = arith.constant 1 : index
    %c0_340 = arith.constant 0 : index
    %284 = vector.load %arg13[%c0_337, %c3_338, %c1_339, %c0_340] : memref<4x6x6x64xf32, #tpu.memory_space<vmem>>, vector<1x1x4x64xf32>
    %285 = vector.shape_cast %284 : vector<1x1x4x64xf32> to vector<4x64xf32>
    %c0_341 = arith.constant 0 : index
    %c4_342 = arith.constant 4 : index
    %c1_343 = arith.constant 1 : index
    %c0_344 = arith.constant 0 : index
    %286 = vector.load %arg13[%c0_341, %c4_342, %c1_343, %c0_344] : memref<4x6x6x64xf32, #tpu.memory_space<vmem>>, vector<1x1x4x64xf32>
    %287 = vector.shape_cast %286 : vector<1x1x4x64xf32> to vector<4x64xf32>
    %c0_345 = arith.constant 0 : index
    %c5_346 = arith.constant 5 : index
    %c1_347 = arith.constant 1 : index
    %c0_348 = arith.constant 0 : index
    %288 = vector.load %arg13[%c0_345, %c5_346, %c1_347, %c0_348] : memref<4x6x6x64xf32, #tpu.memory_space<vmem>>, vector<1x1x4x64xf32>
    %289 = vector.shape_cast %288 : vector<1x1x4x64xf32> to vector<4x64xf32>
    %290 = tpu.concatenate %283, %285, %287, %289 in 0 : vector<4x64xf32>, vector<4x64xf32>, vector<4x64xf32>, vector<4x64xf32> -> vector<16x64xf32>
    %291 = arith.truncf %290 : vector<16x64xf32> to vector<16x64xbf16>
    %c13 = arith.constant 13 : index
    %c0_349 = arith.constant 0 : index
    %c0_350 = arith.constant 0 : index
    %292 = vector.load %arg5[%c13, %c0_349, %c0_350] : memref<16x64x128xbf16, #tpu.memory_space<vmem>>, vector<1x64x128xbf16>
    %293 = vector.shape_cast %292 : vector<1x64x128xbf16> to vector<64x128xbf16>
    %cst_351 = arith.constant dense<0.000000e+00> : vector<16x128xf32>
    %294 = tpu.matmul %291, %293, %cst_351 {dimension_numbers = #tpu.dot_dimension_numbers<[1], [0], [0], [1], [0, 0, 1, 1], [], []>} : vector<16x64xbf16>, vector<64x128xbf16>, vector<16x128xf32> -> vector<16x128xf32>
    %295 = arith.addf %281, %294 : vector<16x128xf32>
    %c1_352 = arith.constant 1 : index
    %c2_353 = arith.constant 2 : index
    %c1_354 = arith.constant 1 : index
    %c0_355 = arith.constant 0 : index
    %296 = vector.load %arg13[%c1_352, %c2_353, %c1_354, %c0_355] : memref<4x6x6x64xf32, #tpu.memory_space<vmem>>, vector<1x1x4x64xf32>
    %297 = vector.shape_cast %296 : vector<1x1x4x64xf32> to vector<4x64xf32>
    %c1_356 = arith.constant 1 : index
    %c3_357 = arith.constant 3 : index
    %c1_358 = arith.constant 1 : index
    %c0_359 = arith.constant 0 : index
    %298 = vector.load %arg13[%c1_356, %c3_357, %c1_358, %c0_359] : memref<4x6x6x64xf32, #tpu.memory_space<vmem>>, vector<1x1x4x64xf32>
    %299 = vector.shape_cast %298 : vector<1x1x4x64xf32> to vector<4x64xf32>
    %c1_360 = arith.constant 1 : index
    %c4_361 = arith.constant 4 : index
    %c1_362 = arith.constant 1 : index
    %c0_363 = arith.constant 0 : index
    %300 = vector.load %arg13[%c1_360, %c4_361, %c1_362, %c0_363] : memref<4x6x6x64xf32, #tpu.memory_space<vmem>>, vector<1x1x4x64xf32>
    %301 = vector.shape_cast %300 : vector<1x1x4x64xf32> to vector<4x64xf32>
    %c1_364 = arith.constant 1 : index
    %c5_365 = arith.constant 5 : index
    %c1_366 = arith.constant 1 : index
    %c0_367 = arith.constant 0 : index
    %302 = vector.load %arg13[%c1_364, %c5_365, %c1_366, %c0_367] : memref<4x6x6x64xf32, #tpu.memory_space<vmem>>, vector<1x1x4x64xf32>
    %303 = vector.shape_cast %302 : vector<1x1x4x64xf32> to vector<4x64xf32>
    %304 = tpu.concatenate %297, %299, %301, %303 in 0 : vector<4x64xf32>, vector<4x64xf32>, vector<4x64xf32>, vector<4x64xf32> -> vector<16x64xf32>
    %305 = arith.truncf %304 : vector<16x64xf32> to vector<16x64xbf16>
    %c14 = arith.constant 14 : index
    %c0_368 = arith.constant 0 : index
    %c0_369 = arith.constant 0 : index
    %306 = vector.load %arg5[%c14, %c0_368, %c0_369] : memref<16x64x128xbf16, #tpu.memory_space<vmem>>, vector<1x64x128xbf16>
    %307 = vector.shape_cast %306 : vector<1x64x128xbf16> to vector<64x128xbf16>
    %cst_370 = arith.constant dense<0.000000e+00> : vector<16x128xf32>
    %308 = tpu.matmul %305, %307, %cst_370 {dimension_numbers = #tpu.dot_dimension_numbers<[1], [0], [0], [1], [0, 0, 1, 1], [], []>} : vector<16x64xbf16>, vector<64x128xbf16>, vector<16x128xf32> -> vector<16x128xf32>
    %309 = arith.addf %295, %308 : vector<16x128xf32>
    %c0_371 = arith.constant 0 : index
    %c2_372 = arith.constant 2 : index
    %c2_373 = arith.constant 2 : index
    %c0_374 = arith.constant 0 : index
    %310 = vector.load %arg13[%c0_371, %c2_372, %c2_373, %c0_374] : memref<4x6x6x64xf32, #tpu.memory_space<vmem>>, vector<1x1x4x64xf32>
    %311 = vector.shape_cast %310 : vector<1x1x4x64xf32> to vector<4x64xf32>
    %c0_375 = arith.constant 0 : index
    %c3_376 = arith.constant 3 : index
    %c2_377 = arith.constant 2 : index
    %c0_378 = arith.constant 0 : index
    %312 = vector.load %arg13[%c0_375, %c3_376, %c2_377, %c0_378] : memref<4x6x6x64xf32, #tpu.memory_space<vmem>>, vector<1x1x4x64xf32>
    %313 = vector.shape_cast %312 : vector<1x1x4x64xf32> to vector<4x64xf32>
    %c0_379 = arith.constant 0 : index
    %c4_380 = arith.constant 4 : index
    %c2_381 = arith.constant 2 : index
    %c0_382 = arith.constant 0 : index
    %314 = vector.load %arg13[%c0_379, %c4_380, %c2_381, %c0_382] : memref<4x6x6x64xf32, #tpu.memory_space<vmem>>, vector<1x1x4x64xf32>
    %315 = vector.shape_cast %314 : vector<1x1x4x64xf32> to vector<4x64xf32>
    %c0_383 = arith.constant 0 : index
    %c5_384 = arith.constant 5 : index
    %c2_385 = arith.constant 2 : index
    %c0_386 = arith.constant 0 : index
    %316 = vector.load %arg13[%c0_383, %c5_384, %c2_385, %c0_386] : memref<4x6x6x64xf32, #tpu.memory_space<vmem>>, vector<1x1x4x64xf32>
    %317 = vector.shape_cast %316 : vector<1x1x4x64xf32> to vector<4x64xf32>
    %318 = tpu.concatenate %311, %313, %315, %317 in 0 : vector<4x64xf32>, vector<4x64xf32>, vector<4x64xf32>, vector<4x64xf32> -> vector<16x64xf32>
    %319 = arith.truncf %318 : vector<16x64xf32> to vector<16x64xbf16>
    %c15 = arith.constant 15 : index
    %c0_387 = arith.constant 0 : index
    %c0_388 = arith.constant 0 : index
    %320 = vector.load %arg5[%c15, %c0_387, %c0_388] : memref<16x64x128xbf16, #tpu.memory_space<vmem>>, vector<1x64x128xbf16>
    %321 = vector.shape_cast %320 : vector<1x64x128xbf16> to vector<64x128xbf16>
    %cst_389 = arith.constant dense<0.000000e+00> : vector<16x128xf32>
    %322 = tpu.matmul %319, %321, %cst_389 {dimension_numbers = #tpu.dot_dimension_numbers<[1], [0], [0], [1], [0, 0, 1, 1], [], []>} : vector<16x64xbf16>, vector<64x128xbf16>, vector<16x128xf32> -> vector<16x128xf32>
    %323 = arith.addf %309, %322 : vector<16x128xf32>
    %cst_390 = arith.constant dense<0.000000e+00> : vector<128xf32>
    %324 = vector.multi_reduction <add>, %323, %cst_390 [0] : vector<16x128xf32> to vector<128xf32>
    %325 = vector.shape_cast %324 : vector<128xf32> to vector<1x128xf32>
    %cst_391 = arith.constant 1.600000e+01 : f32
    %326 = vector.broadcast %cst_391 : f32 to vector<1x128xf32>
    %327 = arith.divf %325, %326 : vector<1x128xf32>
    %328 = arith.mulf %323, %323 : vector<16x128xf32>
    %cst_392 = arith.constant dense<0.000000e+00> : vector<128xf32>
    %329 = vector.multi_reduction <add>, %328, %cst_392 [0] : vector<16x128xf32> to vector<128xf32>
    %330 = vector.shape_cast %329 : vector<128xf32> to vector<1x128xf32>
    %cst_393 = arith.constant 1.600000e+01 : f32
    %331 = vector.broadcast %cst_393 : f32 to vector<1x128xf32>
    %332 = arith.divf %330, %331 : vector<1x128xf32>
    %333 = arith.mulf %327, %327 : vector<1x128xf32>
    %334 = arith.subf %332, %333 : vector<1x128xf32>
    %335 = vector.broadcast %327 : vector<1x128xf32> to vector<16x128xf32>
    %336 = arith.subf %323, %335 : vector<16x128xf32>
    %cst_394 = arith.constant 9.99999974E-6 : f32
    %337 = vector.broadcast %cst_394 : f32 to vector<1x128xf32>
    %338 = arith.addf %334, %337 : vector<1x128xf32>
    %339 = math.rsqrt %338 : vector<1x128xf32>
    %340 = vector.broadcast %339 : vector<1x128xf32> to vector<16x128xf32>
    %341 = arith.mulf %336, %340 : vector<16x128xf32>
    %c0_395 = arith.constant 0 : index
    %c0_396 = arith.constant 0 : index
    %342 = vector.load %arg6[%c0_395, %c0_396] : memref<1x128xf32, #tpu.memory_space<vmem>>, vector<1x128xf32>
    %343 = vector.broadcast %342 : vector<1x128xf32> to vector<16x128xf32>
    %344 = arith.mulf %341, %343 : vector<16x128xf32>
    %c0_397 = arith.constant 0 : index
    %c0_398 = arith.constant 0 : index
    %345 = vector.load %arg7[%c0_397, %c0_398] : memref<1x128xf32, #tpu.memory_space<vmem>>, vector<1x128xf32>
    %346 = vector.broadcast %345 : vector<1x128xf32> to vector<16x128xf32>
    %347 = arith.addf %344, %346 : vector<16x128xf32>
    %cst_399 = arith.constant 0.000000e+00 : f32
    %348 = vector.broadcast %cst_399 : f32 to vector<16x128xf32>
    %349 = arith.cmpf oge, %347, %348 : vector<16x128xf32>
    %cst_400 = arith.constant 2.000000e-01 : f32
    %350 = vector.broadcast %cst_400 : f32 to vector<16x128xf32>
    %351 = arith.mulf %350, %347 : vector<16x128xf32>
    %352 = arith.select %349, %347, %351 : vector<16x128xi1>, vector<16x128xf32>
    %353 = arith.truncf %352 : vector<16x128xf32> to vector<16x128xbf16>
    %c0_401 = arith.constant 0 : index
    %c0_402 = arith.constant 0 : index
    %354 = vector.load %arg9[%c0_401, %c0_402] : memref<1x32xf32, #tpu.memory_space<vmem>>, vector<1x32xf32>
    %355 = vector.extract_strided_slice %353 {offsets = [0, 0], sizes = [1, 128], strides = [1, 1]} : vector<16x128xbf16> to vector<1x128xbf16>
    %c0_403 = arith.constant 0 : index
    %c0_404 = arith.constant 0 : index
    %c0_405 = arith.constant 0 : index
    %356 = vector.load %arg8[%c0_403, %c0_404, %c0_405] : memref<16x128x32xbf16, #tpu.memory_space<vmem>>, vector<1x128x32xbf16>
    %357 = vector.shape_cast %356 : vector<1x128x32xbf16> to vector<128x32xbf16>
    %cst_406 = arith.constant dense<0.000000e+00> : vector<1x32xf32>
    %358 = tpu.matmul %355, %357, %cst_406 {dimension_numbers = #tpu.dot_dimension_numbers<[1], [0], [0], [1], [0, 0, 1, 1], [], []>} : vector<1x128xbf16>, vector<128x32xbf16>, vector<1x32xf32> -> vector<1x32xf32>
    %359 = arith.addf %354, %358 : vector<1x32xf32>
    %360 = vector.extract_strided_slice %353 {offsets = [1, 0], sizes = [1, 128], strides = [1, 1]} : vector<16x128xbf16> to vector<1x128xbf16>
    %c1_407 = arith.constant 1 : index
    %c0_408 = arith.constant 0 : index
    %c0_409 = arith.constant 0 : index
    %361 = vector.load %arg8[%c1_407, %c0_408, %c0_409] : memref<16x128x32xbf16, #tpu.memory_space<vmem>>, vector<1x128x32xbf16>
    %362 = vector.shape_cast %361 : vector<1x128x32xbf16> to vector<128x32xbf16>
    %cst_410 = arith.constant dense<0.000000e+00> : vector<1x32xf32>
    %363 = tpu.matmul %360, %362, %cst_410 {dimension_numbers = #tpu.dot_dimension_numbers<[1], [0], [0], [1], [0, 0, 1, 1], [], []>} : vector<1x128xbf16>, vector<128x32xbf16>, vector<1x32xf32> -> vector<1x32xf32>
    %364 = arith.addf %359, %363 : vector<1x32xf32>
    %365 = vector.extract_strided_slice %353 {offsets = [2, 0], sizes = [1, 128], strides = [1, 1]} : vector<16x128xbf16> to vector<1x128xbf16>
    %c2_411 = arith.constant 2 : index
    %c0_412 = arith.constant 0 : index
    %c0_413 = arith.constant 0 : index
    %366 = vector.load %arg8[%c2_411, %c0_412, %c0_413] : memref<16x128x32xbf16, #tpu.memory_space<vmem>>, vector<1x128x32xbf16>
    %367 = vector.shape_cast %366 : vector<1x128x32xbf16> to vector<128x32xbf16>
    %cst_414 = arith.constant dense<0.000000e+00> : vector<1x32xf32>
    %368 = tpu.matmul %365, %367, %cst_414 {dimension_numbers = #tpu.dot_dimension_numbers<[1], [0], [0], [1], [0, 0, 1, 1], [], []>} : vector<1x128xbf16>, vector<128x32xbf16>, vector<1x32xf32> -> vector<1x32xf32>
    %369 = arith.addf %364, %368 : vector<1x32xf32>
    %370 = vector.extract_strided_slice %353 {offsets = [3, 0], sizes = [1, 128], strides = [1, 1]} : vector<16x128xbf16> to vector<1x128xbf16>
    %c3_415 = arith.constant 3 : index
    %c0_416 = arith.constant 0 : index
    %c0_417 = arith.constant 0 : index
    %371 = vector.load %arg8[%c3_415, %c0_416, %c0_417] : memref<16x128x32xbf16, #tpu.memory_space<vmem>>, vector<1x128x32xbf16>
    %372 = vector.shape_cast %371 : vector<1x128x32xbf16> to vector<128x32xbf16>
    %cst_418 = arith.constant dense<0.000000e+00> : vector<1x32xf32>
    %373 = tpu.matmul %370, %372, %cst_418 {dimension_numbers = #tpu.dot_dimension_numbers<[1], [0], [0], [1], [0, 0, 1, 1], [], []>} : vector<1x128xbf16>, vector<128x32xbf16>, vector<1x32xf32> -> vector<1x32xf32>
    %374 = arith.addf %369, %373 : vector<1x32xf32>
    %375 = vector.extract_strided_slice %353 {offsets = [4, 0], sizes = [1, 128], strides = [1, 1]} : vector<16x128xbf16> to vector<1x128xbf16>
    %c4_419 = arith.constant 4 : index
    %c0_420 = arith.constant 0 : index
    %c0_421 = arith.constant 0 : index
    %376 = vector.load %arg8[%c4_419, %c0_420, %c0_421] : memref<16x128x32xbf16, #tpu.memory_space<vmem>>, vector<1x128x32xbf16>
    %377 = vector.shape_cast %376 : vector<1x128x32xbf16> to vector<128x32xbf16>
    %cst_422 = arith.constant dense<0.000000e+00> : vector<1x32xf32>
    %378 = tpu.matmul %375, %377, %cst_422 {dimension_numbers = #tpu.dot_dimension_numbers<[1], [0], [0], [1], [0, 0, 1, 1], [], []>} : vector<1x128xbf16>, vector<128x32xbf16>, vector<1x32xf32> -> vector<1x32xf32>
    %379 = arith.addf %374, %378 : vector<1x32xf32>
    %380 = vector.extract_strided_slice %353 {offsets = [5, 0], sizes = [1, 128], strides = [1, 1]} : vector<16x128xbf16> to vector<1x128xbf16>
    %c5_423 = arith.constant 5 : index
    %c0_424 = arith.constant 0 : index
    %c0_425 = arith.constant 0 : index
    %381 = vector.load %arg8[%c5_423, %c0_424, %c0_425] : memref<16x128x32xbf16, #tpu.memory_space<vmem>>, vector<1x128x32xbf16>
    %382 = vector.shape_cast %381 : vector<1x128x32xbf16> to vector<128x32xbf16>
    %cst_426 = arith.constant dense<0.000000e+00> : vector<1x32xf32>
    %383 = tpu.matmul %380, %382, %cst_426 {dimension_numbers = #tpu.dot_dimension_numbers<[1], [0], [0], [1], [0, 0, 1, 1], [], []>} : vector<1x128xbf16>, vector<128x32xbf16>, vector<1x32xf32> -> vector<1x32xf32>
    %384 = arith.addf %379, %383 : vector<1x32xf32>
    %385 = vector.extract_strided_slice %353 {offsets = [6, 0], sizes = [1, 128], strides = [1, 1]} : vector<16x128xbf16> to vector<1x128xbf16>
    %c6_427 = arith.constant 6 : index
    %c0_428 = arith.constant 0 : index
    %c0_429 = arith.constant 0 : index
    %386 = vector.load %arg8[%c6_427, %c0_428, %c0_429] : memref<16x128x32xbf16, #tpu.memory_space<vmem>>, vector<1x128x32xbf16>
    %387 = vector.shape_cast %386 : vector<1x128x32xbf16> to vector<128x32xbf16>
    %cst_430 = arith.constant dense<0.000000e+00> : vector<1x32xf32>
    %388 = tpu.matmul %385, %387, %cst_430 {dimension_numbers = #tpu.dot_dimension_numbers<[1], [0], [0], [1], [0, 0, 1, 1], [], []>} : vector<1x128xbf16>, vector<128x32xbf16>, vector<1x32xf32> -> vector<1x32xf32>
    %389 = arith.addf %384, %388 : vector<1x32xf32>
    %390 = vector.extract_strided_slice %353 {offsets = [7, 0], sizes = [1, 128], strides = [1, 1]} : vector<16x128xbf16> to vector<1x128xbf16>
    %c7_431 = arith.constant 7 : index
    %c0_432 = arith.constant 0 : index
    %c0_433 = arith.constant 0 : index
    %391 = vector.load %arg8[%c7_431, %c0_432, %c0_433] : memref<16x128x32xbf16, #tpu.memory_space<vmem>>, vector<1x128x32xbf16>
    %392 = vector.shape_cast %391 : vector<1x128x32xbf16> to vector<128x32xbf16>
    %cst_434 = arith.constant dense<0.000000e+00> : vector<1x32xf32>
    %393 = tpu.matmul %390, %392, %cst_434 {dimension_numbers = #tpu.dot_dimension_numbers<[1], [0], [0], [1], [0, 0, 1, 1], [], []>} : vector<1x128xbf16>, vector<128x32xbf16>, vector<1x32xf32> -> vector<1x32xf32>
    %394 = arith.addf %389, %393 : vector<1x32xf32>
    %395 = vector.extract_strided_slice %353 {offsets = [8, 0], sizes = [1, 128], strides = [1, 1]} : vector<16x128xbf16> to vector<1x128xbf16>
    %c8_435 = arith.constant 8 : index
    %c0_436 = arith.constant 0 : index
    %c0_437 = arith.constant 0 : index
    %396 = vector.load %arg8[%c8_435, %c0_436, %c0_437] : memref<16x128x32xbf16, #tpu.memory_space<vmem>>, vector<1x128x32xbf16>
    %397 = vector.shape_cast %396 : vector<1x128x32xbf16> to vector<128x32xbf16>
    %cst_438 = arith.constant dense<0.000000e+00> : vector<1x32xf32>
    %398 = tpu.matmul %395, %397, %cst_438 {dimension_numbers = #tpu.dot_dimension_numbers<[1], [0], [0], [1], [0, 0, 1, 1], [], []>} : vector<1x128xbf16>, vector<128x32xbf16>, vector<1x32xf32> -> vector<1x32xf32>
    %399 = arith.addf %394, %398 : vector<1x32xf32>
    %400 = vector.extract_strided_slice %353 {offsets = [9, 0], sizes = [1, 128], strides = [1, 1]} : vector<16x128xbf16> to vector<1x128xbf16>
    %c9_439 = arith.constant 9 : index
    %c0_440 = arith.constant 0 : index
    %c0_441 = arith.constant 0 : index
    %401 = vector.load %arg8[%c9_439, %c0_440, %c0_441] : memref<16x128x32xbf16, #tpu.memory_space<vmem>>, vector<1x128x32xbf16>
    %402 = vector.shape_cast %401 : vector<1x128x32xbf16> to vector<128x32xbf16>
    %cst_442 = arith.constant dense<0.000000e+00> : vector<1x32xf32>
    %403 = tpu.matmul %400, %402, %cst_442 {dimension_numbers = #tpu.dot_dimension_numbers<[1], [0], [0], [1], [0, 0, 1, 1], [], []>} : vector<1x128xbf16>, vector<128x32xbf16>, vector<1x32xf32> -> vector<1x32xf32>
    %404 = arith.addf %399, %403 : vector<1x32xf32>
    %405 = vector.extract_strided_slice %353 {offsets = [10, 0], sizes = [1, 128], strides = [1, 1]} : vector<16x128xbf16> to vector<1x128xbf16>
    %c10_443 = arith.constant 10 : index
    %c0_444 = arith.constant 0 : index
    %c0_445 = arith.constant 0 : index
    %406 = vector.load %arg8[%c10_443, %c0_444, %c0_445] : memref<16x128x32xbf16, #tpu.memory_space<vmem>>, vector<1x128x32xbf16>
    %407 = vector.shape_cast %406 : vector<1x128x32xbf16> to vector<128x32xbf16>
    %cst_446 = arith.constant dense<0.000000e+00> : vector<1x32xf32>
    %408 = tpu.matmul %405, %407, %cst_446 {dimension_numbers = #tpu.dot_dimension_numbers<[1], [0], [0], [1], [0, 0, 1, 1], [], []>} : vector<1x128xbf16>, vector<128x32xbf16>, vector<1x32xf32> -> vector<1x32xf32>
    %409 = arith.addf %404, %408 : vector<1x32xf32>
    %410 = vector.extract_strided_slice %353 {offsets = [11, 0], sizes = [1, 128], strides = [1, 1]} : vector<16x128xbf16> to vector<1x128xbf16>
    %c11_447 = arith.constant 11 : index
    %c0_448 = arith.constant 0 : index
    %c0_449 = arith.constant 0 : index
    %411 = vector.load %arg8[%c11_447, %c0_448, %c0_449] : memref<16x128x32xbf16, #tpu.memory_space<vmem>>, vector<1x128x32xbf16>
    %412 = vector.shape_cast %411 : vector<1x128x32xbf16> to vector<128x32xbf16>
    %cst_450 = arith.constant dense<0.000000e+00> : vector<1x32xf32>
    %413 = tpu.matmul %410, %412, %cst_450 {dimension_numbers = #tpu.dot_dimension_numbers<[1], [0], [0], [1], [0, 0, 1, 1], [], []>} : vector<1x128xbf16>, vector<128x32xbf16>, vector<1x32xf32> -> vector<1x32xf32>
    %414 = arith.addf %409, %413 : vector<1x32xf32>
    %415 = vector.extract_strided_slice %353 {offsets = [12, 0], sizes = [1, 128], strides = [1, 1]} : vector<16x128xbf16> to vector<1x128xbf16>
    %c12_451 = arith.constant 12 : index
    %c0_452 = arith.constant 0 : index
    %c0_453 = arith.constant 0 : index
    %416 = vector.load %arg8[%c12_451, %c0_452, %c0_453] : memref<16x128x32xbf16, #tpu.memory_space<vmem>>, vector<1x128x32xbf16>
    %417 = vector.shape_cast %416 : vector<1x128x32xbf16> to vector<128x32xbf16>
    %cst_454 = arith.constant dense<0.000000e+00> : vector<1x32xf32>
    %418 = tpu.matmul %415, %417, %cst_454 {dimension_numbers = #tpu.dot_dimension_numbers<[1], [0], [0], [1], [0, 0, 1, 1], [], []>} : vector<1x128xbf16>, vector<128x32xbf16>, vector<1x32xf32> -> vector<1x32xf32>
    %419 = arith.addf %414, %418 : vector<1x32xf32>
    %420 = vector.extract_strided_slice %353 {offsets = [13, 0], sizes = [1, 128], strides = [1, 1]} : vector<16x128xbf16> to vector<1x128xbf16>
    %c13_455 = arith.constant 13 : index
    %c0_456 = arith.constant 0 : index
    %c0_457 = arith.constant 0 : index
    %421 = vector.load %arg8[%c13_455, %c0_456, %c0_457] : memref<16x128x32xbf16, #tpu.memory_space<vmem>>, vector<1x128x32xbf16>
    %422 = vector.shape_cast %421 : vector<1x128x32xbf16> to vector<128x32xbf16>
    %cst_458 = arith.constant dense<0.000000e+00> : vector<1x32xf32>
    %423 = tpu.matmul %420, %422, %cst_458 {dimension_numbers = #tpu.dot_dimension_numbers<[1], [0], [0], [1], [0, 0, 1, 1], [], []>} : vector<1x128xbf16>, vector<128x32xbf16>, vector<1x32xf32> -> vector<1x32xf32>
    %424 = arith.addf %419, %423 : vector<1x32xf32>
    %425 = vector.extract_strided_slice %353 {offsets = [14, 0], sizes = [1, 128], strides = [1, 1]} : vector<16x128xbf16> to vector<1x128xbf16>
    %c14_459 = arith.constant 14 : index
    %c0_460 = arith.constant 0 : index
    %c0_461 = arith.constant 0 : index
    %426 = vector.load %arg8[%c14_459, %c0_460, %c0_461] : memref<16x128x32xbf16, #tpu.memory_space<vmem>>, vector<1x128x32xbf16>
    %427 = vector.shape_cast %426 : vector<1x128x32xbf16> to vector<128x32xbf16>
    %cst_462 = arith.constant dense<0.000000e+00> : vector<1x32xf32>
    %428 = tpu.matmul %425, %427, %cst_462 {dimension_numbers = #tpu.dot_dimension_numbers<[1], [0], [0], [1], [0, 0, 1, 1], [], []>} : vector<1x128xbf16>, vector<128x32xbf16>, vector<1x32xf32> -> vector<1x32xf32>
    %429 = arith.addf %424, %428 : vector<1x32xf32>
    %430 = vector.extract_strided_slice %353 {offsets = [15, 0], sizes = [1, 128], strides = [1, 1]} : vector<16x128xbf16> to vector<1x128xbf16>
    %c15_463 = arith.constant 15 : index
    %c0_464 = arith.constant 0 : index
    %c0_465 = arith.constant 0 : index
    %431 = vector.load %arg8[%c15_463, %c0_464, %c0_465] : memref<16x128x32xbf16, #tpu.memory_space<vmem>>, vector<1x128x32xbf16>
    %432 = vector.shape_cast %431 : vector<1x128x32xbf16> to vector<128x32xbf16>
    %cst_466 = arith.constant dense<0.000000e+00> : vector<1x32xf32>
    %433 = tpu.matmul %430, %432, %cst_466 {dimension_numbers = #tpu.dot_dimension_numbers<[1], [0], [0], [1], [0, 0, 1, 1], [], []>} : vector<1x128xbf16>, vector<128x32xbf16>, vector<1x32xf32> -> vector<1x32xf32>
    %434 = arith.addf %429, %433 : vector<1x32xf32>
    %c0_467 = arith.constant 0 : index
    %c0_468 = arith.constant 0 : index
    %435 = vector.load %arg10[%c0_467, %c0_468] : memref<32x10xf32, #tpu.memory_space<vmem>>, vector<32x10xf32>
    %cst_469 = arith.constant dense<0.000000e+00> : vector<1x10xf32>
    %436 = tpu.matmul %434, %435, %cst_469 {dimension_numbers = #tpu.dot_dimension_numbers<[1], [0], [0], [1], [0, 0, 1, 1], [], []>} : vector<1x32xf32>, vector<32x10xf32>, vector<1x10xf32> -> vector<1x10xf32>
    %c0_470 = arith.constant 0 : index
    %c0_471 = arith.constant 0 : index
    %437 = vector.load %arg11[%c0_470, %c0_471] : memref<1x10xf32, #tpu.memory_space<vmem>>, vector<1x10xf32>
    %438 = arith.addf %436, %437 : vector<1x10xf32>
    %c0_472 = arith.constant 0 : index
    %c0_473 = arith.constant 0 : index
    %c0_474 = arith.constant 0 : index
    %439 = vector.load %arg12[%c0_472, %c0_473, %c0_474] : memref<1x1x10xf32, #tpu.memory_space<vmem>>, vector<1x1x10xf32>
    %440 = vector.shape_cast %439 : vector<1x1x10xf32> to vector<1x10xf32>
    %441 = vector.shape_cast %438 : vector<1x10xf32> to vector<1x1x10xf32>
    tpu.vector_store %arg12[%c0_472, %c0_473, %c0_474], %441 {strides = array<i32>} : memref<1x1x10xf32, #tpu.memory_space<vmem>>, vector<1x1x10xf32>,
    return
  }
  func.func @transform_0(%arg0: i32) -> (i32, i32, i32) {
    %c0_i32 = arith.constant 0 : i32
    %c0_i32_0 = arith.constant 0 : i32
    %c0_i32_1 = arith.constant 0 : i32
    return %arg0, %c0_i32, %c0_i32_0 : i32, i32, i32
  }
  func.func @transform_1(%arg0: i32) -> (i32, i32) {
    %c0_i32 = arith.constant 0 : i32
    %c0_i32_0 = arith.constant 0 : i32
    %c0_i32_1 = arith.constant 0 : i32
    return %c0_i32, %c0_i32_0 : i32, i32
  }
  func.func @transform_2(%arg0: i32) -> (i32, i32) {
    %c0_i32 = arith.constant 0 : i32
    %c0_i32_0 = arith.constant 0 : i32
    %c0_i32_1 = arith.constant 0 : i32
    return %c0_i32, %c0_i32_0 : i32, i32
  }
  func.func @transform_3(%arg0: i32) -> (i32, i32) {
    %c0_i32 = arith.constant 0 : i32
    %c0_i32_0 = arith.constant 0 : i32
    %c0_i32_1 = arith.constant 0 : i32
    return %c0_i32, %c0_i32_0 : i32, i32
  }
  func.func @transform_4(%arg0: i32) -> (i32, i32, i32) {
    %c0_i32 = arith.constant 0 : i32
    %c0_i32_0 = arith.constant 0 : i32
    %c0_i32_1 = arith.constant 0 : i32
    %c0_i32_2 = arith.constant 0 : i32
    return %c0_i32, %c0_i32_0, %c0_i32_1 : i32, i32, i32
  }
  func.func @transform_5(%arg0: i32) -> (i32, i32) {
    %c0_i32 = arith.constant 0 : i32
    %c0_i32_0 = arith.constant 0 : i32
    %c0_i32_1 = arith.constant 0 : i32
    return %c0_i32, %c0_i32_0 : i32, i32
  }
  func.func @transform_6(%arg0: i32) -> (i32, i32) {
    %c0_i32 = arith.constant 0 : i32
    %c0_i32_0 = arith.constant 0 : i32
    %c0_i32_1 = arith.constant 0 : i32
    return %c0_i32, %c0_i32_0 : i32, i32
  }
  func.func @transform_7(%arg0: i32) -> (i32, i32, i32) {
    %c0_i32 = arith.constant 0 : i32
    %c0_i32_0 = arith.constant 0 : i32
    %c0_i32_1 = arith.constant 0 : i32
    %c0_i32_2 = arith.constant 0 : i32
    return %c0_i32, %c0_i32_0, %c0_i32_1 : i32, i32, i32
  }
  func.func @transform_8(%arg0: i32) -> (i32, i32) {
    %c0_i32 = arith.constant 0 : i32
    %c0_i32_0 = arith.constant 0 : i32
    %c0_i32_1 = arith.constant 0 : i32
    return %c0_i32, %c0_i32_0 : i32, i32
  }
  func.func @transform_9(%arg0: i32) -> (i32, i32) {
    %c0_i32 = arith.constant 0 : i32
    %c0_i32_0 = arith.constant 0 : i32
    %c0_i32_1 = arith.constant 0 : i32
    return %c0_i32, %c0_i32_0 : i32, i32
  }
  func.func @transform_10(%arg0: i32) -> (i32, i32) {
    %c0_i32 = arith.constant 0 : i32
    %c0_i32_0 = arith.constant 0 : i32
    %c0_i32_1 = arith.constant 0 : i32
    return %c0_i32, %c0_i32_0 : i32, i32
  }
  func.func @transform_11(%arg0: i32) -> (i32, i32, i32) {
    %c0_i32 = arith.constant 0 : i32
    %c0_i32_0 = arith.constant 0 : i32
    %c0_i32_1 = arith.constant 0 : i32
    return %arg0, %c0_i32, %c0_i32_0 : i32, i32, i32
  }
}

</mosaic_0001>

<bundles_post_ra>
// kernel: model_forward.1
= control target key start
LH: loop header
LB: loop body
LE: loop exit
PB: predicated region body
PF: predicated region fallthrough
CT: control target
= control target key end

     0   :  { %s7145_s0 = inlined_call_operand.vmem [shape: bf16[2,64,64], index: 0, kind: input, shape index: {}]   ;;  %s7146_s1 = inlined_call_operand.vmem [shape: bf16[64,64], index: 1, kind: input, shape index: {}]   ;;  %s7147_s2 = inlined_call_operand.vmem [shape: f32[1,64], index: 2, kind: input, shape index: {}]   ;;  %s7148_s3 = inlined_call_operand.vmem [shape: f32[1,64], index: 3, kind: input, shape index: {}]   ;;  %s7149_s4 = inlined_call_operand.vmem [shape: bf16[16,64,128], index: 4, kind: input, shape index: {}]   ;;  %s7150_s5 = inlined_call_operand.vmem [shape: f32[1,128], index: 5, kind: input, shape index: {}]   ;;  %s7151_s6 = inlined_call_operand.vmem [shape: f32[1,128], index: 6, kind: input, shape index: {}]   ;;  %s7152_s7 = inlined_call_operand.vmem [shape: bf16[16,128,32], index: 7, kind: input, shape index: {}]   ;;  %s7153_s8 = inlined_call_operand.vmem [shape: f32[1,32], index: 8, kind: input, shape index: {}]   ;;  %s7154_s9 = inlined_call_operand.vmem [shape: f32[32,10], index: 9, kind: input, shape index: {}]   ;;  %s7155_s10 = inlined_call_operand.vmem [shape: f32[1,10], index: 10, kind: input, shape index: {}]   ;;  %s7156_s11 = inlined_call_operand.hbm [shape: f32[2,1,10], index: 11, kind: output, shape index: {}]  }
   0x1   :  { %7157 = sst [smem:[#allocation6_spill]] %s7145_s0 }
   0x2   :  { %16 = vsyncpa [#allocation4], 0 }
   0x3   :  { %18 = vsyncpa [#allocation4 + $0x1], 0  ;;  %s5828_s17 = smov 0   ;;  %s5830_s18 = smov 0  }
   0x4   :  { %s5832_s19 = smov 0   ;;  %s5834_s20 = smov 0  }
   0x5 LB: > { %s5849_s21 = sadd.s32 4294967295, %s5763_s20   ;;  %s4087_s22 = sadd.s32 4294967294, %s5763_s20   ;;  %s5763_s20 = sphi %s5834_s20, %s7164_s20   ;;  %s5759_s19 = sphi %s5832_s19, %s7163_s19   ;;  %s5755_s18 = sphi %s5830_s18, %s7162_s18   ;;  %s5751_s17 = sphi %s5828_s17, %s7161_s17  }
   0x6   : > { %s5853_s23 = sadd.s32 1, %s5763_s20   ;;  %s267_s24 = sadd.s32 1, %s5759_s19 }
   0x7   : > { %s264_s25 = ssub.s32 %s5763_s20, %s5853_s23  ;;  %p277_p0 = scmp.ne.s32.totalorder %s5759_s19, %s5755_s18 }
   0x8   : > { %p265_p1 = scmp.eq.s32.totalorder %s264_s25, 0  ;;  %p278_p2 = scmp.eq.s32.totalorder %s5849_s21, 1 }
   0x9   : > { %p283_p3 = scmp.ne.s32.totalorder %s5755_s18, %s5751_s17  ;;  %p284_p4 = scmp.eq.s32.totalorder %s4087_s22, 1 }
   0xa   : > { %s5864_s26 = scalar_select %p265_p1, %s5759_s19, %s267_s24  }
   0xb   : > { %p5866_p5 = por %p278_p2, %p277_p0  ;;  %p5870_p6 = por %p284_p4, %p283_p3 }
   0xc   : > { %p4090_p7 = scmp.ge.s32.totalorder %s5763_s20, 1  ;;  %p340_p8 = scmp.lt.s32.totalorder %s5763_s20, 3 }
   0xe   : > { %p341_p9 = pnand %p4090_p7, %p340_p8 }
   0xf   : > { %p379_p10 = scmp.lt.s32.totalorder (!%p341_p9), %s5849_s21, 1  ;;  %s7160_s0 = sld [smem:[#allocation6_spill]] (!%p341_p9) }
  0x10   : > { %344 = sbr.rel (%p341_p9) target bundleno = 1304 (0x518), region = 64  ;;  %s377_s15 = sand.u32 (!%p341_p9), 1, %s5755_s18  }
  0x11   : > { %s4678_s24 = sshll.u32 (!%p341_p9), %s5849_s21, 4  ;;  %s378_s25 = scalar_lea.vmem (!%p341_p9), [#allocation3], %s377_s15 }
  0x12   : > { %s7110_s13 = scalar_lea.hbm (!%p341_p9), %s7156_s11, %s4678_s24 }
  0x15   : > { %v5499_v0 = vld [vmem:[%s7146_s1 + $0x18] sm:$0xff]   ;;  %v5500_v1 = vld [vmem:[%s7146_s1 + $0x10] sm:$0xff]   ;;  %s380_s14 = scalar_select %p379_p10, %s5849_s21, 1  ;;  %vm445_vm0 = vcmask 523264   ;;  %v5501_v2 = vld [vmem:[%s7146_s1 + $0x8] sm:$0xff]   ;;  %v5765_v10 = vmov 0.0  }
  0x16   : > { %4919 = vmatprep.subr.bf16.mxu0 %v5499_v0  ;;  %v5502_v4 = vld [vmem:[%s7146_s1] sm:$0xff]   ;;  %v5507_v8 = vld [vmem:[%s7149_s4 + $0x38] sm:$0xff]   ;;  %4935 = vmatprep.subr.bf16.mxu1 %v5765_v10  ;;  %vm650_vm1 = vcmask 521216   ;;  %v5509_v11 = vld [vmem:[%s7149_s4 + $0x30] sm:$0xff]   ;;  %vm5766_vm2 = vmmov 0   ;;  %vm676_vm3 = vcmask 519168  }
  0x17   : > { %4920 = vmatpush3.bf16.msra.mxu0 %v5499_v0  ;;  %s4681_s22 = sshll.u32 %s380_s14, 5  ;;  %v5508_v9 = vld [vmem:[%s7149_s4 + $0x18] sm:$0xff]   ;;  %4936 = vmatpush3.bf16.msra.mxu1 %v5507_v8  ;;  %653 = vst.msk [vmem:[#allocation2 + $0x10] sm:$0x3f] %vm650_vm1, %v5765_v10  ;;  %655 = vst.msk [vmem:[#allocation2 + $0x20] sm:$0x3f] %vm650_vm1, %v5765_v10 }
  0x18   : > { %4921 = vmatprep.subr.bf16.mxu0 %v5500_v1  ;;  %s383_s29 = scalar_lea.vmem %s7160_s0, %s4681_s22  ;;  %659 = vst.msk [vmem:[#allocation2 + $0x40] sm:$0x3f] %vm650_vm1, %v5765_v10  ;;  %661 = vst.msk [vmem:[#allocation2 + $0x50] sm:$0x3f] %vm650_vm1, %v5765_v10  ;;  %4937 = vmatprep.subr.bf16.mxu1 %v5765_v10  ;;  %v5510_v12 = vld [vmem:[%s7149_s4 + $0x10] sm:$0xff]   ;;  %v5511_v13 = vld [vmem:[%s7149_s4 + $0x28] sm:$0xff]  }
  0x19   : > { %v5503_v3 = vld [vmem:[%s383_s29] sm:$0xff]   ;;  %v5504_v5 = vld [vmem:[%s383_s29 + $0x8] sm:$0xff]   ;;  %v5505_v6 = vld [vmem:[%s383_s29 + $0x10] sm:$0xff]   ;;  %666 = vst.msk [vmem:[#allocation2 + $0x78] sm:$0x3f] %vm650_vm1, %v5765_v10  ;;  %4943 = vmatprep.mubr.msk.bf16.mxu1 %vm5766_vm2, %v5765_v10  ;;  %vm679_vm4 = vcmask 523268  }
  0x1a   : > { %4927 = vmatprep.mubr.msk.bf16.mxu0 %vm445_vm0, %v5503_v3  ;;  %v5506_v7 = vld [vmem:[%s383_s29 + $0x18] sm:$0xff]   ;;  %667 = vst.msk [vmem:[#allocation2 + $0x80] sm:$0x3f] %vm650_vm1, %v5765_v10  ;;  %670 = vst.msk [vmem:[#allocation2 + $0x98] sm:$0x3f] %vm650_vm1, %v5765_v10  ;;  %v5512_v14 = vld [vmem:[%s7149_s4 + $0x8] sm:$0xff]  }
  0x1b   : > { %4922 = vmatpush3.bf16.msra.mxu0 %v5500_v1  ;;  %671 = vst.msk [vmem:[#allocation2 + $0xa0] sm:$0x3f] %vm650_vm1, %v5765_v10  ;;  %672 = vst.msk [vmem:[#allocation2 + $0xa8] sm:$0x3f] %vm650_vm1, %v5765_v10  ;;  %4938 = vmatpush3.bf16.msra.mxu1 %v5509_v11  ;;  %v5513_v15 = vld [vmem:[%s7149_s4 + $0x20] sm:$0xff]   ;;  %vm720_vm13 = vcmask 1043456  }
  0x1c   : > { %4923 = vmatprep.subr.bf16.mxu0 %v5501_v2  ;;  %673 = vst.msk [vmem:[#allocation2 + $0xb0] sm:$0x3f] %vm650_vm1, %v5765_v10  ;;  %652 = vst.msk [vmem:[#allocation2 + $0x8] sm:$0x3f] %vm650_vm1, %v5765_v10  ;;  %4939 = vmatprep.subr.bf16.mxu1 %v5765_v10  ;;  %v5514_v16 = vld [vmem:[%s7149_s4] sm:$0xff]   ;;  %s4032_s29 = sshll.u32 %s378_s25, 4  ;;  %s4033_s29 = int_to_ptr.vmem [resolvable:$true] %s4032_s29 }
  0x1d   : > { %654 = vst.msk [vmem:[#allocation2 + $0x18] sm:$0x3f] %vm650_vm1, %v5765_v10  ;;  %656 = vst.msk [vmem:[#allocation2 + $0x28] sm:$0x3f] %vm650_vm1, %v5765_v10  ;;  %s4020_s14 = scalar_lea.sflag [#allocation4], %s377_s15  ;;  %s5703_s0 = scalar_lea.vmem %s4033_s29, 16 }
  0x1e   : > { %658 = vst.msk [vmem:[#allocation2 + $0x38] sm:$0x3f] %vm650_vm1, %v5765_v10  ;;  %660 = vst.msk [vmem:[#allocation2 + $0x48] sm:$0x3f] %vm650_vm1, %v5765_v10  ;;  %p5704_p11 = scmp.ne.s32.totalorder %s4033_s29, %s5703_s0  ;;  %s5767_s21 = smov [#allocation3]  }
  0x1f   : > { %4924 = vmatpush3.bf16.msra.mxu0 %v5501_v2  ;;  %662 = vst.msk [vmem:[#allocation2 + $0x58] sm:$0x3f] %vm650_vm1, %v5765_v10  ;;  %663 = vst.msk [vmem:[#allocation2 + $0x60] sm:$0x3f] %vm650_vm1, %v5765_v10  ;;  %4940 = vmatpush3.bf16.msra.mxu1 %v5511_v13  ;;  %s5707_s16 = sshll.u32 %s5767_s21, 4  ;;  %s5708_s16 = int_to_ptr.vmem [resolvable:$false] %s5707_s16 }
  0x20   : > { %4925 = vmatprep.subr.bf16.mxu0 %v5502_v4  ;;  %664 = vst.msk [vmem:[#allocation2 + $0x68] sm:$0x3f] %vm650_vm1, %v5765_v10  ;;  %665 = vst.msk [vmem:[#allocation2 + $0x70] sm:$0x3f] %vm650_vm1, %v5765_v10  ;;  %4941 = vmatprep.subr.bf16.mxu1 %v5765_v10  ;;  %p5705_p12 = pnand %p5704_p11, %p5866_p5  ;;  %s5709_s22 = scalar_lea.vmem %s5708_s16, 32 }
  0x21   : > { %669 = vst.msk [vmem:[#allocation2 + $0x90] sm:$0x3f] %vm650_vm1, %v5765_v10  ;;  %vm4017_vm1 = vcmask 73728   ;;  %p5710_p0 = scmp.lt.s32.totalorder %s4033_s29, %s5708_s16  ;;  %p5711_p1 = scmp.lt.s32.totalorder %s5709_s22, %s5703_s0 }
  0x22   : > { %p5706_p13 = pneg %p5705_p12 }
  0x23   : > { %4926 = vmatpush3.bf16.msra.mxu0 %v5502_v4  ;;  %4942 = vmatpush3.bf16.msra.mxu1 %v5513_v15  ;;  %p5712_p2 = por %p5711_p1, %p5710_p0 }
  0x24   : > { %4947 = vmatprep.subr.bf16.mxu0 %v5765_v10  ;;  %4959 = vmatprep.subr.bf16.mxu1 %v5765_v10 }
  0x25   : > { %p5713_p3 = pnand %p5712_p2, %p5706_p13 }
  0x26   : > { %4928 = vmatmul.mubr.msk.bf16.vlgmr.msra.gmra.mxu0 %vm445_vm0, %v5504_v5 }
  0x27   : > { %4931 = vmatprep.mubr.msk.bf16.mxu0 %vm445_vm0, %v5505_v6  ;;  %4948 = vmatpush3.bf16.msra.mxu0 %v5508_v9 }
  0x28   : > { %4949 = vmatprep.subr.bf16.mxu0 %v5765_v10 }
  0x2b   : > { %4950 = vmatpush3.bf16.msra.mxu0 %v5510_v12 }
  0x2c   : > { %4951 = vmatprep.subr.bf16.mxu0 %v5765_v10 }
  0x2e   : > { %4932 = vmatmul.mubr.msk.bf16.gmra.mxu0 %vm445_vm0, %v5506_v7 }
  0x2f   : > { %4955 = vmatprep.mubr.msk.bf16.mxu0 %vm5766_vm2, %v5765_v10  ;;  %4952 = vmatpush3.bf16.msra.mxu0 %v5512_v14 }
  0x30   : > { %4953 = vmatprep.subr.bf16.mxu0 %v5765_v10 }
  0x33   : > { %4954 = vmatpush3.bf16.msra.mxu0 %v5514_v16 }
  0x34   : > { %4971 = vmatprep.subr.bf16.mxu0 %v5765_v10 }
  0xe6   : > { %v5975_v17 = vpop.f32.mrf.mxu0 }
  0xe7   : > { %v548_v22 = vmul.f32 %v5975_v17, %v5975_v17  ;;  %v526_v28 = vsel %vm445_vm0, %v5975_v17, 0.0 }
  0xe8   : > { %v5977_v18 = vpop.f32.mrf.mxu0 }
  0xe9   : > { %v546_v20 = vmul.f32 %v5977_v18, %v5977_v18  ;;  %v523_v23 = vsel %vm445_vm0, %v5977_v18, 0.0  ;;  %v557_v35 = vsel %vm445_vm0, %v548_v22, 0.0 }
  0xea   : > { %v5979_v19 = vpop.f32.mrf.mxu0 }
  0xeb   : > { %v554_v29 = vsel %vm445_vm0, %v546_v20, 0.0  ;;  %v549_v30 = vmul.f32 %v5979_v19, %v5979_v19  ;;  %v528_v36 = vsel %vm445_vm0, %v5979_v19, 0.0 }
  0xec   : > { %v5983_v21 = vpop.f32.mrf.mxu0 }
  0xed   : > { %v524_v24 = vsel %vm445_vm0, %v5983_v21, 0.0  ;;  %v547_v25 = vmul.f32 %v5983_v21, %v5983_v21  ;;  %v559_v41 = vsel %vm445_vm0, %v549_v30, 0.0 }
  0xee   : > { %v525_v26 = vadd.f32 %v524_v24, %v523_v23  ;;  %v5993_v27 = vpop.f32.mrf.mxu0 }
  0xef   : > { %v555_v31 = vsel %vm445_vm0, %v547_v25, 0.0  ;;  %v552_v46 = vmul.f32 %v5993_v27, %v5993_v27  ;;  %v534_v52 = vsel %vm445_vm0, %v5993_v27, 0.0 }
  0xf0   : > { %v527_v32 = vadd.f32 %v526_v28, %v525_v26  ;;  %v556_v33 = vadd.f32 %v555_v31, %v554_v29  ;;  %v6001_v34 = vpop.f32.mrf.mxu0  ;;  %v4105_v31 = vld [vmem:[%s7147_s2] ss:$0 sm:$0xff] }
  0xf1   : > { %v550_v37 = vmul.f32 %v6001_v34, %v6001_v34  ;;  %v530_v42 = vsel %vm445_vm0, %v6001_v34, 0.0  ;;  %v565_v57 = vsel %vm445_vm0, %v552_v46, 0.0 }
  0xf2   : > { %v558_v38 = vadd.f32 %v557_v35, %v556_v33  ;;  %v529_v39 = vadd.f32 %v528_v36, %v527_v32  ;;  %v4934_v40 = vpop.f32.mrf.mxu0 }
  0xf3   : > { %v561_v47 = vsel %vm445_vm0, %v550_v37, 0.0  ;;  %v553_v53 = vmul.f32 %v4934_v40, %v4934_v40  ;;  %v536_v58 = vsel %vm445_vm0, %v4934_v40, 0.0 }
  0xf4   : > { %v531_v43 = vadd.f32 %v530_v42, %v529_v39  ;;  %v560_v44 = vadd.f32 %v559_v41, %v558_v38  ;;  %v511_v45 = vpop.f32.mrf.mxu0 }
  0xf5   : > { %v532_v48 = vsel %vm445_vm0, %v511_v45, 0.0  ;;  %v551_v49 = vmul.f32 %v511_v45, %v511_v45  ;;  %v567_v61 = vsel %vm445_vm0, %v553_v53, 0.0 }
  0xf6   : > { %v562_v50 = vadd.f32 %v561_v47, %v560_v44  ;;  %v533_v51 = vadd.f32 %v532_v48, %v531_v43 }
  0xf7   : > { %v563_v54 = vsel %vm445_vm0, %v551_v49, 0.0 }
  0xf8   : > { %v535_v55 = vadd.f32 %v534_v52, %v533_v51  ;;  %v564_v56 = vadd.f32 %v563_v54, %v562_v50 }
  0xfa   : > { %v537_v59 = vadd.f32 %v536_v58, %v535_v55  ;;  %v566_v60 = vadd.f32 %v565_v57, %v564_v56 }
  0xfc   : > { %v538_v62 = vrot.slane %v537_v59, 4  ;;  %v568_v63 = vadd.f32 %v567_v61, %v566_v60 }
  0xfe   : > { %v539_v0 = vadd.f32 %v538_v62, %v537_v59  ;;  %v569_v1 = vrot.slane %v568_v63, 4 }
 0x100   : > { %v540_v2 = vrot.slane %v539_v0, 2  ;;  %v570_v3 = vadd.f32 %v569_v1, %v568_v63 }
 0x102   : > { %v541_v4 = vadd.f32 %v540_v2, %v539_v0  ;;  %v571_v5 = vrot.slane %v570_v3, 2 }
 0x104   : > { %v542_v6 = vrot.slane %v541_v4, 1  ;;  %v572_v7 = vadd.f32 %v571_v5, %v570_v3  ;;  %v710_v5 = vld [vmem:[#allocation2 + $0x90] sm:$0xf] }
 0x106   : > { %v543_v8 = vadd.f32 %v542_v6, %v541_v4  ;;  %v573_v9 = vrot.slane %v572_v7, 1  ;;  %v733_v4 = vld [vmem:[#allocation2 + $0x61] sm:$0xf] }
 0x108   : > { %v545_v11 = vmul.f32 0.015625, %v543_v8  ;;  %v574_v12 = vadd.f32 %v573_v9, %v572_v7 }
 0x10a   : > { %v575_v13 = vmul.f32 0.015625, %v574_v12  ;;  %v576_v14 = vmul.f32 %v545_v11, %v545_v11  ;;  %v578_v20 = vsub.f32 %v5977_v18, %v545_v11  ;;  %v579_v22 = vsub.f32 %v5983_v21, %v545_v11 }
 0x10b   : > { %v580_v23 = vsub.f32 %v5975_v17, %v545_v11  ;;  %v581_v24 = vsub.f32 %v5979_v19, %v545_v11  ;;  %v582_v26 = vsub.f32 %v6001_v34, %v545_v11  ;;  %v583_v28 = vsub.f32 %v511_v45, %v545_v11  ;;  %v4106_v34 = vld [vmem:[%s7148_s3] ss:$0 sm:$0xff] }
 0x10c   : > { %v577_v15 = vsub.f32 %v575_v13, %v576_v14  ;;  %v584_v29 = vsub.f32 %v5993_v27, %v545_v11  ;;  %v585_v30 = vsub.f32 %v4934_v40, %v545_v11 }
 0x10e   : > { %v586_v16 = vadd.f32 1e-05, %v577_v15 }
 0x110   : > { %5699 = vrsqrt.f32 %v586_v16 }
 0x11d   : > { %v5700_v25 = vpop.eup %5699 }
 0x11e   : > { %v588_v32 = vmul.f32 %v5700_v25, %v578_v20  ;;  %v589_v33 = vmul.f32 %v5700_v25, %v579_v22  ;;  %v590_v18 = vmul.f32 %v5700_v25, %v580_v23  ;;  %v591_v35 = vmul.f32 %v5700_v25, %v581_v24  ;;  %v5515_v23 = vld [vmem:[%s7149_s4 + $0x58] sm:$0xff]  }
 0x11f   : > { %v592_v17 = vmul.f32 %v5700_v25, %v582_v26  ;;  %v593_v21 = vmul.f32 %v5700_v25, %v583_v28  ;;  %v594_v19 = vmul.f32 %v5700_v25, %v584_v29  ;;  %v595_v36 = vmul.f32 %v5700_v25, %v585_v30  ;;  %v5516_v24 = vld [vmem:[%s7149_s4 + $0x78] sm:$0xff]  }
 0x120   : > { %v603_v27 = vmul.f32 %v4105_v31, %v588_v32  ;;  %v604_v37 = vmul.f32 %v4105_v31, %v589_v33  ;;  %v605_v38 = vmul.f32 %v4105_v31, %v590_v18  ;;  %v606_v39 = vmul.f32 %v4105_v31, %v591_v35  ;;  %v6071_v30 = vld [vmem:[#allocation2 + $0x58] sm:$0xf] }
 0x121   : > { %v607_v40 = vmul.f32 %v4105_v31, %v592_v17  ;;  %v608_v41 = vmul.f32 %v4105_v31, %v593_v21  ;;  %v609_v42 = vmul.f32 %v4105_v31, %v594_v19  ;;  %v610_v43 = vmul.f32 %v4105_v31, %v595_v36  ;;  %v6073_v31 = vld [vmem:[#allocation2 + $0x29] sm:$0xf]  ;;  %v6081_v35 = vld [vmem:[#allocation2 + $0x59] sm:$0xf]  ;;  %v5517_v19 = vld [vmem:[%s7149_s4 + $0x50] sm:$0xff]  }
 0x122   : > { %v618_v44 = vadd.f32 %v4106_v34, %v603_v27  ;;  %v619_v45 = vadd.f32 %v4106_v34, %v604_v37  ;;  %v620_v46 = vadd.f32 %v4106_v34, %v605_v38  ;;  %v621_v47 = vadd.f32 %v4106_v34, %v606_v39  ;;  %v6083_v17 = vld [vmem:[#allocation2 + $0x2a] sm:$0xf] }
 0x123   : > { %v622_v48 = vadd.f32 %v4106_v34, %v607_v40  ;;  %v623_v49 = vadd.f32 %v4106_v34, %v608_v41  ;;  %v624_v50 = vadd.f32 %v4106_v34, %v609_v42  ;;  %v625_v51 = vadd.f32 %v4106_v34, %v610_v43 }
 0x124   : > { %vm626_vm5 = vcmp.ge.f32.partialorder %v618_v44, 0.0  ;;  %vm627_vm6 = vcmp.ge.f32.partialorder %v619_v45, 0.0  ;;  %vm628_vm7 = vcmp.ge.f32.partialorder %v620_v46, 0.0  ;;  %vm629_vm8 = vcmp.ge.f32.partialorder %v621_v47, 0.0 }
 0x125   : > { %vm630_vm9 = vcmp.ge.f32.partialorder %v622_v48, 0.0  ;;  %vm631_vm10 = vcmp.ge.f32.partialorder %v623_v49, 0.0  ;;  %vm632_vm11 = vcmp.ge.f32.partialorder %v624_v50, 0.0  ;;  %vm633_vm12 = vcmp.ge.f32.partialorder %v625_v51, 0.0 }
 0x126   : > { %v634_v52 = vmul.f32 0.2, %v618_v44  ;;  %v635_v53 = vmul.f32 0.2, %v619_v45  ;;  %v636_v54 = vmul.f32 0.2, %v620_v46 }
 0x127   : > { %v637_v55 = vmul.f32 0.2, %v621_v47  ;;  %v638_v56 = vmul.f32 0.2, %v622_v48  ;;  %v639_v57 = vmul.f32 0.2, %v623_v49 }
 0x128   : > { %v640_v58 = vmul.f32 0.2, %v624_v50  ;;  %v641_v59 = vmul.f32 0.2, %v625_v51  ;;  %v642_v60 = vsel %vm626_vm5, %v618_v44, %v634_v52  ;;  %v643_v61 = vsel %vm627_vm6, %v619_v45, %v635_v53  ;;  %v5518_v45 = vld [vmem:[%s7149_s4 + $0x70] sm:$0xff]  }
 0x129   : > { %v644_v62 = vsel %vm628_vm7, %v620_v46, %v636_v54  ;;  %v645_v63 = vsel %vm629_vm8, %v621_v47, %v637_v55  ;;  %v647_v0 = vsel %vm631_vm10, %v623_v49, %v639_v57  ;;  %680 = vst.msk [vmem:[#allocation2 + $0xd] sm:$0xf0] %vm679_vm4, %v642_v60  ;;  %684 = vst.msk [vmem:[#allocation2 + $0x1d] sm:$0xf0] %vm679_vm4, %v643_v61  ;;  %v1805_v43 = vrot.slane %v6071_v30, 4 }
 0x12a   : > { %677 = vst.msk [vmem:[#allocation2 + $0x9] sm:$0xf] %vm676_vm3, %v642_v60  ;;  %682 = vst.msk [vmem:[#allocation2 + $0x19] sm:$0xf] %vm676_vm3, %v643_v61  ;;  %v646_v1 = vsel %vm630_vm9, %v622_v48, %v638_v56  ;;  %v648_v2 = vsel %vm632_vm11, %v624_v50, %v640_v58  ;;  %v649_v3 = vsel %vm633_vm12, %v625_v51, %v641_v59  ;;  %v1895_v44 = vrot.slane %v6073_v31, 4  ;;  %v5519_v51 = vld [vmem:[%s7149_s4 + $0x48] sm:$0xff]  }
 0x12b   : > { %688 = vst.msk [vmem:[#allocation2 + $0x3d] sm:$0xf0] %vm679_vm4, %v644_v62  ;;  %692 = vst.msk [vmem:[#allocation2 + $0x4d] sm:$0xf0] %vm679_vm4, %v645_v63  ;;  %v891_v46 = vld [vmem:[#allocation2 + $0x91] sm:$0xf] }
 0x12c   : > { %698 = vst.msk [vmem:[#allocation2 + $0x79] sm:$0xf] %vm676_vm3, %v647_v0  ;;  %686 = vst.msk [vmem:[#allocation2 + $0x39] sm:$0xf] %vm676_vm3, %v644_v62  ;;  %v983_v52 = vld [vmem:[#allocation2 + $0x62] sm:$0xf] }
 0x12d   : > { %700 = vst.msk [vmem:[#allocation2 + $0x7d] sm:$0xf0] %vm679_vm4, %v647_v0  ;;  %696 = vst.msk [vmem:[#allocation2 + $0x6d] sm:$0xf0] %vm679_vm4, %v646_v1  ;;  %v1984_v55 = vrot.slane %v6081_v35, 4  ;;  %v2073_v56 = vrot.slane %v6083_v17, 4 }
 0x12e   : > { %690 = vst.msk [vmem:[#allocation2 + $0x49] sm:$0xf] %vm676_vm3, %v645_v63  ;;  %694 = vst.msk [vmem:[#allocation2 + $0x69] sm:$0xf] %vm676_vm3, %v646_v1  ;;  %v5520_v1 = vld [vmem:[%s7149_s4 + $0x68] sm:$0xff]  }
 0x12f   : > { %702 = vst.msk [vmem:[#allocation2 + $0x99] sm:$0xf] %vm676_vm3, %v648_v2  ;;  %706 = vst.msk [vmem:[#allocation2 + $0xa9] sm:$0xf] %vm676_vm3, %v649_v3 }
 0x130   : > { %704 = vst.msk [vmem:[#allocation2 + $0x9d] sm:$0xf0] %vm679_vm4, %v648_v2  ;;  %708 = vst.msk [vmem:[#allocation2 + $0xad] sm:$0xf0] %vm679_vm4, %v649_v3  ;;  %v1168_v35 = vld [vmem:[#allocation2 + $0x11] sm:$0xf] }
 0x131   : > { %v6100_v42 = vld [vmem:[#allocation2 + $0x19] sm:$0xf] }
 0x132   : > { %v6124_v58 = vld [vmem:[#allocation2 + $0x40] sm:$0xf]  ;;  %v1892_v59 = vrot.slane %v6100_v42, 4  ;;  %v6133_v62 = vld [vmem:[#allocation2 + $0x50] sm:$0xf] }
 0x133   : > { %v6056_v8 = vld [vmem:[#allocation2 + $0x79] sm:$0xf]  ;;  %v6183_v17 = vld [vmem:[#allocation2 + $0x41] sm:$0xf] }
 0x134   : > { %v735_v7 = vld [vmem:[#allocation2 + $0x71] sm:$0xf]  ;;  %v741_v11 = vrot.slane %v6056_v8, 4  ;;  %v6098_v41 = vld [vmem:[#allocation2 + $0x7a] sm:$0xf] }
 0x135   : > { %v734_v6 = vld [vmem:[#allocation2 + $0x69] sm:$0xf]  ;;  %v1534_v12 = vrot.slane %v735_v7, 4  ;;  %v6076_v33 = vld [vmem:[#allocation2 + $0x72] sm:$0xf]  ;;  %v991_v57 = vrot.slane %v6098_v41, 4 }
 0x136   : > { %v738_v9 = vrot.slane %v734_v6, 4  ;;  %v711_v13 = vld [vmem:[#allocation2 + $0x98] sm:$0xf]  ;;  %v6059_v14 = vld [vmem:[#allocation2 + $0xa8] sm:$0xf]  ;;  %v744_v20 = vsel %vm720_vm13, %v735_v7, %v741_v11  ;;  %v1712_v38 = vrot.slane %v6076_v33, 4 }
 0x137   : > { %v715_v15 = vrot.slane %v711_v13, 4  ;;  %v718_v22 = vrot.slane %v6059_v14, 4  ;;  %v893_v25 = vld [vmem:[#allocation2 + $0xa1] sm:$0xf]  ;;  %v6079_v18 = vsel %vm720_vm13, %v734_v6, %v1534_v12  ;;  %v892_v36 = vld [vmem:[#allocation2 + $0x99] sm:$0xf] }
 0x138   : > { %v743_v16 = vsel %vm720_vm13, %v733_v4, %v738_v9  ;;  %v712_v28 = vld [vmem:[#allocation2 + $0xa0] sm:$0xf]  ;;  %v6089_v34 = vld [vmem:[#allocation2 + $0xa9] sm:$0xf]  ;;  %v1623_v27 = vrot.slane %v893_v25, 4  ;;  %v896_v47 = vrot.slane %v892_v36, 4 }
 0x139   : > { %v745_v26 = vpack.c.bf16 %v744_v20, %v743_v16  ;;  %v721_v29 = vsel %vm720_vm13, %v710_v5, %v715_v15  ;;  %v722_v32 = vsel %vm720_vm13, %v712_v28, %v718_v22  ;;  %v984_v37 = vld [vmem:[#allocation2 + $0x6a] sm:$0xf]  ;;  %v1445_v40 = vrot.slane %v712_v28, 4  ;;  %v6135_v63 = vld [vmem:[#allocation2 + $0x1a] sm:$0xf]  ;;  %v5521_v16 = vld [vmem:[%s7149_s4 + $0x40] sm:$0xff]  }
 0x13a   : > { %v723_v21 = vpack.c.bf16 %v722_v32, %v721_v29  ;;  %v6094_v39 = vld [vmem:[#allocation2 + $0x48] sm:$0xf]  ;;  %v899_v48 = vrot.slane %v6089_v34, 4  ;;  %v988_v53 = vrot.slane %v984_v37, 4  ;;  %v6119_v54 = vsel %vm720_vm13, %v892_v36, %v1623_v27  ;;  %v1443_v0 = vld [vmem:[#allocation2 + $0xb0] sm:$0xf] }
 0x13b   : > { %4944 = vmatmul.mubr.msk.bf16.vlgmr.msra.gmra.mxu1 %vm445_vm0, %v745_v26  ;;  %v1802_v49 = vrot.slane %v6094_v39, 4  ;;  %v6112_v50 = vsel %vm720_vm13, %v711_v13, %v1445_v40  ;;  %v6127_v60 = vld [vmem:[#allocation2 + $0x49] sm:$0xf]  ;;  %v6130_v61 = vsel %vm720_vm13, %v984_v37, %v1712_v38  ;;  %v901_v2 = vsel %vm720_vm13, %v891_v46, %v896_v47  ;;  %v1532_v5 = vld [vmem:[#allocation2 + $0x81] sm:$0xf] }
 0x13c   : > { %4960 = vmatpush3.bf16.msra.mxu1 %v5515_v23  ;;  %4967 = vmatprep.mubr.msk.bf16.mxu1 %vm5766_vm2, %v5765_v10  ;;  %v902_v3 = vsel %vm720_vm13, %v893_v25, %v899_v48  ;;  %v1448_v4 = vrot.slane %v1443_v0, 4  ;;  %v1621_v6 = vld [vmem:[#allocation2 + $0xb1] sm:$0xf]  ;;  %v993_v9 = vsel %vm720_vm13, %v983_v52, %v988_v53  ;;  %v1981_v11 = vrot.slane %v6127_v60, 4  ;;  %v1710_v15 = vld [vmem:[#allocation2 + $0x82] sm:$0xf] }
 0x13d   : > { %4956 = vmatmul.mubr.msk.bf16.vlgmr.msra.gmra.mxu0 %vm445_vm0, %v723_v21  ;;  %4961 = vmatprep.subr.bf16.mxu1 %v5765_v10  ;;  %v6144_v7 = vsel %vm720_vm13, %v6124_v58, %v1802_v49  ;;  %v1537_v12 = vrot.slane %v1532_v5, 4  ;;  %v1626_v13 = vrot.slane %v1621_v6, 4  ;;  %v6152_v20 = vld [vmem:[#allocation2 + $0x21] sm:$0xf]  ;;  %v2070_v22 = vrot.slane %v6135_v63, 4  ;;  %v5524_v49 = vld [vmem:[%s7149_s4 + $0xb8] sm:$0xff]  }
 0x13e   : > { %4972 = vmatpush3.bf16.msra.mxu0 %v5516_v24  ;;  %4979 = vmatprep.mubr.msk.bf16.mxu0 %vm5766_vm2, %v5765_v10  ;;  %v6157_v23 = vsel %vm720_vm13, %v6059_v14, %v1448_v4  ;;  %v1715_v24 = vrot.slane %v1710_v15, 4  ;;  %v6161_v25 = vsel %vm720_vm13, %v6133_v62, %v1805_v43  ;;  %v994_v26 = vsel %vm720_vm13, %v6076_v33, %v991_v57  ;;  %v6166_v28 = vld [vmem:[#allocation2 + $0x51] sm:$0xf]  ;;  %v6168_v29 = vld [vmem:[#allocation2 + $0x22] sm:$0xf] }
 0x13f   : > { %4973 = vmatprep.subr.bf16.mxu0 %v5765_v10  ;;  %v1452_v30 = vpack.c.bf16 %v6157_v23, %v6112_v50  ;;  %v6174_v14 = vsel %vm720_vm13, %v6056_v8, %v1537_v12  ;;  %v6178_v32 = vsel %vm720_vm13, %v6089_v34, %v1626_v13  ;;  %v5522_v33 = vld [vmem:[%s7149_s4 + $0x60] sm:$0xff]   ;;  %v1809_v36 = vpack.c.bf16 %v6161_v25, %v6144_v7  ;;  %v6196_v34 = vld [vmem:[#allocation2 + $0x12] sm:$0xf]  ;;  %v1167_v5 = vld [vmem:[#allocation2 + $0x9] sm:$0xf] }
 0x140   : > { %4962 = vmatpush3.bf16.msra.mxu1 %v5517_v19  ;;  %v1541_v21 = vpack.c.bf16 %v6174_v14, %v6079_v18  ;;  %v1630_v19 = vpack.c.bf16 %v6178_v32, %v6119_v54  ;;  %v6191_v8 = vsel %vm720_vm13, %v6098_v41, %v1715_v24  ;;  %v6201_v37 = vsel %vm720_vm13, %v1168_v35, %v1892_v59  ;;  %v5523_v41 = vld [vmem:[%s7149_s4 + $0x98] sm:$0xff]   ;;  %v5525_v52 = vld [vmem:[%s7149_s4 + $0x90] sm:$0xff]   ;;  %v5529_v0 = vld [vmem:[%s7149_s4 + $0x80] sm:$0xff]  }
 0x141   : > { %4963 = vmatprep.subr.bf16.mxu1 %v5765_v10  ;;  %v1719_v27 = vpack.c.bf16 %v6191_v8, %v6130_v61  ;;  %v6207_v38 = vsel %vm720_vm13, %v6152_v20, %v1895_v44  ;;  %v6211_v40 = vsel %vm720_vm13, %v6183_v17, %v1981_v11  ;;  %v6224_v31 = vsel %vm720_vm13, %v6196_v34, %v2070_v22  ;;  %v5526_v53 = vld [vmem:[%s7149_s4 + $0xb0] sm:$0xff]   ;;  %v5531_v11 = vld [vmem:[%s7149_s4 + $0xd8] sm:$0xff]   ;;  %v5551_v23 = vld [vmem:[%s7149_s4 + $0x148] sm:$0xff]  }
 0x142   : > { %4974 = vmatpush3.bf16.msra.mxu0 %v5518_v45  ;;  %v1899_v43 = vpack.c.bf16 %v6207_v38, %v6201_v37  ;;  %v6220_v45 = vsel %vm720_vm13, %v6166_v28, %v1984_v55  ;;  %v6228_v44 = vsel %vm720_vm13, %v6168_v29, %v2073_v56  ;;  %v903_v46 = vpack.c.bf16 %v902_v3, %v901_v2  ;;  %v5527_v55 = vld [vmem:[%s7149_s4 + $0x88] sm:$0xff]   ;;  %v1075_v3 = vld [vmem:[#allocation2 + $0x38] sm:$0xf]  ;;  %v5534_v15 = vld [vmem:[%s7149_s4 + $0xf0] sm:$0xff]  }
 0x143   : > { %4975 = vmatprep.subr.bf16.mxu0 %v5765_v10  ;;  %v1988_v47 = vpack.c.bf16 %v6220_v45, %v6211_v40  ;;  %v2077_v48 = vpack.c.bf16 %v6228_v44, %v6224_v31  ;;  %v5528_v56 = vld [vmem:[%s7149_s4 + $0xa8] sm:$0xff]   ;;  %v1080_v57 = vrot.slane %v6124_v58, 4  ;;  %v1083_v59 = vrot.slane %v6133_v62, 4  ;;  %v5530_v58 = vld [vmem:[%s7149_s4 + $0xa0] sm:$0xff]   ;;  %v5550_v50 = vld [vmem:[%s7149_s4 + $0x170] sm:$0xff]  }
 0x144   : > { %4964 = vmatpush3.bf16.msra.mxu1 %v5519_v51  ;;  %v995_v51 = vpack.c.bf16 %v994_v26, %v993_v9  ;;  %v1175_v2 = vrot.slane %v6152_v20, 4  ;;  %v5536_v20 = vld [vmem:[%s7149_s4 + $0xe8] sm:$0xff]   ;;  %v1264_v22 = vrot.slane %v6183_v17, 4  ;;  %v1267_v24 = vrot.slane %v6166_v28, 4  ;;  %v5537_v26 = vld [vmem:[%s7149_s4 + $0xc0] sm:$0xff]   ;;  %v5558_v54 = vld [vmem:[%s7149_s4 + $0x1b0] sm:$0xff]  }
 0x145   : > { %4965 = vmatprep.subr.bf16.mxu1 %v5765_v10  ;;  %v1085_v62 = vsel %vm720_vm13, %v1075_v3, %v1080_v57  ;;  %v1086_v4 = vsel %vm720_vm13, %v6094_v39, %v1083_v59  ;;  %v5532_v39 = vld [vmem:[%s7149_s4 + $0xf8] sm:$0xff]   ;;  %v5538_v17 = vld [vmem:[%s7149_s4 + $0xe0] sm:$0xff]   ;;  %v5544_v57 = vld [vmem:[%s7149_s4 + $0x128] sm:$0xff]  }
 0x146   : > { %4976 = vmatpush3.bf16.msra.mxu0 %v5520_v1  ;;  %v1172_v1 = vrot.slane %v1168_v35, 4  ;;  %v1178_v9 = vsel %vm720_vm13, %v6100_v42, %v1175_v2  ;;  %v1087_v12 = vpack.c.bf16 %v1086_v4, %v1085_v62  ;;  %v5533_v42 = vld [vmem:[%s7149_s4 + $0xd0] sm:$0xff]   ;;  %v1359_v35 = vrot.slane %v6168_v29, 4  ;;  %v5545_v59 = vld [vmem:[%s7149_s4 + $0x100] sm:$0xff]   ;;  %v5548_v2 = vld [vmem:[%s7149_s4 + $0x178] sm:$0xff]  }
 0x147   : > { %4977 = vmatprep.subr.bf16.mxu0 %v5765_v10  ;;  %v5549_v3 = vld [vmem:[%s7149_s4 + $0x150] sm:$0xff]   ;;  %v5552_v18 = vld [vmem:[%s7149_s4 + $0x168] sm:$0xff]   ;;  %v5554_v14 = vld [vmem:[%s7149_s4 + $0x160] sm:$0xff]  }
 0x148   : > { %4966 = vmatpush3.bf16.msra.mxu1 %v5521_v16  ;;  %v1177_v6 = vsel %vm720_vm13, %v1167_v5, %v1172_v1  ;;  %v5535_v16 = vld [vmem:[%s7149_s4 + $0xc8] sm:$0xff]   ;;  %v1362_v29 = vsel %vm720_vm13, %v6135_v63, %v1359_v35  ;;  %v5541_v63 = vld [vmem:[%s7149_s4 + $0x110] sm:$0xff]   ;;  %v5547_v1 = vld [vmem:[%s7149_s4 + $0x158] sm:$0xff]  }
 0x149   : > { %4983 = vmatprep.subr.bf16.mxu1 %v5765_v10  ;;  %v1179_v13 = vpack.c.bf16 %v1178_v9, %v1177_v6  ;;  %v5557_v62 = vld [vmem:[%s7149_s4 + $0x190] sm:$0xff]   ;;  %v5559_v32 = vld [vmem:[%s7149_s4 + $0x188] sm:$0xff]   ;;  %v5562_v8 = vld [vmem:[%s7149_s4 + $0x1a0] sm:$0xff]  }
 0x14a   : > { %4978 = vmatpush3.bf16.msra.mxu0 %v5522_v33  ;;  %v1356_v33 = vrot.slane %v6196_v34, 4  ;;  %v5560_v61 = vld [vmem:[%s7149_s4 + $0x1a8] sm:$0xff]   ;;  %v5564_v4 = vld [vmem:[%s7149_s4 + $0x1f8] sm:$0xff]   ;;  %v5565_v5 = vld [vmem:[%s7149_s4 + $0x1d0] sm:$0xff]  }
 0x14b   : > { %4968 = vmatmul.mubr.msk.bf16.vlgmr.msra.gmra.mxu1 %vm445_vm0, %v903_v46  ;;  %4995 = vmatprep.subr.bf16.mxu0 %v5765_v10  ;;  %v1270_v46 = vsel %vm720_vm13, %v6127_v60, %v1267_v24  ;;  %v5540_v60 = vld [vmem:[%s7149_s4 + $0x138] sm:$0xff]   ;;  %v5566_v7 = vld [vmem:[%s7149_s4 + $0x1f0] sm:$0xff]   ;;  %v5567_v25 = vld [vmem:[%s7149_s4 + $0x1c8] sm:$0xff]  }
 0x14c   : > { %4984 = vmatpush3.bf16.msra.mxu1 %v5523_v41  ;;  %4991 = vmatprep.mubr.msk.bf16.mxu1 %vm5766_vm2, %v5765_v10  ;;  %v1259_v41 = vld [vmem:[#allocation2 + $0x39] sm:$0xf]  ;;  %v5569_v37 = vld [vmem:[%s7149_s4 + $0x1c0] sm:$0xff]  }
 0x14d   : > { %4980 = vmatmul.mubr.msk.bf16.vlgmr.msra.gmra.mxu0 %vm445_vm0, %v995_v51  ;;  %4985 = vmatprep.subr.bf16.mxu1 %v5765_v10  ;;  %v1269_v28 = vsel %vm720_vm13, %v1259_v41, %v1264_v22  ;;  %v5539_v51 = vld [vmem:[%s7149_s4 + $0x118] sm:$0xff]   ;;  %v5570_v38 = vld [vmem:[%s7149_s4 + $0x1e0] sm:$0xff]  }
 0x14e   : > { %4996 = vmatpush3.bf16.msra.mxu0 %v5524_v49  ;;  %5003 = vmatprep.mubr.msk.bf16.mxu0 %vm5766_vm2, %v5765_v10  ;;  %v1351_v49 = vld [vmem:[#allocation2 + $0xa] sm:$0xf]  ;;  %v5571_v35 = vld [vmem:[%s7152_s7 + $0x38] sm:$0xff]  }
 0x14f   : > { %4997 = vmatprep.subr.bf16.mxu0 %v5765_v10  ;;  %v1361_v34 = vsel %vm720_vm13, %v1351_v49, %v1356_v33  ;;  %v5575_v49 = vld [vmem:[%s7152_s7 + $0x28] sm:$0xff]  }
 0x150   : > { %4986 = vmatpush3.bf16.msra.mxu1 %v5525_v52  ;;  %v1271_v52 = vpack.c.bf16 %v1270_v46, %v1269_v28  ;;  %v5573_v28 = vld [vmem:[%s7152_s7 + $0x30] sm:$0xff]  }
 0x151   : > { %4987 = vmatprep.subr.bf16.mxu1 %v5765_v10  ;;  %v5574_v46 = vld [vmem:[%s7152_s7 + $0x70] sm:$0xff]  }
 0x152   : > { %4998 = vmatpush3.bf16.msra.mxu0 %v5526_v53  ;;  %v1363_v53 = vpack.c.bf16 %v1362_v29, %v1361_v34 }
 0x153   : > { %4999 = vmatprep.subr.bf16.mxu0 %v5765_v10 }
 0x154   : > { %4988 = vmatpush3.bf16.msra.mxu1 %v5527_v55  ;;  %v5542_v55 = vld [vmem:[%s7149_s4 + $0x130] sm:$0xff]  }
 0x155   : > { %4989 = vmatprep.subr.bf16.mxu1 %v5765_v10 }
 0x156   : > { %5000 = vmatpush3.bf16.msra.mxu0 %v5528_v56  ;;  %v5543_v56 = vld [vmem:[%s7149_s4 + $0x108] sm:$0xff]  }
 0x157   : > { %5001 = vmatprep.subr.bf16.mxu0 %v5765_v10 }
 0x158   : > { %4990 = vmatpush3.bf16.msra.mxu1 %v5529_v0  ;;  %v5546_v0 = vld [vmem:[%s7149_s4 + $0x120] sm:$0xff]  }
 0x159   : > { %5007 = vmatprep.subr.bf16.mxu1 %v5765_v10 }
 0x15a   : > { %5002 = vmatpush3.bf16.msra.mxu0 %v5530_v58  ;;  %v5556_v58 = vld [vmem:[%s7149_s4 + $0x1b8] sm:$0xff]  }
 0x15b   : > { %4992 = vmatmul.mubr.msk.bf16.vlgmr.msra.gmra.mxu1 %vm445_vm0, %v1087_v12  ;;  %5019 = vmatprep.subr.bf16.mxu0 %v5765_v10 }
 0x15c   : > { %5008 = vmatpush3.bf16.msra.mxu1 %v5531_v11  ;;  %5015 = vmatprep.mubr.msk.bf16.mxu1 %vm5766_vm2, %v5765_v10 }
 0x15d   : > { %5004 = vmatmul.mubr.msk.bf16.vlgmr.msra.gmra.mxu0 %vm445_vm0, %v1179_v13  ;;  %5009 = vmatprep.subr.bf16.mxu1 %v5765_v10 }
 0x15e   : > { %5020 = vmatpush3.bf16.msra.mxu0 %v5532_v39  ;;  %5027 = vmatprep.mubr.msk.bf16.mxu0 %vm5766_vm2, %v5765_v10 }
 0x15f   : > { %5021 = vmatprep.subr.bf16.mxu0 %v5765_v10 }
 0x160   : > { %5010 = vmatpush3.bf16.msra.mxu1 %v5533_v42 }
 0x161   : > { %5011 = vmatprep.subr.bf16.mxu1 %v5765_v10 }
 0x162   : > { %5022 = vmatpush3.bf16.msra.mxu0 %v5534_v15 }
 0x163   : > { %5023 = vmatprep.subr.bf16.mxu0 %v5765_v10 }
 0x164   : > { %5012 = vmatpush3.bf16.msra.mxu1 %v5535_v16 }
 0x165   : > { %5013 = vmatprep.subr.bf16.mxu1 %v5765_v10 }
 0x166   : > { %5024 = vmatpush3.bf16.msra.mxu0 %v5536_v20 }
 0x167   : > { %5025 = vmatprep.subr.bf16.mxu0 %v5765_v10 }
 0x168   : > { %5014 = vmatpush3.bf16.msra.mxu1 %v5537_v26 }
 0x169   : > { %5031 = vmatprep.subr.bf16.mxu1 %v5765_v10 }
 0x16a   : > { %5026 = vmatpush3.bf16.msra.mxu0 %v5538_v17  ;;  %v5572_v17 = vld [vmem:[%s7152_s7 + $0x78] sm:$0xff]  }
 0x16b   : > { %5016 = vmatmul.mubr.msk.bf16.vlgmr.msra.gmra.mxu1 %vm445_vm0, %v1271_v52  ;;  %5043 = vmatprep.subr.bf16.mxu0 %v5765_v10 }
 0x16c   : > { %5032 = vmatpush3.bf16.msra.mxu1 %v5539_v51  ;;  %5039 = vmatprep.mubr.msk.bf16.mxu1 %vm5766_vm2, %v5765_v10  ;;  %v5576_v51 = vld [vmem:[%s7152_s7 + $0x68] sm:$0xff]  }
 0x16d   : > { %5028 = vmatmul.mubr.msk.bf16.vlgmr.msra.gmra.mxu0 %vm445_vm0, %v1363_v53  ;;  %5033 = vmatprep.subr.bf16.mxu1 %v5765_v10 }
 0x16e   : > { %5044 = vmatpush3.bf16.msra.mxu0 %v5540_v60  ;;  %5051 = vmatprep.mubr.msk.bf16.mxu0 %vm5766_vm2, %v5765_v10 }
 0x16f   : > { %5045 = vmatprep.subr.bf16.mxu0 %v5765_v10 }
 0x170   : > { %5034 = vmatpush3.bf16.msra.mxu1 %v5541_v63  ;;  %v5577_v63 = vld [vmem:[%s7152_s7 + $0x20] sm:$0xff]  }
 0x171   : > { %5035 = vmatprep.subr.bf16.mxu1 %v5765_v10 }
 0x172   : > { %5046 = vmatpush3.bf16.msra.mxu0 %v5542_v55 }
 0x173   : > { %5047 = vmatprep.subr.bf16.mxu0 %v5765_v10 }
 0x174   : > { %5036 = vmatpush3.bf16.msra.mxu1 %v5543_v56 }
 0x175   : > { %5037 = vmatprep.subr.bf16.mxu1 %v5765_v10 }
 0x176   : > { %5048 = vmatpush3.bf16.msra.mxu0 %v5544_v57  ;;  %v5578_v57 = vld [vmem:[%s7152_s7 + $0x60] sm:$0xff]  }
 0x177   : > { %5049 = vmatprep.subr.bf16.mxu0 %v5765_v10 }
 0x178   : > { %5038 = vmatpush3.bf16.msra.mxu1 %v5545_v59 }
 0x179   : > { %5055 = vmatprep.subr.bf16.mxu1 %v5765_v10 }
 0x17a   : > { %5050 = vmatpush3.bf16.msra.mxu0 %v5546_v0 }
 0x17b   : > { %5040 = vmatmul.mubr.msk.bf16.vlgmr.msra.gmra.mxu1 %vm445_vm0, %v1452_v30  ;;  %5067 = vmatprep.subr.bf16.mxu0 %v5765_v10  ;;  %v5553_v30 = vld [vmem:[%s7149_s4 + $0x140] sm:$0xff]  }
 0x17c   : > { %5056 = vmatpush3.bf16.msra.mxu1 %v5547_v1  ;;  %5063 = vmatprep.mubr.msk.bf16.mxu1 %vm5766_vm2, %v5765_v10  ;;  %v5579_v1 = vld [vmem:[%s7152_s7 + $0x18] sm:$0xff]  }
 0x17d   : > { %5052 = vmatmul.mubr.msk.bf16.vlgmr.msra.gmra.mxu0 %vm445_vm0, %v1541_v21  ;;  %5057 = vmatprep.subr.bf16.mxu1 %v5765_v10  ;;  %v5555_v21 = vld [vmem:[%s7149_s4 + $0x198] sm:$0xff]  }
 0x17e   : > { %5068 = vmatpush3.bf16.msra.mxu0 %v5548_v2  ;;  %5075 = vmatprep.mubr.msk.bf16.mxu0 %vm5766_vm2, %v5765_v10  ;;  %v5580_v2 = vld [vmem:[%s7152_s7 + $0x58] sm:$0xff]  }
 0x17f   : > { %5069 = vmatprep.subr.bf16.mxu0 %v5765_v10 }
 0x180   : > { %5058 = vmatpush3.bf16.msra.mxu1 %v5549_v3 }
 0x181   : > { %5059 = vmatprep.subr.bf16.mxu1 %v5765_v10 }
 0x182   : > { %5070 = vmatpush3.bf16.msra.mxu0 %v5550_v50  ;;  %v5581_v50 = vld [vmem:[%s7152_s7 + $0x10] sm:$0xff]  }
 0x183   : > { %5071 = vmatprep.subr.bf16.mxu0 %v5765_v10 }
 0x184   : > { %5060 = vmatpush3.bf16.msra.mxu1 %v5551_v23  ;;  %v5582_v23 = vld [vmem:[%s7152_s7 + $0x50] sm:$0xff]  }
 0x185   : > { %5061 = vmatprep.subr.bf16.mxu1 %v5765_v10 }
 0x186   : > { %5072 = vmatpush3.bf16.msra.mxu0 %v5552_v18  ;;  %v5583_v18 = vld [vmem:[%s7152_s7 + $0x8] sm:$0xff]  }
 0x187   : > { %5073 = vmatprep.subr.bf16.mxu0 %v5765_v10 }
 0x188   : > { %5062 = vmatpush3.bf16.msra.mxu1 %v5553_v30  ;;  %v5584_v30 = vld [vmem:[%s7152_s7 + $0x48] sm:$0xff]  }
 0x189   : > { %5079 = vmatprep.subr.bf16.mxu1 %v5765_v10 }
 0x18a   : > { %5074 = vmatpush3.bf16.msra.mxu0 %v5554_v14 }
 0x18b   : > { %5064 = vmatmul.mubr.msk.bf16.vlgmr.msra.gmra.mxu1 %vm445_vm0, %v1630_v19  ;;  %5091 = vmatprep.subr.bf16.mxu0 %v5765_v10  ;;  %v5561_v19 = vld [vmem:[%s7149_s4 + $0x180] sm:$0xff]  }
 0x18c   : > { %5080 = vmatpush3.bf16.msra.mxu1 %v5555_v21  ;;  %5087 = vmatprep.mubr.msk.bf16.mxu1 %vm5766_vm2, %v5765_v10  ;;  %v5585_v21 = vld [vmem:[%s7152_s7] sm:$0xff]  }
 0x18d   : > { %5076 = vmatmul.mubr.msk.bf16.vlgmr.msra.gmra.mxu0 %vm445_vm0, %v1719_v27  ;;  %5081 = vmatprep.subr.bf16.mxu1 %v5765_v10  ;;  %v5563_v27 = vld [vmem:[%s7149_s4 + $0x1d8] sm:$0xff]  }
 0x18e   : > { %5092 = vmatpush3.bf16.msra.mxu0 %v5556_v58  ;;  %5099 = vmatprep.mubr.msk.bf16.mxu0 %vm5766_vm2, %v5765_v10 }
 0x18f   : > { %5093 = vmatprep.subr.bf16.mxu0 %v5765_v10 }
 0x190   : > { %5082 = vmatpush3.bf16.msra.mxu1 %v5557_v62 }
 0x191   : > { %5083 = vmatprep.subr.bf16.mxu1 %v5765_v10 }
 0x192   : > { %5094 = vmatpush3.bf16.msra.mxu0 %v5558_v54  ;;  %v5586_v54 = vld [vmem:[%s7152_s7 + $0x40] sm:$0xff]  }
 0x193   : > { %5095 = vmatprep.subr.bf16.mxu0 %v5765_v10 }
 0x194   : > { %5084 = vmatpush3.bf16.msra.mxu1 %v5559_v32 }
 0x195   : > { %5085 = vmatprep.subr.bf16.mxu1 %v5765_v10 }
 0x196   : > { %5096 = vmatpush3.bf16.msra.mxu0 %v5560_v61 }
 0x197   : > { %5097 = vmatprep.subr.bf16.mxu0 %v5765_v10 }
 0x198   : > { %5086 = vmatpush3.bf16.msra.mxu1 %v5561_v19 }
 0x199   : > { %5103 = vmatprep.subr.bf16.mxu1 %v5765_v10 }
 0x19a   : > { %5098 = vmatpush3.bf16.msra.mxu0 %v5562_v8 }
 0x19b   : > { %5088 = vmatmul.mubr.msk.bf16.vlgmr.msra.gmra.mxu1 %vm445_vm0, %v1809_v36  ;;  %5115 = vmatprep.subr.bf16.mxu0 %v5765_v10  ;;  %v5568_v36 = vld [vmem:[%s7149_s4 + $0x1e8] sm:$0xff]  }
 0x19c   : > { %5104 = vmatpush3.bf16.msra.mxu1 %v5563_v27  ;;  %5111 = vmatprep.mubr.msk.bf16.mxu1 %vm5766_vm2, %v5765_v10 }
 0x19d   : > { %5100 = vmatmul.mubr.msk.bf16.vlgmr.msra.gmra.mxu0 %vm445_vm0, %v1899_v43  ;;  %5105 = vmatprep.subr.bf16.mxu1 %v5765_v10 }
 0x19e   : > { %5116 = vmatpush3.bf16.msra.mxu0 %v5564_v4  ;;  %5123 = vmatprep.mubr.msk.bf16.mxu0 %vm5766_vm2, %v5765_v10 }
 0x19f   : > { %5117 = vmatprep.subr.bf16.mxu0 %v5765_v10 }
 0x1a0   : > { %5106 = vmatpush3.bf16.msra.mxu1 %v5565_v5 }
 0x1a1   : > { %5107 = vmatprep.subr.bf16.mxu1 %v5765_v10 }
 0x1a2   : > { %5118 = vmatpush3.bf16.msra.mxu0 %v5566_v7 }
 0x1a3   : > { %5119 = vmatprep.subr.bf16.mxu0 %v5765_v10 }
 0x1a4   : > { %5108 = vmatpush3.bf16.msra.mxu1 %v5567_v25 }
 0x1a5   : > { %5109 = vmatprep.subr.bf16.mxu1 %v5765_v10 }
 0x1a6   : > { %5120 = vmatpush3.bf16.msra.mxu0 %v5568_v36 }
 0x1a7   : > { %5121 = vmatprep.subr.bf16.mxu0 %v5765_v10 }
 0x1a8   : > { %5110 = vmatpush3.bf16.msra.mxu1 %v5569_v37 }
 0x1a9   : > { %5127 = vmatprep.subr.bf16.mxu1 %v5765_v10 }
 0x1aa   : > { %5122 = vmatpush3.bf16.msra.mxu0 %v5570_v38 }
 0x1ab   : > { %5112 = vmatmul.mubr.msk.bf16.vlgmr.msra.gmra.mxu1 %vm445_vm0, %v1988_v47  ;;  %5147 = vmatprep.subr.bf16.mxu0 %v5765_v10 }
 0x1ac   : > { %5143 = vmatprep.mubr.msk.bf16.mxu1 %vm5766_vm2, %v5765_v10  ;;  %5128 = vmatpush3.bf16.msra.mxu1 %v5571_v35 }
 0x1ad   : > { %5124 = vmatmul.mubr.msk.bf16.vlgmr.msra.gmra.mxu0 %vm445_vm0, %v2077_v48  ;;  %5129 = vmatprep.subr.bf16.mxu1 %v5765_v10  ;;  %vm3943_vm0 = vcmask 261120  }
 0x1ae   : > { %5163 = vmatprep.mubr.msk.bf16.mxu0 %vm5766_vm2, %v5765_v10  ;;  %5148 = vmatpush3.bf16.msra.mxu0 %v5572_v17 }
 0x1af   : > { %5149 = vmatprep.subr.bf16.mxu0 %v5765_v10 }
 0x1b0   : > { %5130 = vmatpush3.bf16.msra.mxu1 %v5573_v28 }
 0x1b1   : > { %5131 = vmatprep.subr.bf16.mxu1 %v5765_v10 }
 0x1b2   : > { %5150 = vmatpush3.bf16.msra.mxu0 %v5574_v46 }
 0x1b3   : > { %5151 = vmatprep.subr.bf16.mxu0 %v5765_v10 }
 0x1b4   : > { %5132 = vmatpush3.bf16.msra.mxu1 %v5575_v49 }
 0x1b5   : > { %5133 = vmatprep.subr.bf16.mxu1 %v5765_v10 }
 0x1b6   : > { %5152 = vmatpush3.bf16.msra.mxu0 %v5576_v51 }
 0x1b7   : > { %5153 = vmatprep.subr.bf16.mxu0 %v5765_v10 }
 0x1b8   : > { %5134 = vmatpush3.bf16.msra.mxu1 %v5577_v63 }
 0x1b9   : > { %5135 = vmatprep.subr.bf16.mxu1 %v5765_v10 }
 0x1ba   : > { %5154 = vmatpush3.bf16.msra.mxu0 %v5578_v57 }
 0x1bb   : > { %5155 = vmatprep.subr.bf16.mxu0 %v5765_v10 }
 0x1bc   : > { %5136 = vmatpush3.bf16.msra.mxu1 %v5579_v1 }
 0x1bd   : > { %5137 = vmatprep.subr.bf16.mxu1 %v5765_v10 }
 0x1be   : > { %5156 = vmatpush3.bf16.msra.mxu0 %v5580_v2 }
 0x1bf   : > { %5157 = vmatprep.subr.bf16.mxu0 %v5765_v10 }
 0x1c0   : > { %5138 = vmatpush3.bf16.msra.mxu1 %v5581_v50 }
 0x1c1   : > { %5139 = vmatprep.subr.bf16.mxu1 %v5765_v10 }
 0x1c2   : > { %5158 = vmatpush3.bf16.msra.mxu0 %v5582_v23 }
 0x1c3   : > { %5159 = vmatprep.subr.bf16.mxu0 %v5765_v10 }
 0x1c4   : > { %5140 = vmatpush3.bf16.msra.mxu1 %v5583_v18 }
 0x1c5   : > { %5141 = vmatprep.subr.bf16.mxu1 %v5765_v10 }
 0x1c6   : > { %5160 = vmatpush3.bf16.msra.mxu0 %v5584_v30 }
 0x1c7   : > { %5161 = vmatprep.subr.bf16.mxu0 %v5765_v10 }
 0x1c8   : > { %5142 = vmatpush3.bf16.msra.mxu1 %v5585_v21 }
 0x1c9   : > { %5167 = vmatprep.subr.bf16.mxu1 %v5765_v10 }
 0x1ca   : > { %5162 = vmatpush3.bf16.msra.mxu0 %v5586_v54 }
 0x1cb   : > { %5187 = vmatprep.subr.bf16.mxu0 %v5765_v10 }
 0x1fb   : > { %v816_v43 = vpop.f32.mrf.mxu1 }
 0x1fd   : > { %v884_v6 = vpop.f32.mrf.mxu0  ;;  %v4945_v9 = vpop.f32.mrf.mxu1 }
 0x1fe   : > { %v885_v11 = vadd.f32 %v884_v6, %v816_v43 }
 0x1ff   : > { %v4957_v40 = vpop.f32.mrf.mxu0  ;;  %v819_v45 = vpop.f32.mrf.mxu1 }
 0x201   : > { %v887_v47 = vpop.f32.mrf.mxu0  ;;  %v4946_v12 = vpop.f32.mrf.mxu1 }
 0x202   : > { %v888_v39 = vadd.f32 %v887_v47, %v819_v45 }
 0x203   : > { %v4958_v13 = vpop.f32.mrf.mxu0 }
 0x20b   : > { %v974_v42 = vpop.f32.mrf.mxu1 }
 0x20c   : > { %v981_v15 = vadd.f32 %v974_v42, %v885_v11 }
 0x20d   : > { %v1066_v16 = vpop.f32.mrf.mxu0  ;;  %v4969_v20 = vpop.f32.mrf.mxu1 }
 0x20e   : > { %v1073_v31 = vadd.f32 %v1066_v16, %v981_v15 }
 0x20f   : > { %v4981_v44 = vpop.f32.mrf.mxu0  ;;  %v977_v48 = vpop.f32.mrf.mxu1 }
 0x210   : > { %v982_v22 = vadd.f32 %v977_v48, %v888_v39 }
 0x211   : > { %v1069_v24 = vpop.f32.mrf.mxu0  ;;  %v4970_v26 = vpop.f32.mrf.mxu1 }
 0x212   : > { %v6510_v33 = vadd.f32 %v1069_v24, %v982_v22 }
 0x213   : > { %v4982_v41 = vpop.f32.mrf.mxu0 }
 0x21b   : > { %v1158_v34 = vpop.f32.mrf.mxu1 }
 0x21c   : > { %v1165_v29 = vadd.f32 %v1158_v34, %v1073_v31 }
 0x21d   : > { %v1250_v52 = vpop.f32.mrf.mxu0  ;;  %v4993_v60 = vpop.f32.mrf.mxu1 }
 0x21e   : > { %v6535_v53 = vadd.f32 %v1250_v52, %v1165_v29 }
 0x21f   : > { %v5005_v55 = vpop.f32.mrf.mxu0  ;;  %v1161_v56 = vpop.f32.mrf.mxu1 }
 0x220   : > { %v1166_v39 = vadd.f32 %v1161_v56, %v6510_v33 }
 0x221   : > { %v1253_v59 = vpop.f32.mrf.mxu0  ;;  %v4994_v0 = vpop.f32.mrf.mxu1 }
 0x222   : > { %v1258_v15 = vadd.f32 %v1253_v59, %v1166_v39  ;;  %v4307_v39 = vld [vmem:[%s7150_s5] ss:$0 sm:$0xff] }
 0x223   : > { %v5006_v3 = vpop.f32.mrf.mxu0 }
 0x22b   : > { %v1342_v14 = vpop.f32.mrf.mxu1 }
 0x22c   : > { %v1349_v42 = vadd.f32 %v1342_v14, %v6535_v53 }
 0x22d   : > { %v1434_v58 = vpop.f32.mrf.mxu0  ;;  %v5017_v62 = vpop.f32.mrf.mxu1 }
 0x22e   : > { %v1441_v16 = vadd.f32 %v1434_v58, %v1349_v42 }
 0x22f   : > { %v5029_v32 = vpop.f32.mrf.mxu0  ;;  %v1345_v61 = vpop.f32.mrf.mxu1 }
 0x230   : > { %v1350_v20 = vadd.f32 %v1345_v61, %v1258_v15  ;;  %v4308_v15 = vld [vmem:[%s7151_s6] ss:$0 sm:$0xff] }
 0x231   : > { %v1437_v19 = vpop.f32.mrf.mxu0  ;;  %v5018_v8 = vpop.f32.mrf.mxu1 }
 0x232   : > { %v1442_v48 = vadd.f32 %v1437_v19, %v1350_v20 }
 0x233   : > { %v5030_v27 = vpop.f32.mrf.mxu0 }
 0x23b   : > { %v1523_v4 = vpop.f32.mrf.mxu1 }
 0x23c   : > { %v1530_v31 = vadd.f32 %v1523_v4, %v1441_v16 }
 0x23d   : > { %v1612_v5 = vpop.f32.mrf.mxu0  ;;  %v5041_v7 = vpop.f32.mrf.mxu1 }
 0x23e   : > { %v1619_v26 = vadd.f32 %v1612_v5, %v1530_v31 }
 0x23f   : > { %v5053_v25 = vpop.f32.mrf.mxu0  ;;  %v1526_v36 = vpop.f32.mrf.mxu1 }
 0x240   : > { %v1531_v35 = vadd.f32 %v1526_v36, %v1442_v48 }
 0x241   : > { %v1615_v37 = vpop.f32.mrf.mxu0  ;;  %v5042_v38 = vpop.f32.mrf.mxu1 }
 0x242   : > { %v1620_v34 = vadd.f32 %v1615_v37, %v1531_v35  ;;  %v5587_v35 = vld [vmem:[%s7152_s7 + $0xb8] sm:$0xff]  }
 0x243   : > { %v5054_v43 = vpop.f32.mrf.mxu0 }
 0x24b   : > { %v1701_v6 = vpop.f32.mrf.mxu1 }
 0x24c   : > { %v1708_v28 = vadd.f32 %v1701_v6, %v1619_v26 }
 0x24d   : > { %v1790_v9 = vpop.f32.mrf.mxu0  ;;  %v5065_v11 = vpop.f32.mrf.mxu1 }
 0x24e   : > { %v1797_v29 = vadd.f32 %v1790_v9, %v1708_v28 }
 0x24f   : > { %v5077_v40 = vpop.f32.mrf.mxu0  ;;  %v1704_v45 = vpop.f32.mrf.mxu1 }
 0x250   : > { %v1709_v51 = vadd.f32 %v1704_v45, %v1620_v34  ;;  %v5591_v34 = vld [vmem:[%s7152_s7 + $0xa8] sm:$0xff]  }
 0x251   : > { %v1793_v47 = vpop.f32.mrf.mxu0  ;;  %v5066_v12 = vpop.f32.mrf.mxu1 }
 0x252   : > { %v1798_v60 = vadd.f32 %v1793_v47, %v1709_v51  ;;  %v5594_v51 = vld [vmem:[%s7152_s7 + $0xe0] sm:$0xff]  }
 0x253   : > { %v5078_v13 = vpop.f32.mrf.mxu0 }
 0x25b   : > { %v1880_v44 = vpop.f32.mrf.mxu1 }
 0x25c   : > { %v1887_v52 = vadd.f32 %v1880_v44, %v1797_v29  ;;  %v5593_v29 = vld [vmem:[%s7152_s7 + $0xa0] sm:$0xff]  }
 0x25d   : > { %v1970_v22 = vpop.f32.mrf.mxu0  ;;  %v5089_v24 = vpop.f32.mrf.mxu1 }
 0x25e   : > { %v1977_v53 = vadd.f32 %v1970_v22, %v1887_v52  ;;  %v5595_v52 = vld [vmem:[%s7152_s7 + $0x98] sm:$0xff]  }
 0x25f   : > { %v5101_v41 = vpop.f32.mrf.mxu0  ;;  %v1883_v17 = vpop.f32.mrf.mxu1 }
 0x260   : > { %v1888_v63 = vadd.f32 %v1883_v17, %v1798_v60  ;;  %v5588_v17 = vld [vmem:[%s7152_s7 + $0xf8] sm:$0xff]  }
 0x261   : > { %v1973_v46 = vpop.f32.mrf.mxu0  ;;  %v5090_v49 = vpop.f32.mrf.mxu1  ;;  %v5596_v60 = vld [vmem:[%s7152_s7 + $0xd8] sm:$0xff]  }
 0x262   : > { %v1978_v0 = vadd.f32 %v1973_v46, %v1888_v63  ;;  %v5589_v46 = vld [vmem:[%s7152_s7 + $0xb0] sm:$0xff]  }
 0x263   : > { %v5102_v33 = vpop.f32.mrf.mxu0  ;;  %v5590_v49 = vld [vmem:[%s7152_s7 + $0xf0] sm:$0xff]  }
 0x264   : > { %v5592_v33 = vld [vmem:[%s7152_s7 + $0xe8] sm:$0xff]   ;;  %v5598_v63 = vld [vmem:[%s7152_s7 + $0xd0] sm:$0xff]  }
 0x26b   : > { %v2059_v55 = vpop.f32.mrf.mxu1 }
 0x26c   : > { %v2066_v56 = vadd.f32 %v2059_v55, %v1977_v53  ;;  %v5597_v53 = vld [vmem:[%s7152_s7 + $0x90] sm:$0xff]   ;;  %v5599_v55 = vld [vmem:[%s7152_s7 + $0x88] sm:$0xff]  }
 0x26d   : > { %v2148_v57 = vpop.f32.mrf.mxu0  ;;  %v5113_v59 = vpop.f32.mrf.mxu1 }
 0x26e   : > { %v2155_v3 = vadd.f32 %v2148_v57, %v2066_v56  ;;  %v5600_v56 = vld [vmem:[%s7152_s7 + $0xc8] sm:$0xff]   ;;  %v5601_v57 = vld [vmem:[%s7152_s7 + $0x80] sm:$0xff]  }
 0x26f   : > { %v5125_v1 = vpop.f32.mrf.mxu0  ;;  %v2062_v2 = vpop.f32.mrf.mxu1  ;;  %v5602_v59 = vld [vmem:[%s7152_s7 + $0xc0] sm:$0xff]  }
 0x270   : > { %v2067_v50 = vadd.f32 %v2062_v2, %v1978_v0  ;;  %v2166_v21 = vmul.f32 %v2155_v3, %v2155_v3  ;;  %v5603_v0 = vld [vmem:[%s7152_s7 + $0x138] sm:$0xff]  }
 0x271   : > { %v2151_v23 = vpop.f32.mrf.mxu0  ;;  %v5114_v18 = vpop.f32.mrf.mxu1  ;;  %v5604_v2 = vld [vmem:[%s7152_s7 + $0x178] sm:$0xff]  }
 0x272   : > { %v2156_v30 = vadd.f32 %v2151_v23, %v2067_v50  ;;  %v5605_v50 = vld [vmem:[%s7152_s7 + $0x130] sm:$0xff]   ;;  %v5607_v18 = vld [vmem:[%s7152_s7 + $0x128] sm:$0xff]  }
 0x273   : > { %v5126_v14 = vpop.f32.mrf.mxu0  ;;  %v5606_v23 = vld [vmem:[%s7152_s7 + $0x170] sm:$0xff]  }
 0x274   : > { %v2157_v58 = vadd.f32 %v2156_v30, %v2155_v3  ;;  %v2167_v62 = vmul.f32 %v2156_v30, %v2156_v30  ;;  %v5609_v14 = vld [vmem:[%s7152_s7 + $0x120] sm:$0xff]  }
 0x276   : > { %v2158_v54 = vrot.slane %v2157_v58, 4  ;;  %v2168_v32 = vadd.f32 %v2167_v62, %v2166_v21  ;;  %v5610_v21 = vld [vmem:[%s7152_s7 + $0x160] sm:$0xff]   ;;  %v5612_v62 = vld [vmem:[%s7152_s7 + $0x158] sm:$0xff]  }
 0x278   : > { %v2159_v61 = vadd.f32 %v2158_v54, %v2157_v58  ;;  %v2169_v19 = vrot.slane %v2168_v32, 4  ;;  %v5611_v58 = vld [vmem:[%s7152_s7 + $0x118] sm:$0xff]   ;;  %v5613_v54 = vld [vmem:[%s7152_s7 + $0x110] sm:$0xff]  }
 0x27a   : > { %v2160_v8 = vrot.slane %v2159_v61, 2  ;;  %v2170_v27 = vadd.f32 %v2169_v19, %v2168_v32  ;;  %v5614_v32 = vld [vmem:[%s7152_s7 + $0x150] sm:$0xff]   ;;  %v5616_v19 = vld [vmem:[%s7152_s7 + $0x148] sm:$0xff]  }
 0x27c   : > { %v2161_v4 = vadd.f32 %v2160_v8, %v2159_v61  ;;  %v2171_v5 = vrot.slane %v2170_v27, 2  ;;  %v5615_v61 = vld [vmem:[%s7152_s7 + $0x108] sm:$0xff]   ;;  %v5617_v8 = vld [vmem:[%s7152_s7 + $0x100] sm:$0xff]  }
 0x27e   : > { %v2162_v7 = vrot.slane %v2161_v4, 1  ;;  %v2172_v25 = vadd.f32 %v2171_v5, %v2170_v27  ;;  %v5618_v27 = vld [vmem:[%s7152_s7 + $0x140] sm:$0xff]  }
 0x280   : > { %v2163_v36 = vadd.f32 %v2162_v7, %v2161_v4  ;;  %v2173_v37 = vrot.slane %v2172_v25, 1  ;;  %v5619_v4 = vld [vmem:[%s7152_s7 + $0x1b8] sm:$0xff]  }
 0x281   : > { %v5620_v7 = vld [vmem:[%s7152_s7 + $0x1f8] sm:$0xff]  }
 0x282   : > { %v2165_v38 = vmul.f32 0.0625, %v2163_v36  ;;  %v2174_v43 = vadd.f32 %v2173_v37, %v2172_v25  ;;  %v5621_v36 = vld [vmem:[%s7152_s7 + $0x1b0] sm:$0xff]  }
 0x283   : > { %v5622_v37 = vld [vmem:[%s7152_s7 + $0x1f0] sm:$0xff]  }
 0x284   : > { %v2175_v6 = vmul.f32 0.0625, %v2174_v43  ;;  %v2176_v9 = vmul.f32 %v2165_v38, %v2165_v38  ;;  %v2178_v11 = vsub.f32 %v2155_v3, %v2165_v38  ;;  %v2179_v40 = vsub.f32 %v2156_v30, %v2165_v38  ;;  %v5608_v30 = vld [vmem:[%s7152_s7 + $0x168] sm:$0xff]  }
 0x285   : > { %v5623_v38 = vld [vmem:[%s7152_s7 + $0x1a8] sm:$0xff]  }
 0x286   : > { %v2177_v45 = vsub.f32 %v2175_v6, %v2176_v9  ;;  %v5624_v43 = vld [vmem:[%s7152_s7 + $0x1e8] sm:$0xff]   ;;  %v5625_v6 = vld [vmem:[%s7152_s7 + $0x1a0] sm:$0xff]  }
 0x287   : > { %v5626_v9 = vld [vmem:[%s7152_s7 + $0x1e0] sm:$0xff]  }
 0x288   : > { %v2180_v47 = vadd.f32 1e-05, %v2177_v45  ;;  %v5629_v45 = vld [vmem:[%s7152_s7 + $0x190] sm:$0xff]  }
 0x28a   : > { %5701 = vrsqrt.f32 %v2180_v47  ;;  %v5630_v47 = vld [vmem:[%s7152_s7 + $0x1d0] sm:$0xff]  }
 0x297   : > { %v5702_v12 = vpop.eup %5701 }
 0x298   : > { %v2182_v13 = vmul.f32 %v5702_v12, %v2178_v11  ;;  %v2183_v42 = vmul.f32 %v5702_v12, %v2179_v40  ;;  %v5627_v11 = vld [vmem:[%s7152_s7 + $0x198] sm:$0xff]   ;;  %v5631_v12 = vld [vmem:[%s7152_s7 + $0x188] sm:$0xff]  }
 0x299   : > { %v5628_v40 = vld [vmem:[%s7152_s7 + $0x1d8] sm:$0xff]  }
 0x29a   : > { %v2191_v16 = vmul.f32 %v4307_v39, %v2182_v13  ;;  %v2192_v20 = vmul.f32 %v4307_v39, %v2183_v42  ;;  %v5632_v39 = vld [vmem:[%s7152_s7 + $0x1c8] sm:$0xff]   ;;  %v5633_v13 = vld [vmem:[%s7152_s7 + $0x180] sm:$0xff]  }
 0x29b   : > { %v5634_v42 = vld [vmem:[%s7152_s7 + $0x1c0] sm:$0xff]  }
 0x29c   : > { %v2200_v31 = vadd.f32 %v4308_v15, %v2191_v16  ;;  %v2201_v44 = vadd.f32 %v4308_v15, %v2192_v20  ;;  %v5635_v15 = vld [vmem:[%s7152_s7 + $0x238] sm:$0xff]  }
 0x29d   : > { %v5636_v20 = vld [vmem:[%s7152_s7 + $0x278] sm:$0xff]  }
 0x29e   : > { %vm2202_vm14 = vcmp.ge.f32.partialorder %v2200_v31, 0.0  ;;  %vm2203_vm15 = vcmp.ge.f32.partialorder %v2201_v44, 0.0  ;;  %v2204_v48 = vmul.f32 0.2, %v2200_v31  ;;  %v2205_v22 = vmul.f32 0.2, %v2201_v44 }
 0x2a0   : > { %v2206_v24 = vsel %vm2202_vm14, %v2200_v31, %v2204_v48  ;;  %v2207_v26 = vsel %vm2203_vm15, %v2201_v44, %v2205_v22  ;;  %v5637_v44 = vld [vmem:[%s7152_s7 + $0x230] sm:$0xff]   ;;  %v5639_v22 = vld [vmem:[%s7152_s7 + $0x228] sm:$0xff]  }
 0x2a1   : > { %v6589_v41 = vpack.c.bf16 %v2207_v26, %v2206_v24  ;;  %v5638_v48 = vld [vmem:[%s7152_s7 + $0x270] sm:$0xff]   ;;  %v5640_v24 = vld [vmem:[%s7152_s7 + $0x268] sm:$0xff]   ;;  %v5641_v26 = vld [vmem:[%s7152_s7 + $0x220] sm:$0xff]  }
 0x2a3   : > { %5144 = vmatmul.mubr.bf16.vlgmr.msra.gmra.mxu1 %v6589_v41  ;;  %v6596_v28 = vshrl.u32 %v6589_v41, 16  ;;  %v2443_v1 = vrot.slane %v6589_v41, 1  ;;  %v2659_v5 = vrot.slane %v6589_v41, 2  ;;  %v2875_v16 = vrot.slane %v6589_v41, 3 }
 0x2a4   : > { %5168 = vmatpush3.bf16.msra.mxu1 %v5587_v35  ;;  %5183 = vmatprep.mubr.msk.bf16.mxu1 %vm5766_vm2, %v5765_v10  ;;  %v5642_v35 = vld [vmem:[%s7152_s7 + $0x260] sm:$0xff]  }
 0x2a5   : > { %5164 = vmatmul.mubr.bf16.vlgmr.msra.gmra.mxu0 %v6596_v28  ;;  %5169 = vmatprep.subr.bf16.mxu1 %v5765_v10  ;;  %v2551_v3 = vrot.slane %v6596_v28, 1  ;;  %v2767_v25 = vrot.slane %v6596_v28, 2  ;;  %v2983_v31 = vrot.slane %v6596_v28, 3 }
 0x2a6   : > { %5188 = vmatpush3.bf16.msra.mxu0 %v5588_v17  ;;  %5203 = vmatprep.mubr.msk.bf16.mxu0 %vm5766_vm2, %v5765_v10  ;;  %v5643_v17 = vld [vmem:[%s7152_s7 + $0x218] sm:$0xff]  }
 0x2a7   : > { %5189 = vmatprep.subr.bf16.mxu0 %v5765_v10 }
 0x2a8   : > { %5170 = vmatpush3.bf16.msra.mxu1 %v5589_v46  ;;  %v5644_v46 = vld [vmem:[%s7152_s7 + $0x258] sm:$0xff]  }
 0x2a9   : > { %5171 = vmatprep.subr.bf16.mxu1 %v5765_v10 }
 0x2aa   : > { %5190 = vmatpush3.bf16.msra.mxu0 %v5590_v49  ;;  %v5645_v49 = vld [vmem:[%s7152_s7 + $0x210] sm:$0xff]  }
 0x2ab   : > { %5191 = vmatprep.subr.bf16.mxu0 %v5765_v10 }
 0x2ac   : > { %5172 = vmatpush3.bf16.msra.mxu1 %v5591_v34  ;;  %v5646_v34 = vld [vmem:[%s7152_s7 + $0x250] sm:$0xff]  }
 0x2ad   : > { %5173 = vmatprep.subr.bf16.mxu1 %v5765_v10 }
 0x2ae   : > { %5192 = vmatpush3.bf16.msra.mxu0 %v5592_v33  ;;  %v5647_v33 = vld [vmem:[%s7152_s7 + $0x208] sm:$0xff]  }
 0x2af   : > { %5193 = vmatprep.subr.bf16.mxu0 %v5765_v10 }
 0x2b0   : > { %5174 = vmatpush3.bf16.msra.mxu1 %v5593_v29  ;;  %v5648_v29 = vld [vmem:[%s7152_s7 + $0x248] sm:$0xff]  }
 0x2b1   : > { %5175 = vmatprep.subr.bf16.mxu1 %v5765_v10 }
 0x2b2   : > { %5194 = vmatpush3.bf16.msra.mxu0 %v5594_v51  ;;  %v5649_v51 = vld [vmem:[%s7152_s7 + $0x200] sm:$0xff]  }
 0x2b3   : > { %5195 = vmatprep.subr.bf16.mxu0 %v5765_v10 }
 0x2b4   : > { %5176 = vmatpush3.bf16.msra.mxu1 %v5595_v52  ;;  %v5650_v52 = vld [vmem:[%s7152_s7 + $0x240] sm:$0xff]  }
 0x2b5   : > { %5177 = vmatprep.subr.bf16.mxu1 %v5765_v10 }
 0x2b6   : > { %5196 = vmatpush3.bf16.msra.mxu0 %v5596_v60  ;;  %v5651_v60 = vld [vmem:[%s7152_s7 + $0x2b8] sm:$0xff]  }
 0x2b7   : > { %5197 = vmatprep.subr.bf16.mxu0 %v5765_v10 }
 0x2b8   : > { %5178 = vmatpush3.bf16.msra.mxu1 %v5597_v53  ;;  %v3091_v53 = vrot.slane %v6589_v41, 4 }
 0x2b9   : > { %5179 = vmatprep.subr.bf16.mxu1 %v5765_v10 }
 0x2ba   : > { %5198 = vmatpush3.bf16.msra.mxu0 %v5598_v63  ;;  %v5652_v63 = vld [vmem:[%s7152_s7 + $0x2f8] sm:$0xff]  }
 0x2bb   : > { %5199 = vmatprep.subr.bf16.mxu0 %v5765_v10 }
 0x2bc   : > { %5180 = vmatpush3.bf16.msra.mxu1 %v5599_v55  ;;  %v3199_v55 = vrot.slane %v6596_v28, 4 }
 0x2bd   : > { %5181 = vmatprep.subr.bf16.mxu1 %v5765_v10 }
 0x2be   : > { %5200 = vmatpush3.bf16.msra.mxu0 %v5600_v56  ;;  %v5653_v56 = vld [vmem:[%s7152_s7 + $0x2b0] sm:$0xff]  }
 0x2bf   : > { %5201 = vmatprep.subr.bf16.mxu0 %v5765_v10 }
 0x2c0   : > { %5182 = vmatpush3.bf16.msra.mxu1 %v5601_v57  ;;  %v5654_v57 = vld [vmem:[%s7152_s7 + $0x2f0] sm:$0xff]  }
 0x2c1   : > { %5207 = vmatprep.subr.bf16.mxu1 %v5765_v10 }
 0x2c2   : > { %5202 = vmatpush3.bf16.msra.mxu0 %v5602_v59  ;;  %v5655_v59 = vld [vmem:[%s7152_s7 + $0x2a8] sm:$0xff]  }
 0x2c3   : > { %5184 = vmatmul.mubr.bf16.vlgmr.msra.gmra.mxu1 %v2443_v1  ;;  %5227 = vmatprep.subr.bf16.mxu0 %v5765_v10  ;;  %v5657_v1 = vld [vmem:[%s7152_s7 + $0x2a0] sm:$0xff]  }
 0x2c4   : > { %5208 = vmatpush3.bf16.msra.mxu1 %v5603_v0  ;;  %5223 = vmatprep.mubr.msk.bf16.mxu1 %vm5766_vm2, %v5765_v10  ;;  %v5656_v0 = vld [vmem:[%s7152_s7 + $0x2e8] sm:$0xff]  }
 0x2c5   : > { %5204 = vmatmul.mubr.bf16.vlgmr.msra.gmra.mxu0 %v2551_v3  ;;  %5209 = vmatprep.subr.bf16.mxu1 %v5765_v10  ;;  %v5659_v3 = vld [vmem:[%s7152_s7 + $0x298] sm:$0xff]  }
 0x2c6   : > { %5228 = vmatpush3.bf16.msra.mxu0 %v5604_v2  ;;  %5243 = vmatprep.mubr.msk.bf16.mxu0 %vm5766_vm2, %v5765_v10  ;;  %v5658_v2 = vld [vmem:[%s7152_s7 + $0x2e0] sm:$0xff]  }
 0x2c7   : > { %5229 = vmatprep.subr.bf16.mxu0 %v5765_v10 }
 0x2c8   : > { %5210 = vmatpush3.bf16.msra.mxu1 %v5605_v50  ;;  %v5660_v50 = vld [vmem:[%s7152_s7 + $0x2d8] sm:$0xff]  }
 0x2c9   : > { %5211 = vmatprep.subr.bf16.mxu1 %v5765_v10 }
 0x2ca   : > { %5230 = vmatpush3.bf16.msra.mxu0 %v5606_v23  ;;  %v5661_v23 = vld [vmem:[%s7152_s7 + $0x290] sm:$0xff]  }
 0x2cb   : > { %5231 = vmatprep.subr.bf16.mxu0 %v5765_v10 }
 0x2cc   : > { %5212 = vmatpush3.bf16.msra.mxu1 %v5607_v18  ;;  %v5662_v18 = vld [vmem:[%s7152_s7 + $0x2d0] sm:$0xff]  }
 0x2cd   : > { %5213 = vmatprep.subr.bf16.mxu1 %v5765_v10 }
 0x2ce   : > { %5232 = vmatpush3.bf16.msra.mxu0 %v5608_v30  ;;  %v5663_v30 = vld [vmem:[%s7152_s7 + $0x288] sm:$0xff]  }
 0x2cf   : > { %5233 = vmatprep.subr.bf16.mxu0 %v5765_v10 }
 0x2d0   : > { %5214 = vmatpush3.bf16.msra.mxu1 %v5609_v14  ;;  %v5664_v14 = vld [vmem:[%s7152_s7 + $0x2c8] sm:$0xff]  }
 0x2d1   : > { %5215 = vmatprep.subr.bf16.mxu1 %v5765_v10 }
 0x2d2   : > { %5234 = vmatpush3.bf16.msra.mxu0 %v5610_v21  ;;  %v5665_v21 = vld [vmem:[%s7152_s7 + $0x280] sm:$0xff]  }
 0x2d3   : > { %5235 = vmatprep.subr.bf16.mxu0 %v5765_v10 }
 0x2d4   : > { %5216 = vmatpush3.bf16.msra.mxu1 %v5611_v58  ;;  %v5666_v58 = vld [vmem:[%s7152_s7 + $0x2c0] sm:$0xff]  }
 0x2d5   : > { %5217 = vmatprep.subr.bf16.mxu1 %v5765_v10 }
 0x2d6   : > { %5236 = vmatpush3.bf16.msra.mxu0 %v5612_v62  ;;  %v5667_v62 = vld [vmem:[%s7152_s7 + $0x338] sm:$0xff]  }
 0x2d7   : > { %5237 = vmatprep.subr.bf16.mxu0 %v5765_v10 }
 0x2d8   : > { %5218 = vmatpush3.bf16.msra.mxu1 %v5613_v54  ;;  %v3307_v54 = vrot.slane %v6589_v41, 5 }
 0x2d9   : > { %5219 = vmatprep.subr.bf16.mxu1 %v5765_v10 }
 0x2da   : > { %5238 = vmatpush3.bf16.msra.mxu0 %v5614_v32  ;;  %v5668_v32 = vld [vmem:[%s7152_s7 + $0x378] sm:$0xff]  }
 0x2db   : > { %5239 = vmatprep.subr.bf16.mxu0 %v5765_v10 }
 0x2dc   : > { %5220 = vmatpush3.bf16.msra.mxu1 %v5615_v61  ;;  %v3415_v61 = vrot.slane %v6596_v28, 5 }
 0x2dd   : > { %5221 = vmatprep.subr.bf16.mxu1 %v5765_v10 }
 0x2de   : > { %5240 = vmatpush3.bf16.msra.mxu0 %v5616_v19  ;;  %v5669_v19 = vld [vmem:[%s7152_s7 + $0x330] sm:$0xff]  }
 0x2df   : > { %5241 = vmatprep.subr.bf16.mxu0 %v5765_v10 }
 0x2e0   : > { %5222 = vmatpush3.bf16.msra.mxu1 %v5617_v8  ;;  %v5670_v8 = vld [vmem:[%s7152_s7 + $0x370] sm:$0xff]  }
 0x2e1   : > { %5247 = vmatprep.subr.bf16.mxu1 %v5765_v10 }
 0x2e2   : > { %5242 = vmatpush3.bf16.msra.mxu0 %v5618_v27  ;;  %v5671_v27 = vld [vmem:[%s7152_s7 + $0x328] sm:$0xff]  }
 0x2e3   : > { %5224 = vmatmul.mubr.bf16.vlgmr.msra.gmra.mxu1 %v2659_v5  ;;  %5267 = vmatprep.subr.bf16.mxu0 %v5765_v10  ;;  %v5673_v5 = vld [vmem:[%s7152_s7 + $0x320] sm:$0xff]  }
 0x2e4   : > { %5248 = vmatpush3.bf16.msra.mxu1 %v5619_v4  ;;  %5263 = vmatprep.mubr.msk.bf16.mxu1 %vm5766_vm2, %v5765_v10  ;;  %v5672_v4 = vld [vmem:[%s7152_s7 + $0x368] sm:$0xff]  }
 0x2e5   : > { %5244 = vmatmul.mubr.bf16.vlgmr.msra.gmra.mxu0 %v2767_v25  ;;  %5249 = vmatprep.subr.bf16.mxu1 %v5765_v10  ;;  %v5675_v25 = vld [vmem:[%s7152_s7 + $0x318] sm:$0xff]  }
 0x2e6   : > { %5268 = vmatpush3.bf16.msra.mxu0 %v5620_v7  ;;  %5283 = vmatprep.mubr.msk.bf16.mxu0 %vm5766_vm2, %v5765_v10  ;;  %v5674_v7 = vld [vmem:[%s7152_s7 + $0x360] sm:$0xff]  }
 0x2e7   : > { %5269 = vmatprep.subr.bf16.mxu0 %v5765_v10 }
 0x2e8   : > { %5250 = vmatpush3.bf16.msra.mxu1 %v5621_v36  ;;  %v5676_v36 = vld [vmem:[%s7152_s7 + $0x358] sm:$0xff]  }
 0x2e9   : > { %5251 = vmatprep.subr.bf16.mxu1 %v5765_v10 }
 0x2ea   : > { %5270 = vmatpush3.bf16.msra.mxu0 %v5622_v37  ;;  %v5677_v37 = vld [vmem:[%s7152_s7 + $0x310] sm:$0xff]  }
 0x2eb   : > { %5271 = vmatprep.subr.bf16.mxu0 %v5765_v10 }
 0x2ec   : > { %5252 = vmatpush3.bf16.msra.mxu1 %v5623_v38  ;;  %v5678_v38 = vld [vmem:[%s7152_s7 + $0x350] sm:$0xff]  }
 0x2ed   : > { %5253 = vmatprep.subr.bf16.mxu1 %v5765_v10 }
 0x2ee   : > { %5272 = vmatpush3.bf16.msra.mxu0 %v5624_v43  ;;  %v5679_v43 = vld [vmem:[%s7152_s7 + $0x308] sm:$0xff]  }
 0x2ef   : > { %5273 = vmatprep.subr.bf16.mxu0 %v5765_v10 }
 0x2f0   : > { %5254 = vmatpush3.bf16.msra.mxu1 %v5625_v6  ;;  %v5680_v6 = vld [vmem:[%s7152_s7 + $0x348] sm:$0xff]  }
 0x2f1   : > { %5255 = vmatprep.subr.bf16.mxu1 %v5765_v10 }
 0x2f2   : > { %5274 = vmatpush3.bf16.msra.mxu0 %v5626_v9  ;;  %v5681_v9 = vld [vmem:[%s7152_s7 + $0x300] sm:$0xff]  }
 0x2f3   : > { %5275 = vmatprep.subr.bf16.mxu0 %v5765_v10 }
 0x2f4   : > { %5256 = vmatpush3.bf16.msra.mxu1 %v5627_v11  ;;  %v5682_v11 = vld [vmem:[%s7152_s7 + $0x340] sm:$0xff]  }
 0x2f5   : > { %5257 = vmatprep.subr.bf16.mxu1 %v5765_v10 }
 0x2f6   : > { %5276 = vmatpush3.bf16.msra.mxu0 %v5628_v40  ;;  %v5683_v40 = vld [vmem:[%s7152_s7 + $0x3b8] sm:$0xff]  }
 0x2f7   : > { %5277 = vmatprep.subr.bf16.mxu0 %v5765_v10 }
 0x2f8   : > { %5258 = vmatpush3.bf16.msra.mxu1 %v5629_v45  ;;  %v3523_v45 = vrot.slane %v6589_v41, 6 }
 0x2f9   : > { %5259 = vmatprep.subr.bf16.mxu1 %v5765_v10 }
 0x2fa   : > { %5278 = vmatpush3.bf16.msra.mxu0 %v5630_v47  ;;  %v2209_v47 = vld [vmem:[%s7153_s8] sm:$0x1] }
 0x2fb   : > { %5279 = vmatprep.subr.bf16.mxu0 %v5765_v10 }
 0x2fc   : > { %5260 = vmatpush3.bf16.msra.mxu1 %v5631_v12  ;;  %v5684_v12 = vld [vmem:[%s7152_s7 + $0x3f8] sm:$0xff]  }
 0x2fd   : > { %5261 = vmatprep.subr.bf16.mxu1 %v5765_v10 }
 0x2fe   : > { %5280 = vmatpush3.bf16.msra.mxu0 %v5632_v39 }
 0x2ff   : > { %5281 = vmatprep.subr.bf16.mxu0 %v5765_v10 }
 0x300   : > { %5262 = vmatpush3.bf16.msra.mxu1 %v5633_v13  ;;  %v3631_v13 = vrot.slane %v6596_v28, 6 }
 0x301   : > { %5287 = vmatprep.subr.bf16.mxu1 %v5765_v10 }
 0x302   : > { %5282 = vmatpush3.bf16.msra.mxu0 %v5634_v42 }
 0x303   : > { %5264 = vmatmul.mubr.bf16.vlgmr.msra.gmra.mxu1 %v2875_v16  ;;  %5307 = vmatprep.subr.bf16.mxu0 %v5765_v10 }
 0x304   : > { %5288 = vmatpush3.bf16.msra.mxu1 %v5635_v15  ;;  %5303 = vmatprep.mubr.msk.bf16.mxu1 %vm5766_vm2, %v5765_v10  ;;  %v5685_v15 = vld [vmem:[%s7152_s7 + $0x3b0] sm:$0xff]  }
 0x305   : > { %5284 = vmatmul.mubr.bf16.vlgmr.msra.gmra.mxu0 %v2983_v31  ;;  %5289 = vmatprep.subr.bf16.mxu1 %v5765_v10 }
 0x306   : > { %5308 = vmatpush3.bf16.msra.mxu0 %v5636_v20  ;;  %5323 = vmatprep.mubr.msk.bf16.mxu0 %vm5766_vm2, %v5765_v10 }
 0x307   : > { %5309 = vmatprep.subr.bf16.mxu0 %v5765_v10 }
 0x308   : > { %5290 = vmatpush3.bf16.msra.mxu1 %v5637_v44  ;;  %v5686_v44 = vld [vmem:[%s7152_s7 + $0x3f0] sm:$0xff]  }
 0x309   : > { %5291 = vmatprep.subr.bf16.mxu1 %v5765_v10 }
 0x30a   : > { %5310 = vmatpush3.bf16.msra.mxu0 %v5638_v48 }
 0x30b   : > { %5311 = vmatprep.subr.bf16.mxu0 %v5765_v10 }
 0x30c   : > { %5292 = vmatpush3.bf16.msra.mxu1 %v5639_v22 }
 0x30d   : > { %5293 = vmatprep.subr.bf16.mxu1 %v5765_v10 }
 0x30e   : > { %5312 = vmatpush3.bf16.msra.mxu0 %v5640_v24  ;;  %v5687_v24 = vld [vmem:[%s7152_s7 + $0x3a8] sm:$0xff]  }
 0x30f   : > { %5313 = vmatprep.subr.bf16.mxu0 %v5765_v10 }
 0x310   : > { %5294 = vmatpush3.bf16.msra.mxu1 %v5641_v26 }
 0x311   : > { %5295 = vmatprep.subr.bf16.mxu1 %v5765_v10 }
 0x312   : > { %5314 = vmatpush3.bf16.msra.mxu0 %v5642_v35 }
 0x313   : > { %5315 = vmatprep.subr.bf16.mxu0 %v5765_v10 }
 0x314   : > { %5296 = vmatpush3.bf16.msra.mxu1 %v5643_v17  ;;  %v5688_v17 = vld [vmem:[%s7152_s7 + $0x3e8] sm:$0xff]  }
 0x315   : > { %5297 = vmatprep.subr.bf16.mxu1 %v5765_v10 }
 0x316   : > { %5316 = vmatpush3.bf16.msra.mxu0 %v5644_v46 }
 0x317   : > { %5317 = vmatprep.subr.bf16.mxu0 %v5765_v10 }
 0x318   : > { %5298 = vmatpush3.bf16.msra.mxu1 %v5645_v49  ;;  %v5689_v49 = vld [vmem:[%s7152_s7 + $0x3a0] sm:$0xff]  }
 0x319   : > { %5299 = vmatprep.subr.bf16.mxu1 %v5765_v10 }
 0x31a   : > { %5318 = vmatpush3.bf16.msra.mxu0 %v5646_v34  ;;  %v5690_v34 = vld [vmem:[%s7152_s7 + $0x3e0] sm:$0xff]  }
 0x31b   : > { %5319 = vmatprep.subr.bf16.mxu0 %v5765_v10 }
 0x31c   : > { %5300 = vmatpush3.bf16.msra.mxu1 %v5647_v33  ;;  %v5691_v33 = vld [vmem:[%s7152_s7 + $0x398] sm:$0xff]  }
 0x31d   : > { %5301 = vmatprep.subr.bf16.mxu1 %v5765_v10 }
 0x31e   : > { %5320 = vmatpush3.bf16.msra.mxu0 %v5648_v29  ;;  %v5692_v29 = vld [vmem:[%s7152_s7 + $0x3d8] sm:$0xff]  }
 0x31f   : > { %5321 = vmatprep.subr.bf16.mxu0 %v5765_v10 }
 0x320   : > { %5302 = vmatpush3.bf16.msra.mxu1 %v5649_v51  ;;  %v5693_v51 = vld [vmem:[%s7152_s7 + $0x390] sm:$0xff]  }
 0x321   : > { %5327 = vmatprep.subr.bf16.mxu1 %v5765_v10 }
 0x322   : > { %5322 = vmatpush3.bf16.msra.mxu0 %v5650_v52  ;;  %v5694_v52 = vld [vmem:[%s7152_s7 + $0x3d0] sm:$0xff]  }
 0x323   : > { %5304 = vmatmul.mubr.bf16.vlgmr.msra.gmra.mxu1 %v3091_v53  ;;  %5347 = vmatprep.subr.bf16.mxu0 %v5765_v10  ;;  %v5696_v53 = vld [vmem:[%s7152_s7 + $0x3c8] sm:$0xff]  }
 0x324   : > { %5328 = vmatpush3.bf16.msra.mxu1 %v5651_v60  ;;  %5343 = vmatprep.mubr.msk.bf16.mxu1 %vm5766_vm2, %v5765_v10  ;;  %v5695_v60 = vld [vmem:[%s7152_s7 + $0x388] sm:$0xff]  }
 0x325   : > { %5324 = vmatmul.mubr.bf16.vlgmr.msra.gmra.mxu0 %v3199_v55  ;;  %5329 = vmatprep.subr.bf16.mxu1 %v5765_v10  ;;  %v5698_v55 = vld [vmem:[%s7152_s7 + $0x3c0] sm:$0xff]  }
 0x326   : > { %5348 = vmatpush3.bf16.msra.mxu0 %v5652_v63  ;;  %5363 = vmatprep.mubr.msk.bf16.mxu0 %vm5766_vm2, %v5765_v10  ;;  %v5697_v63 = vld [vmem:[%s7152_s7 + $0x380] sm:$0xff]  }
 0x327   : > { %5349 = vmatprep.subr.bf16.mxu0 %v5765_v10 }
 0x328   : > { %5330 = vmatpush3.bf16.msra.mxu1 %v5653_v56  ;;  %v3739_v56 = vrot.slane %v6589_v41, 7 }
 0x329   : > { %5331 = vmatprep.subr.bf16.mxu1 %v5765_v10 }
 0x32a   : > { %5350 = vmatpush3.bf16.msra.mxu0 %v5654_v57 }
 0x32b   : > { %5351 = vmatprep.subr.bf16.mxu0 %v5765_v10 }
 0x32c   : > { %5332 = vmatpush3.bf16.msra.mxu1 %v5655_v59  ;;  %v3847_v59 = vrot.slane %v6596_v28, 7 }
 0x32d   : > { %5333 = vmatprep.subr.bf16.mxu1 %v5765_v10 }
 0x32e   : > { %5352 = vmatpush3.bf16.msra.mxu0 %v5656_v0 }
 0x32f   : > { %5353 = vmatprep.subr.bf16.mxu0 %v5765_v10 }
 0x330   : > { %5334 = vmatpush3.bf16.msra.mxu1 %v5657_v1 }
 0x331   : > { %5335 = vmatprep.subr.bf16.mxu1 %v5765_v10 }
 0x332   : > { %5354 = vmatpush3.bf16.msra.mxu0 %v5658_v2 }
 0x333   : > { %5355 = vmatprep.subr.bf16.mxu0 %v5765_v10 }
 0x334   : > { %5336 = vmatpush3.bf16.msra.mxu1 %v5659_v3 }
 0x335   : > { %5337 = vmatprep.subr.bf16.mxu1 %v5765_v10 }
 0x336   : > { %5356 = vmatpush3.bf16.msra.mxu0 %v5660_v50 }
 0x337   : > { %5357 = vmatprep.subr.bf16.mxu0 %v5765_v10 }
 0x338   : > { %5338 = vmatpush3.bf16.msra.mxu1 %v5661_v23 }
 0x339   : > { %5339 = vmatprep.subr.bf16.mxu1 %v5765_v10 }
 0x33a   : > { %5358 = vmatpush3.bf16.msra.mxu0 %v5662_v18 }
 0x33b   : > { %5359 = vmatprep.subr.bf16.mxu0 %v5765_v10 }
 0x33c   : > { %5340 = vmatpush3.bf16.msra.mxu1 %v5663_v30 }
 0x33d   : > { %5341 = vmatprep.subr.bf16.mxu1 %v5765_v10 }
 0x33e   : > { %5360 = vmatpush3.bf16.msra.mxu0 %v5664_v14 }
 0x33f   : > { %5361 = vmatprep.subr.bf16.mxu0 %v5765_v10 }
 0x340   : > { %5342 = vmatpush3.bf16.msra.mxu1 %v5665_v21 }
 0x341   : > { %5367 = vmatprep.subr.bf16.mxu1 %v5765_v10 }
 0x342   : > { %5362 = vmatpush3.bf16.msra.mxu0 %v5666_v58 }
 0x343   : > { %5344 = vmatmul.mubr.bf16.vlgmr.msra.gmra.mxu1 %v3307_v54  ;;  %5387 = vmatprep.subr.bf16.mxu0 %v5765_v10 }
 0x344   : > { %5368 = vmatpush3.bf16.msra.mxu1 %v5667_v62  ;;  %5383 = vmatprep.mubr.msk.bf16.mxu1 %vm5766_vm2, %v5765_v10 }
 0x345   : > { %5364 = vmatmul.mubr.bf16.vlgmr.msra.gmra.mxu0 %v3415_v61  ;;  %5369 = vmatprep.subr.bf16.mxu1 %v5765_v10 }
 0x346   : > { %5388 = vmatpush3.bf16.msra.mxu0 %v5668_v32  ;;  %5403 = vmatprep.mubr.msk.bf16.mxu0 %vm5766_vm2, %v5765_v10 }
 0x347   : > { %5389 = vmatprep.subr.bf16.mxu0 %v5765_v10 }
 0x348   : > { %5370 = vmatpush3.bf16.msra.mxu1 %v5669_v19 }
 0x349   : > { %5371 = vmatprep.subr.bf16.mxu1 %v5765_v10 }
 0x34a   : > { %5390 = vmatpush3.bf16.msra.mxu0 %v5670_v8 }
 0x34b   : > { %5391 = vmatprep.subr.bf16.mxu0 %v5765_v10 }
 0x34c   : > { %5372 = vmatpush3.bf16.msra.mxu1 %v5671_v27  ;;  %v3941_v27 = vld [vmem:[%s7154_s9 + $0x18] sm:$0xff] }
 0x34d   : > { %5373 = vmatprep.subr.bf16.mxu1 %v5765_v10 }
 0x34e   : > { %5392 = vmatpush3.bf16.msra.mxu0 %v5672_v4  ;;  %v3940_v4 = vld [vmem:[%s7154_s9 + $0x10] sm:$0xff] }
 0x34f   : > { %5393 = vmatprep.subr.bf16.mxu0 %v5765_v10 }
 0x350   : > { %5374 = vmatpush3.bf16.msra.mxu1 %v5673_v5 }
 0x351   : > { %5375 = vmatprep.subr.bf16.mxu1 %v5765_v10 }
 0x352   : > { %5394 = vmatpush3.bf16.msra.mxu0 %v5674_v7 }
 0x353   : > { %5395 = vmatprep.subr.bf16.mxu0 %v5765_v10 }
 0x354   : > { %5376 = vmatpush3.bf16.msra.mxu1 %v5675_v25  ;;  %v3939_v25 = vld [vmem:[%s7154_s9 + $0x8] sm:$0xff] }
 0x355   : > { %5377 = vmatprep.subr.bf16.mxu1 %v5765_v10 }
 0x356   : > { %5396 = vmatpush3.bf16.msra.mxu0 %v5676_v36 }
 0x357   : > { %5397 = vmatprep.subr.bf16.mxu0 %v5765_v10 }
 0x358   : > { %5378 = vmatpush3.bf16.msra.mxu1 %v5677_v37 }
 0x359   : > { %5379 = vmatprep.subr.bf16.mxu1 %v5765_v10 }
 0x35a   : > { %5398 = vmatpush3.bf16.msra.mxu0 %v5678_v38 }
 0x35b   : > { %5399 = vmatprep.subr.bf16.mxu0 %v5765_v10 }
 0x35c   : > { %5380 = vmatpush3.bf16.msra.mxu1 %v5679_v43  ;;  %v3938_v43 = vld [vmem:[%s7154_s9] sm:$0xff] }
 0x35d   : > { %5381 = vmatprep.subr.bf16.mxu1 %v5765_v10 }
 0x35e   : > { %5400 = vmatpush3.bf16.msra.mxu0 %v5680_v6 }
 0x35f   : > { %5401 = vmatprep.subr.bf16.mxu0 %v5765_v10 }
 0x360   : > { %5382 = vmatpush3.bf16.msra.mxu1 %v5681_v9 }
 0x361   : > { %5407 = vmatprep.subr.bf16.mxu1 %v5765_v10 }
 0x362   : > { %5402 = vmatpush3.bf16.msra.mxu0 %v5682_v11 }
 0x363   : > { %5384 = vmatmul.mubr.bf16.vlgmr.msra.gmra.mxu1 %v3523_v45  ;;  %v2308_v39 = vpop.f32.mrf.mxu1  ;;  %5427 = vmatprep.subr.bf16.mxu0 %v5765_v10 }
 0x364   : > { %v2314_v42 = vadd.f32 %v2308_v39, %v2209_v47  ;;  %5408 = vmatpush3.bf16.msra.mxu1 %v5683_v40  ;;  %5423 = vmatprep.mubr.msk.bf16.mxu1 %vm5766_vm2, %v5765_v10 }
 0x365   : > { %5404 = vmatmul.mubr.bf16.vlgmr.msra.gmra.mxu0 %v3631_v13  ;;  %v5145_v16 = vpop.f32.mrf.mxu1  ;;  %v2418_v20 = vpop.f32.mrf.mxu0  ;;  %5409 = vmatprep.subr.bf16.mxu1 %v5765_v10 }
 0x366   : > { %v2424_v31 = vadd.f32 %v2418_v20, %v2314_v42  ;;  %5428 = vmatpush3.bf16.msra.mxu0 %v5684_v12  ;;  %5443 = vmatprep.mubr.msk.bf16.mxu0 %vm5766_vm2, %v5765_v10 }
 0x367   : > { %v2311_v48 = vpop.f32.mrf.mxu1  ;;  %v5165_v22 = vpop.f32.mrf.mxu0  ;;  %5429 = vmatprep.subr.bf16.mxu0 %v5765_v10 }
 0x368   : > { %5410 = vmatpush3.bf16.msra.mxu1 %v5685_v15 }
 0x369   : > { %v5146_v26 = vpop.f32.mrf.mxu1  ;;  %v2421_v35 = vpop.f32.mrf.mxu0  ;;  %5411 = vmatprep.subr.bf16.mxu1 %v5765_v10 }
 0x36a   : > { %5430 = vmatpush3.bf16.msra.mxu0 %v5686_v44 }
 0x36b   : > { %v5166_v46 = vpop.f32.mrf.mxu0  ;;  %5431 = vmatprep.subr.bf16.mxu0 %v5765_v10 }
 0x36c   : > { %5412 = vmatpush3.bf16.msra.mxu1 %v5687_v24 }
 0x36d   : > { %5413 = vmatprep.subr.bf16.mxu1 %v5765_v10 }
 0x36e   : > { %5432 = vmatpush3.bf16.msra.mxu0 %v5688_v17 }
 0x36f   : > { %5433 = vmatprep.subr.bf16.mxu0 %v5765_v10 }
 0x370   : > { %5414 = vmatpush3.bf16.msra.mxu1 %v5689_v49 }
 0x371   : > { %5415 = vmatprep.subr.bf16.mxu1 %v5765_v10 }
 0x372   : > { %5434 = vmatpush3.bf16.msra.mxu0 %v5690_v34 }
 0x373   : > { %5435 = vmatprep.subr.bf16.mxu0 %v5765_v10 }
 0x374   : > { %5416 = vmatpush3.bf16.msra.mxu1 %v5691_v33 }
 0x375   : > { %5417 = vmatprep.subr.bf16.mxu1 %v5765_v10 }
 0x376   : > { %5436 = vmatpush3.bf16.msra.mxu0 %v5692_v29 }
 0x377   : > { %5437 = vmatprep.subr.bf16.mxu0 %v5765_v10 }
 0x378   : > { %5418 = vmatpush3.bf16.msra.mxu1 %v5693_v51 }
 0x379   : > { %5419 = vmatprep.subr.bf16.mxu1 %v5765_v10 }
 0x37a   : > { %5438 = vmatpush3.bf16.msra.mxu0 %v5694_v52 }
 0x37b   : > { %5439 = vmatprep.subr.bf16.mxu0 %v5765_v10 }
 0x37c   : > { %5420 = vmatpush3.bf16.msra.mxu1 %v5695_v60 }
 0x37d   : > { %5421 = vmatprep.subr.bf16.mxu1 %v5765_v10 }
 0x37e   : > { %5440 = vmatpush3.bf16.msra.mxu0 %v5696_v53 }
 0x37f   : > { %5441 = vmatprep.subr.bf16.mxu0 %v5765_v10 }
 0x380   : > { %5422 = vmatpush3.bf16.msra.mxu1 %v5697_v63 }
 0x381   : > { %5447 = vmatprep.subr.mxu1 %v5765_v10 }
 0x382   : > { %5442 = vmatpush3.bf16.msra.mxu0 %v5698_v55 }
 0x383   : > { %v2527_v57 = vpop.f32.mrf.mxu1  ;;  %5424 = vmatmul.mubr.bf16.vlgmr.msra.gmra.mxu1 %v3739_v56 }
 0x384   : > { %v2533_v0 = vadd.f32 %v2527_v57, %v2424_v31  ;;  %5455 = vmatprep.mubr.msk.f32.mxu1 %vm5766_vm2, %v5765_v10  ;;  %5448 = vmatpush3.msra.mxu1 %v3941_v27 }
 0x385   : > { %v5185_v1 = vpop.f32.mrf.mxu1  ;;  %v2635_v2 = vpop.f32.mrf.mxu0  ;;  %5444 = vmatmul.mubr.bf16.vlgmr.msra.gmra.mxu0 %v3847_v59  ;;  %5449 = vmatprep.subr.mxu1 %v5765_v10 }
 0x386   : > { %v2641_v3 = vadd.f32 %v2635_v2, %v2533_v0  ;;  %5450 = vmatpush3.msra.mxu1 %v3940_v4 }
 0x387   : > { %v2530_v50 = vpop.f32.mrf.mxu1  ;;  %v5205_v23 = vpop.f32.mrf.mxu0  ;;  %5451 = vmatprep.subr.mxu1 %v5765_v10 }
 0x388   : > { %5452 = vmatpush3.msra.mxu1 %v3939_v25 }
 0x389   : > { %v5186_v18 = vpop.f32.mrf.mxu1  ;;  %v2638_v30 = vpop.f32.mrf.mxu0  ;;  %5453 = vmatprep.subr.mxu1 %v5765_v10 }
 0x38a   : > { %5454 = vmatpush3.msra.mxu1 %v3938_v43 }
 0x38b   : > { %v5206_v41 = vpop.f32.mrf.mxu0 }
 0x3a3   : > { %v2743_v14 = vpop.f32.mrf.mxu1 }
 0x3a4   : > { %v2749_v21 = vadd.f32 %v2743_v14, %v2641_v3  ;;  %v3942_v14 = vld [vmem:[%s7155_s10] sm:$0x1] }
 0x3a5   : > { %v5225_v58 = vpop.f32.mrf.mxu1  ;;  %v2851_v62 = vpop.f32.mrf.mxu0 }
 0x3a6   : > { %v2857_v54 = vadd.f32 %v2851_v62, %v2749_v21 }
 0x3a7   : > { %v2746_v32 = vpop.f32.mrf.mxu1  ;;  %v5245_v28 = vpop.f32.mrf.mxu0 }
 0x3a9   : > { %v5226_v61 = vpop.f32.mrf.mxu1  ;;  %v2854_v19 = vpop.f32.mrf.mxu0 }
 0x3ab   : > { %v5246_v8 = vpop.f32.mrf.mxu0 }
 0x3c3   : > { %v2959_v5 = vpop.f32.mrf.mxu1 }
 0x3c4   : > { %v2965_v7 = vadd.f32 %v2959_v5, %v2857_v54 }
 0x3c5   : > { %v5265_v36 = vpop.f32.mrf.mxu1  ;;  %v3067_v37 = vpop.f32.mrf.mxu0 }
 0x3c6   : > { %v3073_v38 = vadd.f32 %v3067_v37, %v2965_v7 }
 0x3c7   : > { %v2962_v6 = vpop.f32.mrf.mxu1  ;;  %v5285_v9 = vpop.f32.mrf.mxu0 }
 0x3c9   : > { %v5266_v11 = vpop.f32.mrf.mxu1  ;;  %v3070_v40 = vpop.f32.mrf.mxu0 }
 0x3cb   : > { %v5286_v45 = vpop.f32.mrf.mxu0 }
 0x3e3   : > { %v3175_v47 = vpop.f32.mrf.mxu1 }
 0x3e4   : > { %v3181_v12 = vadd.f32 %v3175_v47, %v3073_v38 }
 0x3e5   : > { %v5305_v39 = vpop.f32.mrf.mxu1  ;;  %v3283_v13 = vpop.f32.mrf.mxu0 }
 0x3e6   : > { %v3289_v42 = vadd.f32 %v3283_v13, %v3181_v12 }
 0x3e7   : > { %v3178_v15 = vpop.f32.mrf.mxu1  ;;  %v5325_v16 = vpop.f32.mrf.mxu0 }
 0x3e9   : > { %v5306_v20 = vpop.f32.mrf.mxu1  ;;  %v3286_v31 = vpop.f32.mrf.mxu0 }
 0x3eb   : > { %v5326_v10 = vpop.f32.mrf.mxu0 }
 0x403   : > { %v3391_v44 = vpop.f32.mrf.mxu1 }
 0x404   : > { %v3397_v63 = vadd.f32 %v3391_v44, %v3289_v42 }
 0x405   : > { %v5345_v48 = vpop.f32.mrf.mxu1  ;;  %v3499_v22 = vpop.f32.mrf.mxu0 }
 0x406   : > { %v3505_v55 = vadd.f32 %v3499_v22, %v3397_v63 }
 0x407   : > { %v3394_v24 = vpop.f32.mrf.mxu1  ;;  %v5365_v26 = vpop.f32.mrf.mxu0 }
 0x409   : > { %v5346_v35 = vpop.f32.mrf.mxu1  ;;  %v3502_v17 = vpop.f32.mrf.mxu0 }
 0x40b   : > { %v5366_v46 = vpop.f32.mrf.mxu0 }
 0x423   : > { %v3607_v49 = vpop.f32.mrf.mxu1 }
 0x424   : > { %v3613_v56 = vadd.f32 %v3607_v49, %v3505_v55 }
 0x425   : > { %v5385_v34 = vpop.f32.mrf.mxu1  ;;  %v3715_v33 = vpop.f32.mrf.mxu0 }
 0x426   : > { %v3721_v57 = vadd.f32 %v3715_v33, %v3613_v56 }
 0x427   : > { %v3610_v29 = vpop.f32.mrf.mxu1  ;;  %v5405_v51 = vpop.f32.mrf.mxu0 }
 0x429   : > { %v5386_v52 = vpop.f32.mrf.mxu1  ;;  %v3718_v60 = vpop.f32.mrf.mxu0 }
 0x42b   : > { %v5406_v53 = vpop.f32.mrf.mxu0 }
 0x443   : > { %v3823_v59 = vpop.f32.mrf.mxu1 }
 0x444   : > { %v3829_v0 = vadd.f32 %v3823_v59, %v3721_v57 }
 0x445   : > { %v5425_v1 = vpop.f32.mrf.mxu1  ;;  %v3931_v2 = vpop.f32.mrf.mxu0 }
 0x446   : > { %v3937_v3 = vadd.f32 %v3931_v2, %v3829_v0 }
 0x447   : > { %v3826_v50 = vpop.f32.mrf.mxu1  ;;  %v5445_v23 = vpop.f32.mrf.mxu0 }
 0x448   : > { %5456 = vmatmul.mubr.msk.f32.vlgmr.msra.gmra.mxu1 %vm3943_vm0, %v3937_v3 }
 0x449   : > { %v5426_v18 = vpop.f32.mrf.mxu1  ;;  %v3934_v30 = vpop.f32.mrf.mxu0 }
 0x44b   : > { %v5446_v41 = vpop.f32.mrf.mxu0 }
 0x508   : > { %v4013_v21 = vpop.f32.mrf.mxu1 }
 0x509   : > { %v4014_v58 = vadd.f32 %v4013_v21, %v3942_v14 }
 0x50a   : > { %v5457_v62 = vpop.f32.mrf.mxu1 }
 0x50b   : > { %4018 = vst.msk [vmem:[%s378_s25] sm:$0x1] %vm4017_vm1, %v4014_v58 }
 0x50c   : > { %5716 = shalt.err (!%p5713_p3)
}
 0x50d   : > { %s5717_s24 = scalar_lea.hbm %s7110_s13, 16  ;;  %s5721_s30 = scalar_lea.hbm %s7156_s11, 32 }
 0x50e   : > { %p5718_p4 = scmp.ne.s32.totalorder %s7110_s13, %s5717_s24  ;;  %p5722_p9 = scmp.lt.s32.totalorder %s7110_s13, %s7156_s11 }
 0x50f   : > { %p5723_p10 = scmp.lt.s32.totalorder %s5721_s30, %s5717_s24 }
 0x510   : > { %p5719_p7 = pnand %p5718_p4, %p5866_p5 }
 0x511   : > { %p5724_p11 = por %p5723_p10, %p5722_p9 }
 0x512   : > { %p5720_p8 = pneg %p5719_p7 }
 0x514   : > { %p5725_p12 = pnand %p5724_p11, %p5720_p8 }
 0x516   : > { %5728 = shalt.err (!%p5725_p12)
}
 0x517   : > { %5458 = dma.vmem_to_hbm [thread:$0]  (%p5866_p5), %s4033_s29, 16, %s7110_s13, %s4020_s14  }
 0x518 PF: > { %p5464_p13 = scmp.ge.s32.totalorder %s5763_s20, 2  ;;  %s4044_s0 = sand.u32 1, %s5751_s17  }
 0x519   : > { %s4045_s16 = scalar_lea.sflag [#allocation4], %s4044_s0 }
 0x51a   : > { %p5461_p0 = pnand %p5464_p13, %p5870_p6 }
 0x51c   : > { %p5462_p1 = pneg %p5461_p0 }
 0x51e   : > { %5746 = dma.done.wait (%p5462_p1), %s4045_s16, 16  }
 0x51f   : > { %5748 = vsyncadd (%p5462_p1), %s4045_s16, 4294967280  ;;  %p21_p2 = scmp.ge.s32.totalorder %s5853_s23, 4   ;;  %s7161_s17 = smov %s5755_s18 }
 0x520   : > { %s7162_s18 = smov %s5759_s19  ;;  %s7163_s19 = smov %s5864_s26 }
 0x521   : > { %s7164_s20 = smov %s5853_s23  ;;  %23 = sbr.rel (!%p21_p2) target bundleno = 5 (0x5), region = 149 }
 0x526   :  { %4049 = vsyncpa [#allocation4], 1 }
 0x527   :  { %4051 = vsyncpa [#allocation4 + $0x1], 1 }

</bundles_post_ra>
